<compile_context>
chip_gen: v6e
topology: v6e:2x2x1
jax: 0.10.0
libtpu: 0.0.40
codegen_flags: <defaults>
</compile_context>

<pallas_src>
import jax
import jax.numpy as jnp
import numpy as np
from jax import lax
from jax.experimental import pallas as pl
from jax.experimental.pallas import tpu as pltpu


# ---------------------------------------------------------------------------
# Packed-parameter slab layout (rows = channel axis, <= 32; columns below).
# conv1 / conv3 im2col K is padded up to a multiple of 8 (extra cols zero).
K1, K1P = 25, 32        # conv1: 5x5 taps (Cin=1), padded K
K3, K3P = 45, 48        # conv3: 3x3 taps x 5 cin, padded K
KD = 288                # deconv: 9 sub-taps x 32 cin (already multiple of 8)

C_W1 = 0
C_B1 = C_W1 + K1P            # 32
C_A1 = C_B1 + 1              # 33
C_W2 = C_A1 + 1              # 34
C_B2 = C_W2 + 32             # 66
C_A2 = C_B2 + 1              # 67
C_W3 = C_A2 + 1              # 68
C_B3 = C_W3 + K3P            # 116
C_A3 = C_B3 + 1              # 117
C_W4 = C_A3 + 1              # 118
C_B4 = C_W4 + 5              # 123
C_A4 = C_B4 + 1              # 124
C_WD = C_A4 + 1              # 125
C_BD = C_WD + KD             # 413
P_COLS = C_BD + 1            # 414


def pack_params(p):
    """Pack every FSRCNN weight/bias/PReLU slope into one (32, P_COLS) f32
    slab so the kernel needs a single constant DMA.  Done once, outside jit."""
    slab = np.zeros((32, P_COLS), np.float32)

    def put(col, arr):
        arr = np.asarray(arr, np.float32)
        slab[:arr.shape[0], col:col + arr.shape[1]] = arr

    put(C_W1, np.asarray(p['w1']).reshape(32, 25))                 # [cout, kh*5+kw]
    put(C_B1, np.asarray(p['b1']).reshape(32, 1))
    put(C_A1, np.asarray(p['a1']).reshape(32, 1))
    put(C_W2, np.asarray(p['w2']).reshape(5, 32))                  # [cout, cin]
    put(C_B2, np.asarray(p['b2']).reshape(5, 1))
    put(C_A2, np.asarray(p['a2']).reshape(5, 1))
    w3 = np.transpose(np.asarray(p['w3']), (0, 2, 3, 1)).reshape(5, 45)
    put(C_W3, w3)                                                  # [cout,(kh*3+kw)*5+cin]
    put(C_B3, np.asarray(p['b3']).reshape(5, 1))
    put(C_A3, np.asarray(p['a3']).reshape(5, 1))
    put(C_W4, np.asarray(p['w4']).reshape(32, 5))                  # [cout, cin]
    put(C_B4, np.asarray(p['b4']).reshape(32, 1))
    put(C_A4, np.asarray(p['a4']).reshape(32, 1))
    # Deconv 9x9 / stride 3 -> nine 3x3 sub-pixel kernels.  Output pixel (v,u)
    # with v+4 = 3*mv+rv uses kernel row kh = 3*(2-ah)+rv, so flip the tap
    # axes; slab row = rv*3+ru, col = (ah*3+aw)*32 + cin.
    wd = np.asarray(p['wd'])[:, 0].reshape(32, 3, 3, 3, 3)         # [cin, th, rv, tw, ru]
    wd = wd[:, ::-1, :, ::-1, :]                                   # th->ah, tw->aw
    wd = np.transpose(wd, (2, 4, 1, 3, 0)).reshape(9, 288)
    put(C_WD, wd)
    put(C_BD, np.asarray(p['bd']).reshape(1, 1))
    return jnp.asarray(slab)


def _make_fsrcnn_kernel(H, W, B):
    """Fused FSRCNN kernel over a lane-stacked group of B (H, W) images."""
    H1, W1 = H - 4, W - 4
    Lb = B * H * W
    f32 = jnp.float32

    def kernel(x_ref, p_ref, o_ref, im1_ref, pad3_ref, im3_ref, pad5_ref, imd_ref):
        # ---- valid-lane mask from an in-kernel iota (no mask DMA).  Float
        # floor-div avoids vector integer div/mod.
        lane = lax.broadcasted_iota(jnp.int32, (1, Lb), 1).astype(f32)
        row = jnp.floor((lane + 0.5) * (1.0 / W))
        col = lane - row * W
        imrow = row - jnp.floor((row + 0.5) * (1.0 / H)) * H
        mask = ((col < W1) & (imrow < H1)).astype(f32)

        def bias_prelu(acc, n, c_bias, c_alpha):
            acc = acc + p_ref[0:n, c_bias:c_bias + 1]
            return jnp.where(acc > 0, acc, p_ref[0:n, c_alpha:c_alpha + 1] * acc)

        # ---- conv1: 5x5, 1 -> 32, valid.  im2col (25 taps, K padded to 32)
        # from ref slices + one MXU matmul.
        im1_ref[K1:K1P, :] = jnp.zeros((K1P - K1, Lb), f32)
        for kh in range(5):
            for kw in range(5):
                t = kh * 5 + kw
                off = kh * W + kw
                im1_ref[t:t + 1, :] = x_ref[0, :, off:off + Lb]
        a1 = jnp.dot(p_ref[0:32, C_W1:C_W1 + K1P], im1_ref[...],
                     preferred_element_type=f32)
        a1 = bias_prelu(a1, 32, C_B1, C_A1)

        # ---- conv2: 1x1, 32 -> 5 (single matmul).
        a2 = jnp.dot(p_ref[0:5, C_W2:C_W2 + 32], a1, preferred_element_type=f32)
        a2 = bias_prelu(a2, 5, C_B2, C_A2)

        # ---- conv3: 3x3, 5 -> 5, padding=1.  Zero only the halo lanes of the
        # padded stride-W grid, embed the masked map, build a (45, Lb) im2col
        # from ref slices, single matmul.
        pad3_ref[:, 0:W + 1] = jnp.zeros((5, W + 1), f32)
        pad3_ref[:, W + 1 + Lb:2 * W + 2 + Lb] = jnp.zeros((5, W + 1), f32)
        pad3_ref[:, W + 1:W + 1 + Lb] = a2 * mask
        im3_ref[K3:K3P, :] = jnp.zeros((K3P - K3, Lb), f32)
        for kh in range(3):
            for kw in range(3):
                t = kh * 3 + kw
                off = kh * W + kw
                im3_ref[t * 5:(t + 1) * 5, :] = pad3_ref[:, off:off + Lb]
        a3 = jnp.dot(p_ref[0:5, C_W3:C_W3 + K3P], im3_ref[...],
                     preferred_element_type=f32)
        a3 = bias_prelu(a3, 5, C_B3, C_A3)

        # ---- conv4: 1x1, 5 -> 32 (single matmul).
        a4 = jnp.dot(p_ref[0:32, C_W4:C_W4 + 5], a3, preferred_element_type=f32)
        a4 = bias_prelu(a4, 32, C_B4, C_A4)

        # ---- deconv 9x9 / stride 3 / pad 4, 32 -> 1 in sub-pixel form: nine
        # 3x3 sub-kernels -> 9 phase maps via ONE (9,288)x(288,Lb) matmul; the
        # zero-FLOP pixel shuffle + crop happens in the wrapper.
        pad5_ref[:, 0:2 * W + 2] = jnp.zeros((32, 2 * W + 2), f32)
        pad5_ref[:, 2 * W + 2 + Lb:4 * W + 4 + Lb] = jnp.zeros((32, 2 * W + 2), f32)
        pad5_ref[:, 2 * W + 2:2 * W + 2 + Lb] = a4 * mask
        for ah in range(3):
            for aw in range(3):
                t = ah * 3 + aw
                off = ah * W + aw
                imd_ref[t * 32:(t + 1) * 32, :] = pad5_ref[:, off:off + Lb]
        pm = jnp.dot(p_ref[0:9, C_WD:C_WD + KD], imd_ref[...],
                     preferred_element_type=f32) + p_ref[0:1, C_BD:C_BD + 1]
        o_ref[...] = pm.reshape(1, 9, Lb)       # lane-dense (Lb = multiple of 128 here)

    return kernel


def fsrcnn_forward(x_nchw, param_slab):
    """FSRCNN forward.  x_nchw: (N, 1, H, W) f32;  param_slab: pack_params(p)."""
    N, C, H, W = x_nchw.shape
    assert C == 1 and H > 4 and W > 4
    f32 = jnp.float32
    H1, W1 = H - 4, W - 4
    Hd, Wd = H1 + 1, W1 + 1
    Ho, Wo = 3 * H1 - 2, 3 * W1 - 2

    # Lane-stack B images per grid step (B divides N, <= ~2048 lanes / step).
    B = 1
    for d in range(1, N + 1):
        if N % d == 0 and d * H * W <= 2048:
            B = d
    G = N // B
    Lb = B * H * W
    Lpx = Lb + 4 * W + 4          # +4W+4 zero lanes keep conv1's last tap window in-bounds

    x_flat = x_nchw.astype(f32).reshape(G, 1, Lb)
    x_flat = jnp.pad(x_flat, ((0, 0), (0, 0), (0, 4 * W + 4)))

    pm = pl.pallas_call(
        _make_fsrcnn_kernel(H, W, B),
        out_shape=jax.ShapeDtypeStruct((G, 9, Lb), f32),
        grid=(G,),
        in_specs=[pl.BlockSpec((1, 1, Lpx), lambda g: (g, 0, 0)),      # image group (1 DMA)
                  pl.BlockSpec((32, P_COLS), lambda g: (0, 0))],       # packed params (1 DMA)
        out_specs=pl.BlockSpec((1, 9, Lb), lambda g: (g, 0, 0)),
        scratch_shapes=[pltpu.VMEM((K1P, Lb), f32),               # conv1 im2col
                        pltpu.VMEM((5, Lb + 2 * W + 2), f32),     # conv3 padded grid
                        pltpu.VMEM((K3P, Lb), f32),               # conv3 im2col
                        pltpu.VMEM((32, Lb + 4 * W + 4), f32),    # deconv padded grid
                        pltpu.VMEM((KD, Lb), f32)],               # deconv im2col
        compiler_params=pltpu.CompilerParams(
            # NOTE: on v7x with G even, pltpu.CORE_PARALLEL on this axis is the
            # lever that actually shards groups across the two TensorCores; the
            # test batch collapses to G == 1 so plain "parallel" is kept here.
            dimension_semantics=("parallel",)),
    )(x_flat, param_slab)

    # Sub-pixel interleave (depth -> space) + crop: pure data movement, one
    # small fused XLA transpose.
    # TODO(synk): for production sizes emit this interleave in-kernel with
    # strided phase stores to drop the extra XLA launch.
    pm6 = pm.reshape(G, 3, 3, B, H, W)[:, :, :, :, :Hd, :Wd]      # (g, rv, ru, b, mv, mu)
    full = jnp.transpose(pm6, (0, 3, 4, 1, 5, 2)).reshape(N, 3 * Hd, 3 * Wd)
    out = full[:, 4:4 + Ho, 4:4 + Wo]                             # v + 4 = 3*mv + rv
    return out.reshape(N, 1, Ho, Wo)


def ref_forward(x, p):
    """Pure-JAX reference with PyTorch NCHW/OIHW semantics."""
    def conv(x, w, b, pad):
        y = lax.conv_general_dilated(x, w, (1, 1), [(pad, pad), (pad, pad)],
                                     dimension_numbers=('NCHW', 'OIHW', 'NCHW'))
        return y + b[None, :, None, None]

    def prelu(x, a):
        return jnp.where(x > 0, x, a[None, :, None, None] * x)

    out = prelu(conv(x, p['w1'], p['b1'], 0), p['a1'])
    out = prelu(conv(out, p['w2'], p['b2'], 0), p['a2'])
    out = prelu(conv(out, p['w3'], p['b3'], 1), p['a3'])
    out = prelu(conv(out, p['w4'], p['b4'], 0), p['a4'])
    wd = p['wd']                                              # (Cin=32, Cout=1, 9, 9)
    w_conv = jnp.transpose(wd[:, :, ::-1, ::-1], (1, 0, 2, 3))
    out = lax.conv_general_dilated(out, w_conv, (1, 1), [(4, 4), (4, 4)],
                                   lhs_dilation=(3, 3),
                                   dimension_numbers=('NCHW', 'OIHW', 'NCHW'))
    return out + p['bd'][None, :, None, None]


if __name__ == "__main__":
    key = jax.random.PRNGKey(0)
    keys = jax.random.split(key, 11)
    # Deterministic synthetic parameters (shapes from FSRCNN_net.__init__,
    # stds from weight_init; PReLU slopes at the PyTorch default 0.25).
    params = {
        'w1': jax.random.normal(keys[0], (32, 1, 5, 5), jnp.float32) * 0.05,
        'b1': jax.random.normal(keys[1], (32,), jnp.float32) * 0.01,
        'a1': jnp.full((32,), 0.25, jnp.float32),
        'w2': jax.random.normal(keys[2], (5, 32, 1, 1), jnp.float32) * 0.6325,
        'b2': jax.random.normal(keys[3], (5,), jnp.float32) * 0.01,
        'a2': jnp.full((5,), 0.25, jnp.float32),
        'w3': jax.random.normal(keys[4], (5, 5, 3, 3), jnp.float32) * 0.2108,
        'b3': jax.random.normal(keys[5], (5,), jnp.float32) * 0.01,
        'a3': jnp.full((5,), 0.25, jnp.float32),
        'w4': jax.random.normal(keys[6], (32, 5, 1, 1), jnp.float32) * 0.25,
        'b4': jax.random.normal(keys[7], (32,), jnp.float32) * 0.01,
        'a4': jnp.full((32,), 0.25, jnp.float32),
        'wd': jax.random.normal(keys[8], (32, 1, 9, 9), jnp.float32) * 0.001,
        'bd': jax.random.normal(keys[9], (1,), jnp.float32) * 0.01,
    }

    x = jax.random.normal(keys[10], (2, 1, 16, 16), jnp.float32)   # NCHW, like PyTorch

    slab = pack_params(params)                 # one-time packing, outside jit
    fwd = jax.jit(fsrcnn_forward)
    out = jax.block_until_ready(fwd(x, slab))
    ref = jax.block_until_ready(ref_forward(x, params))

    assert out.shape == (2, 1, 34, 34), out.shape                  # (16-4)*3 - 2 = 34
    np.testing.assert_allclose(np.asarray(out), np.asarray(ref), rtol=1e-4, atol=1e-4)
    print("KERNEL_OK")
</pallas_src>

<mosaic_0001>
module attributes {stable_mosaic.version = 11 : i64} {
  func.func @kernel(%arg0: i32, %arg1: memref<1x1x580xf32, #tpu.memory_space<vmem>>, %arg2: memref<32x414xf32, #tpu.memory_space<vmem>>, %arg3: memref<1x9x512xf32, #tpu.memory_space<vmem>>, %arg4: memref<32x512xf32, #tpu.memory_space<vmem>>, %arg5: memref<5x546xf32, #tpu.memory_space<vmem>>, %arg6: memref<48x512xf32, #tpu.memory_space<vmem>>, %arg7: memref<32x580xf32, #tpu.memory_space<vmem>>, %arg8: memref<288x512xf32, #tpu.memory_space<vmem>>) attributes {dimension_semantics = [#tpu.dimension_semantics<parallel>], iteration_bounds = array<i64: 1>, scalar_prefetch = 0 : i64, scratch_operands = 5 : i64, tpu.core_type = #tpu.core_type<tc>, window_params = [{transform_indices = @transform_0, window_bounds = array<i64: 1, 1, 580>}, {pipeline_mode = #tpu.pipeline_mode<synchronous>, transform_indices = @transform_1, window_bounds = array<i64: 32, 414>}, {transform_indices = @transform_2, window_bounds = array<i64: 1, 9, 512>}]} {
    %0 = tpu.iota {dimensions = array<i32: 1>} : vector<1x512xi32>
    %1 = arith.sitofp %0 : vector<1x512xi32> to vector<1x512xf32>
    %cst = arith.constant 5.000000e-01 : f32
    %2 = vector.broadcast %cst : f32 to vector<1x512xf32>
    %3 = arith.addf %1, %2 : vector<1x512xf32>
    %cst_0 = arith.constant 6.250000e-02 : f32
    %4 = vector.broadcast %cst_0 : f32 to vector<1x512xf32>
    %5 = arith.mulf %3, %4 : vector<1x512xf32>
    %6 = math.floor %5 : vector<1x512xf32>
    %cst_1 = arith.constant 1.600000e+01 : f32
    %7 = vector.broadcast %cst_1 : f32 to vector<1x512xf32>
    %8 = arith.mulf %6, %7 : vector<1x512xf32>
    %9 = arith.subf %1, %8 : vector<1x512xf32>
    %cst_2 = arith.constant 5.000000e-01 : f32
    %10 = vector.broadcast %cst_2 : f32 to vector<1x512xf32>
    %11 = arith.addf %6, %10 : vector<1x512xf32>
    %cst_3 = arith.constant 6.250000e-02 : f32
    %12 = vector.broadcast %cst_3 : f32 to vector<1x512xf32>
    %13 = arith.mulf %11, %12 : vector<1x512xf32>
    %14 = math.floor %13 : vector<1x512xf32>
    %cst_4 = arith.constant 1.600000e+01 : f32
    %15 = vector.broadcast %cst_4 : f32 to vector<1x512xf32>
    %16 = arith.mulf %14, %15 : vector<1x512xf32>
    %17 = arith.subf %6, %16 : vector<1x512xf32>
    %cst_5 = arith.constant 1.200000e+01 : f32
    %18 = vector.broadcast %cst_5 : f32 to vector<1x512xf32>
    %19 = arith.cmpf olt, %9, %18 : vector<1x512xf32>
    %cst_6 = arith.constant 1.200000e+01 : f32
    %20 = vector.broadcast %cst_6 : f32 to vector<1x512xf32>
    %21 = arith.cmpf olt, %17, %20 : vector<1x512xf32>
    %22 = arith.andi %19, %21 : vector<1x512xi1>
    %23 = arith.extui %22 : vector<1x512xi1> to vector<1x512xi32>
    %24 = arith.sitofp %23 : vector<1x512xi32> to vector<1x512xf32>
    %cst_7 = arith.constant 0.000000e+00 : f32
    %25 = vector.broadcast %cst_7 : f32 to vector<7x512xf32>
    %c25 = arith.constant 25 : index
    %c0 = arith.constant 0 : index
    %26 = vector.load %arg4[%c25, %c0] : memref<32x512xf32, #tpu.memory_space<vmem>>, vector<7x512xf32>
    tpu.vector_store %arg4[%c25, %c0], %25 {strides = array<i32>} : memref<32x512xf32, #tpu.memory_space<vmem>>, vector<7x512xf32>,
    %c0_8 = arith.constant 0 : index
    %c0_9 = arith.constant 0 : index
    %c0_10 = arith.constant 0 : index
    %27 = vector.load %arg1[%c0_8, %c0_9, %c0_10] : memref<1x1x580xf32, #tpu.memory_space<vmem>>, vector<1x1x512xf32>
    %28 = vector.shape_cast %27 : vector<1x1x512xf32> to vector<1x512xf32>
    %c0_11 = arith.constant 0 : index
    %c0_12 = arith.constant 0 : index
    %29 = vector.load %arg4[%c0_11, %c0_12] : memref<32x512xf32, #tpu.memory_space<vmem>>, vector<1x512xf32>
    tpu.vector_store %arg4[%c0_11, %c0_12], %28 {strides = array<i32>} : memref<32x512xf32, #tpu.memory_space<vmem>>, vector<1x512xf32>,
    %c0_13 = arith.constant 0 : index
    %c0_14 = arith.constant 0 : index
    %c1 = arith.constant 1 : index
    %30 = vector.load %arg1[%c0_13, %c0_14, %c1] : memref<1x1x580xf32, #tpu.memory_space<vmem>>, vector<1x1x512xf32>
    %31 = vector.shape_cast %30 : vector<1x1x512xf32> to vector<1x512xf32>
    %c1_15 = arith.constant 1 : index
    %c0_16 = arith.constant 0 : index
    %32 = vector.load %arg4[%c1_15, %c0_16] : memref<32x512xf32, #tpu.memory_space<vmem>>, vector<1x512xf32>
    tpu.vector_store %arg4[%c1_15, %c0_16], %31 {strides = array<i32>} : memref<32x512xf32, #tpu.memory_space<vmem>>, vector<1x512xf32>,
    %c0_17 = arith.constant 0 : index
    %c0_18 = arith.constant 0 : index
    %c2 = arith.constant 2 : index
    %33 = vector.load %arg1[%c0_17, %c0_18, %c2] : memref<1x1x580xf32, #tpu.memory_space<vmem>>, vector<1x1x512xf32>
    %34 = vector.shape_cast %33 : vector<1x1x512xf32> to vector<1x512xf32>
    %c2_19 = arith.constant 2 : index
    %c0_20 = arith.constant 0 : index
    %35 = vector.load %arg4[%c2_19, %c0_20] : memref<32x512xf32, #tpu.memory_space<vmem>>, vector<1x512xf32>
    tpu.vector_store %arg4[%c2_19, %c0_20], %34 {strides = array<i32>} : memref<32x512xf32, #tpu.memory_space<vmem>>, vector<1x512xf32>,
    %c0_21 = arith.constant 0 : index
    %c0_22 = arith.constant 0 : index
    %c3 = arith.constant 3 : index
    %36 = vector.load %arg1[%c0_21, %c0_22, %c3] : memref<1x1x580xf32, #tpu.memory_space<vmem>>, vector<1x1x512xf32>
    %37 = vector.shape_cast %36 : vector<1x1x512xf32> to vector<1x512xf32>
    %c3_23 = arith.constant 3 : index
    %c0_24 = arith.constant 0 : index
    %38 = vector.load %arg4[%c3_23, %c0_24] : memref<32x512xf32, #tpu.memory_space<vmem>>, vector<1x512xf32>
    tpu.vector_store %arg4[%c3_23, %c0_24], %37 {strides = array<i32>} : memref<32x512xf32, #tpu.memory_space<vmem>>, vector<1x512xf32>,
    %c0_25 = arith.constant 0 : index
    %c0_26 = arith.constant 0 : index
    %c4 = arith.constant 4 : index
    %39 = vector.load %arg1[%c0_25, %c0_26, %c4] : memref<1x1x580xf32, #tpu.memory_space<vmem>>, vector<1x1x512xf32>
    %40 = vector.shape_cast %39 : vector<1x1x512xf32> to vector<1x512xf32>
    %c4_27 = arith.constant 4 : index
    %c0_28 = arith.constant 0 : index
    %41 = vector.load %arg4[%c4_27, %c0_28] : memref<32x512xf32, #tpu.memory_space<vmem>>, vector<1x512xf32>
    tpu.vector_store %arg4[%c4_27, %c0_28], %40 {strides = array<i32>} : memref<32x512xf32, #tpu.memory_space<vmem>>, vector<1x512xf32>,
    %c0_29 = arith.constant 0 : index
    %c0_30 = arith.constant 0 : index
    %c16 = arith.constant 16 : index
    %42 = vector.load %arg1[%c0_29, %c0_30, %c16] : memref<1x1x580xf32, #tpu.memory_space<vmem>>, vector<1x1x512xf32>
    %43 = vector.shape_cast %42 : vector<1x1x512xf32> to vector<1x512xf32>
    %c5 = arith.constant 5 : index
    %c0_31 = arith.constant 0 : index
    %44 = vector.load %arg4[%c5, %c0_31] : memref<32x512xf32, #tpu.memory_space<vmem>>, vector<1x512xf32>
    tpu.vector_store %arg4[%c5, %c0_31], %43 {strides = array<i32>} : memref<32x512xf32, #tpu.memory_space<vmem>>, vector<1x512xf32>,
    %c0_32 = arith.constant 0 : index
    %c0_33 = arith.constant 0 : index
    %c17 = arith.constant 17 : index
    %45 = vector.load %arg1[%c0_32, %c0_33, %c17] : memref<1x1x580xf32, #tpu.memory_space<vmem>>, vector<1x1x512xf32>
    %46 = vector.shape_cast %45 : vector<1x1x512xf32> to vector<1x512xf32>
    %c6 = arith.constant 6 : index
    %c0_34 = arith.constant 0 : index
    %47 = vector.load %arg4[%c6, %c0_34] : memref<32x512xf32, #tpu.memory_space<vmem>>, vector<1x512xf32>
    tpu.vector_store %arg4[%c6, %c0_34], %46 {strides = array<i32>} : memref<32x512xf32, #tpu.memory_space<vmem>>, vector<1x512xf32>,
    %c0_35 = arith.constant 0 : index
    %c0_36 = arith.constant 0 : index
    %c18 = arith.constant 18 : index
    %48 = vector.load %arg1[%c0_35, %c0_36, %c18] : memref<1x1x580xf32, #tpu.memory_space<vmem>>, vector<1x1x512xf32>
    %49 = vector.shape_cast %48 : vector<1x1x512xf32> to vector<1x512xf32>
    %c7 = arith.constant 7 : index
    %c0_37 = arith.constant 0 : index
    %50 = vector.load %arg4[%c7, %c0_37] : memref<32x512xf32, #tpu.memory_space<vmem>>, vector<1x512xf32>
    tpu.vector_store %arg4[%c7, %c0_37], %49 {strides = array<i32>} : memref<32x512xf32, #tpu.memory_space<vmem>>, vector<1x512xf32>,
    %c0_38 = arith.constant 0 : index
    %c0_39 = arith.constant 0 : index
    %c19 = arith.constant 19 : index
    %51 = vector.load %arg1[%c0_38, %c0_39, %c19] : memref<1x1x580xf32, #tpu.memory_space<vmem>>, vector<1x1x512xf32>
    %52 = vector.shape_cast %51 : vector<1x1x512xf32> to vector<1x512xf32>
    %c8 = arith.constant 8 : index
    %c0_40 = arith.constant 0 : index
    %53 = vector.load %arg4[%c8, %c0_40] : memref<32x512xf32, #tpu.memory_space<vmem>>, vector<1x512xf32>
    tpu.vector_store %arg4[%c8, %c0_40], %52 {strides = array<i32>} : memref<32x512xf32, #tpu.memory_space<vmem>>, vector<1x512xf32>,
    %c0_41 = arith.constant 0 : index
    %c0_42 = arith.constant 0 : index
    %c20 = arith.constant 20 : index
    %54 = vector.load %arg1[%c0_41, %c0_42, %c20] : memref<1x1x580xf32, #tpu.memory_space<vmem>>, vector<1x1x512xf32>
    %55 = vector.shape_cast %54 : vector<1x1x512xf32> to vector<1x512xf32>
    %c9 = arith.constant 9 : index
    %c0_43 = arith.constant 0 : index
    %56 = vector.load %arg4[%c9, %c0_43] : memref<32x512xf32, #tpu.memory_space<vmem>>, vector<1x512xf32>
    tpu.vector_store %arg4[%c9, %c0_43], %55 {strides = array<i32>} : memref<32x512xf32, #tpu.memory_space<vmem>>, vector<1x512xf32>,
    %c0_44 = arith.constant 0 : index
    %c0_45 = arith.constant 0 : index
    %c32 = arith.constant 32 : index
    %57 = vector.load %arg1[%c0_44, %c0_45, %c32] : memref<1x1x580xf32, #tpu.memory_space<vmem>>, vector<1x1x512xf32>
    %58 = vector.shape_cast %57 : vector<1x1x512xf32> to vector<1x512xf32>
    %c10 = arith.constant 10 : index
    %c0_46 = arith.constant 0 : index
    %59 = vector.load %arg4[%c10, %c0_46] : memref<32x512xf32, #tpu.memory_space<vmem>>, vector<1x512xf32>
    tpu.vector_store %arg4[%c10, %c0_46], %58 {strides = array<i32>} : memref<32x512xf32, #tpu.memory_space<vmem>>, vector<1x512xf32>,
    %c0_47 = arith.constant 0 : index
    %c0_48 = arith.constant 0 : index
    %c33 = arith.constant 33 : index
    %60 = vector.load %arg1[%c0_47, %c0_48, %c33] : memref<1x1x580xf32, #tpu.memory_space<vmem>>, vector<1x1x512xf32>
    %61 = vector.shape_cast %60 : vector<1x1x512xf32> to vector<1x512xf32>
    %c11 = arith.constant 11 : index
    %c0_49 = arith.constant 0 : index
    %62 = vector.load %arg4[%c11, %c0_49] : memref<32x512xf32, #tpu.memory_space<vmem>>, vector<1x512xf32>
    tpu.vector_store %arg4[%c11, %c0_49], %61 {strides = array<i32>} : memref<32x512xf32, #tpu.memory_space<vmem>>, vector<1x512xf32>,
    %c0_50 = arith.constant 0 : index
    %c0_51 = arith.constant 0 : index
    %c34 = arith.constant 34 : index
    %63 = vector.load %arg1[%c0_50, %c0_51, %c34] : memref<1x1x580xf32, #tpu.memory_space<vmem>>, vector<1x1x512xf32>
    %64 = vector.shape_cast %63 : vector<1x1x512xf32> to vector<1x512xf32>
    %c12 = arith.constant 12 : index
    %c0_52 = arith.constant 0 : index
    %65 = vector.load %arg4[%c12, %c0_52] : memref<32x512xf32, #tpu.memory_space<vmem>>, vector<1x512xf32>
    tpu.vector_store %arg4[%c12, %c0_52], %64 {strides = array<i32>} : memref<32x512xf32, #tpu.memory_space<vmem>>, vector<1x512xf32>,
    %c0_53 = arith.constant 0 : index
    %c0_54 = arith.constant 0 : index
    %c35 = arith.constant 35 : index
    %66 = vector.load %arg1[%c0_53, %c0_54, %c35] : memref<1x1x580xf32, #tpu.memory_space<vmem>>, vector<1x1x512xf32>
    %67 = vector.shape_cast %66 : vector<1x1x512xf32> to vector<1x512xf32>
    %c13 = arith.constant 13 : index
    %c0_55 = arith.constant 0 : index
    %68 = vector.load %arg4[%c13, %c0_55] : memref<32x512xf32, #tpu.memory_space<vmem>>, vector<1x512xf32>
    tpu.vector_store %arg4[%c13, %c0_55], %67 {strides = array<i32>} : memref<32x512xf32, #tpu.memory_space<vmem>>, vector<1x512xf32>,
    %c0_56 = arith.constant 0 : index
    %c0_57 = arith.constant 0 : index
    %c36 = arith.constant 36 : index
    %69 = vector.load %arg1[%c0_56, %c0_57, %c36] : memref<1x1x580xf32, #tpu.memory_space<vmem>>, vector<1x1x512xf32>
    %70 = vector.shape_cast %69 : vector<1x1x512xf32> to vector<1x512xf32>
    %c14 = arith.constant 14 : index
    %c0_58 = arith.constant 0 : index
    %71 = vector.load %arg4[%c14, %c0_58] : memref<32x512xf32, #tpu.memory_space<vmem>>, vector<1x512xf32>
    tpu.vector_store %arg4[%c14, %c0_58], %70 {strides = array<i32>} : memref<32x512xf32, #tpu.memory_space<vmem>>, vector<1x512xf32>,
    %c0_59 = arith.constant 0 : index
    %c0_60 = arith.constant 0 : index
    %c48 = arith.constant 48 : index
    %72 = vector.load %arg1[%c0_59, %c0_60, %c48] : memref<1x1x580xf32, #tpu.memory_space<vmem>>, vector<1x1x512xf32>
    %73 = vector.shape_cast %72 : vector<1x1x512xf32> to vector<1x512xf32>
    %c15 = arith.constant 15 : index
    %c0_61 = arith.constant 0 : index
    %74 = vector.load %arg4[%c15, %c0_61] : memref<32x512xf32, #tpu.memory_space<vmem>>, vector<1x512xf32>
    tpu.vector_store %arg4[%c15, %c0_61], %73 {strides = array<i32>} : memref<32x512xf32, #tpu.memory_space<vmem>>, vector<1x512xf32>,
    %c0_62 = arith.constant 0 : index
    %c0_63 = arith.constant 0 : index
    %c49 = arith.constant 49 : index
    %75 = vector.load %arg1[%c0_62, %c0_63, %c49] : memref<1x1x580xf32, #tpu.memory_space<vmem>>, vector<1x1x512xf32>
    %76 = vector.shape_cast %75 : vector<1x1x512xf32> to vector<1x512xf32>
    %c16_64 = arith.constant 16 : index
    %c0_65 = arith.constant 0 : index
    %77 = vector.load %arg4[%c16_64, %c0_65] : memref<32x512xf32, #tpu.memory_space<vmem>>, vector<1x512xf32>
    tpu.vector_store %arg4[%c16_64, %c0_65], %76 {strides = array<i32>} : memref<32x512xf32, #tpu.memory_space<vmem>>, vector<1x512xf32>,
    %c0_66 = arith.constant 0 : index
    %c0_67 = arith.constant 0 : index
    %c50 = arith.constant 50 : index
    %78 = vector.load %arg1[%c0_66, %c0_67, %c50] : memref<1x1x580xf32, #tpu.memory_space<vmem>>, vector<1x1x512xf32>
    %79 = vector.shape_cast %78 : vector<1x1x512xf32> to vector<1x512xf32>
    %c17_68 = arith.constant 17 : index
    %c0_69 = arith.constant 0 : index
    %80 = vector.load %arg4[%c17_68, %c0_69] : memref<32x512xf32, #tpu.memory_space<vmem>>, vector<1x512xf32>
    tpu.vector_store %arg4[%c17_68, %c0_69], %79 {strides = array<i32>} : memref<32x512xf32, #tpu.memory_space<vmem>>, vector<1x512xf32>,
    %c0_70 = arith.constant 0 : index
    %c0_71 = arith.constant 0 : index
    %c51 = arith.constant 51 : index
    %81 = vector.load %arg1[%c0_70, %c0_71, %c51] : memref<1x1x580xf32, #tpu.memory_space<vmem>>, vector<1x1x512xf32>
    %82 = vector.shape_cast %81 : vector<1x1x512xf32> to vector<1x512xf32>
    %c18_72 = arith.constant 18 : index
    %c0_73 = arith.constant 0 : index
    %83 = vector.load %arg4[%c18_72, %c0_73] : memref<32x512xf32, #tpu.memory_space<vmem>>, vector<1x512xf32>
    tpu.vector_store %arg4[%c18_72, %c0_73], %82 {strides = array<i32>} : memref<32x512xf32, #tpu.memory_space<vmem>>, vector<1x512xf32>,
    %c0_74 = arith.constant 0 : index
    %c0_75 = arith.constant 0 : index
    %c52 = arith.constant 52 : index
    %84 = vector.load %arg1[%c0_74, %c0_75, %c52] : memref<1x1x580xf32, #tpu.memory_space<vmem>>, vector<1x1x512xf32>
    %85 = vector.shape_cast %84 : vector<1x1x512xf32> to vector<1x512xf32>
    %c19_76 = arith.constant 19 : index
    %c0_77 = arith.constant 0 : index
    %86 = vector.load %arg4[%c19_76, %c0_77] : memref<32x512xf32, #tpu.memory_space<vmem>>, vector<1x512xf32>
    tpu.vector_store %arg4[%c19_76, %c0_77], %85 {strides = array<i32>} : memref<32x512xf32, #tpu.memory_space<vmem>>, vector<1x512xf32>,
    %c0_78 = arith.constant 0 : index
    %c0_79 = arith.constant 0 : index
    %c64 = arith.constant 64 : index
    %87 = vector.load %arg1[%c0_78, %c0_79, %c64] : memref<1x1x580xf32, #tpu.memory_space<vmem>>, vector<1x1x512xf32>
    %88 = vector.shape_cast %87 : vector<1x1x512xf32> to vector<1x512xf32>
    %c20_80 = arith.constant 20 : index
    %c0_81 = arith.constant 0 : index
    %89 = vector.load %arg4[%c20_80, %c0_81] : memref<32x512xf32, #tpu.memory_space<vmem>>, vector<1x512xf32>
    tpu.vector_store %arg4[%c20_80, %c0_81], %88 {strides = array<i32>} : memref<32x512xf32, #tpu.memory_space<vmem>>, vector<1x512xf32>,
    %c0_82 = arith.constant 0 : index
    %c0_83 = arith.constant 0 : index
    %c65 = arith.constant 65 : index
    %90 = vector.load %arg1[%c0_82, %c0_83, %c65] : memref<1x1x580xf32, #tpu.memory_space<vmem>>, vector<1x1x512xf32>
    %91 = vector.shape_cast %90 : vector<1x1x512xf32> to vector<1x512xf32>
    %c21 = arith.constant 21 : index
    %c0_84 = arith.constant 0 : index
    %92 = vector.load %arg4[%c21, %c0_84] : memref<32x512xf32, #tpu.memory_space<vmem>>, vector<1x512xf32>
    tpu.vector_store %arg4[%c21, %c0_84], %91 {strides = array<i32>} : memref<32x512xf32, #tpu.memory_space<vmem>>, vector<1x512xf32>,
    %c0_85 = arith.constant 0 : index
    %c0_86 = arith.constant 0 : index
    %c66 = arith.constant 66 : index
    %93 = vector.load %arg1[%c0_85, %c0_86, %c66] : memref<1x1x580xf32, #tpu.memory_space<vmem>>, vector<1x1x512xf32>
    %94 = vector.shape_cast %93 : vector<1x1x512xf32> to vector<1x512xf32>
    %c22 = arith.constant 22 : index
    %c0_87 = arith.constant 0 : index
    %95 = vector.load %arg4[%c22, %c0_87] : memref<32x512xf32, #tpu.memory_space<vmem>>, vector<1x512xf32>
    tpu.vector_store %arg4[%c22, %c0_87], %94 {strides = array<i32>} : memref<32x512xf32, #tpu.memory_space<vmem>>, vector<1x512xf32>,
    %c0_88 = arith.constant 0 : index
    %c0_89 = arith.constant 0 : index
    %c67 = arith.constant 67 : index
    %96 = vector.load %arg1[%c0_88, %c0_89, %c67] : memref<1x1x580xf32, #tpu.memory_space<vmem>>, vector<1x1x512xf32>
    %97 = vector.shape_cast %96 : vector<1x1x512xf32> to vector<1x512xf32>
    %c23 = arith.constant 23 : index
    %c0_90 = arith.constant 0 : index
    %98 = vector.load %arg4[%c23, %c0_90] : memref<32x512xf32, #tpu.memory_space<vmem>>, vector<1x512xf32>
    tpu.vector_store %arg4[%c23, %c0_90], %97 {strides = array<i32>} : memref<32x512xf32, #tpu.memory_space<vmem>>, vector<1x512xf32>,
    %c0_91 = arith.constant 0 : index
    %c0_92 = arith.constant 0 : index
    %c68 = arith.constant 68 : index
    %99 = vector.load %arg1[%c0_91, %c0_92, %c68] : memref<1x1x580xf32, #tpu.memory_space<vmem>>, vector<1x1x512xf32>
    %100 = vector.shape_cast %99 : vector<1x1x512xf32> to vector<1x512xf32>
    %c24 = arith.constant 24 : index
    %c0_93 = arith.constant 0 : index
    %101 = vector.load %arg4[%c24, %c0_93] : memref<32x512xf32, #tpu.memory_space<vmem>>, vector<1x512xf32>
    tpu.vector_store %arg4[%c24, %c0_93], %100 {strides = array<i32>} : memref<32x512xf32, #tpu.memory_space<vmem>>, vector<1x512xf32>,
    %c0_94 = arith.constant 0 : index
    %c0_95 = arith.constant 0 : index
    %102 = vector.load %arg2[%c0_94, %c0_95] : memref<32x414xf32, #tpu.memory_space<vmem>>, vector<32x32xf32>
    %c0_96 = arith.constant 0 : index
    %c0_97 = arith.constant 0 : index
    %103 = vector.load %arg4[%c0_96, %c0_97] : memref<32x512xf32, #tpu.memory_space<vmem>>, vector<32x512xf32>
    %cst_98 = arith.constant dense<0.000000e+00> : vector<32x512xf32>
    %104 = tpu.matmul %102, %103, %cst_98 {dimension_numbers = #tpu.dot_dimension_numbers<[1], [0], [0], [1], [0, 0, 1, 1], [], []>} : vector<32x32xf32>, vector<32x512xf32>, vector<32x512xf32> -> vector<32x512xf32>
    %c0_99 = arith.constant 0 : index
    %c32_100 = arith.constant 32 : index
    %105 = vector.load %arg2[%c0_99, %c32_100] : memref<32x414xf32, #tpu.memory_space<vmem>>, vector<32x1xf32>
    %106 = vector.broadcast %105 : vector<32x1xf32> to vector<32x512xf32>
    %107 = arith.addf %104, %106 : vector<32x512xf32>
    %cst_101 = arith.constant 0.000000e+00 : f32
    %108 = vector.broadcast %cst_101 : f32 to vector<32x512xf32>
    %109 = arith.cmpf ogt, %107, %108 : vector<32x512xf32>
    %c0_102 = arith.constant 0 : index
    %c33_103 = arith.constant 33 : index
    %110 = vector.load %arg2[%c0_102, %c33_103] : memref<32x414xf32, #tpu.memory_space<vmem>>, vector<32x1xf32>
    %111 = vector.broadcast %110 : vector<32x1xf32> to vector<32x512xf32>
    %112 = arith.mulf %111, %107 : vector<32x512xf32>
    %113 = arith.select %109, %107, %112 : vector<32x512xi1>, vector<32x512xf32>
    %c0_104 = arith.constant 0 : index
    %c34_105 = arith.constant 34 : index
    %114 = vector.load %arg2[%c0_104, %c34_105] : memref<32x414xf32, #tpu.memory_space<vmem>>, vector<5x32xf32>
    %cst_106 = arith.constant dense<0.000000e+00> : vector<5x512xf32>
    %115 = tpu.matmul %114, %113, %cst_106 {dimension_numbers = #tpu.dot_dimension_numbers<[1], [0], [0], [1], [0, 0, 1, 1], [], []>} : vector<5x32xf32>, vector<32x512xf32>, vector<5x512xf32> -> vector<5x512xf32>
    %c0_107 = arith.constant 0 : index
    %c66_108 = arith.constant 66 : index
    %116 = vector.load %arg2[%c0_107, %c66_108] : memref<32x414xf32, #tpu.memory_space<vmem>>, vector<5x1xf32>
    %117 = vector.broadcast %116 : vector<5x1xf32> to vector<5x512xf32>
    %118 = arith.addf %115, %117 : vector<5x512xf32>
    %cst_109 = arith.constant 0.000000e+00 : f32
    %119 = vector.broadcast %cst_109 : f32 to vector<5x512xf32>
    %120 = arith.cmpf ogt, %118, %119 : vector<5x512xf32>
    %c0_110 = arith.constant 0 : index
    %c67_111 = arith.constant 67 : index
    %121 = vector.load %arg2[%c0_110, %c67_111] : memref<32x414xf32, #tpu.memory_space<vmem>>, vector<5x1xf32>
    %122 = vector.broadcast %121 : vector<5x1xf32> to vector<5x512xf32>
    %123 = arith.mulf %122, %118 : vector<5x512xf32>
    %124 = arith.select %120, %118, %123 : vector<5x512xi1>, vector<5x512xf32>
    %cst_112 = arith.constant 0.000000e+00 : f32
    %125 = vector.broadcast %cst_112 : f32 to vector<5x17xf32>
    %c0_113 = arith.constant 0 : index
    %c0_114 = arith.constant 0 : index
    %126 = vector.load %arg5[%c0_113, %c0_114] : memref<5x546xf32, #tpu.memory_space<vmem>>, vector<5x17xf32>
    tpu.vector_store %arg5[%c0_113, %c0_114], %125 {strides = array<i32>} : memref<5x546xf32, #tpu.memory_space<vmem>>, vector<5x17xf32>,
    %cst_115 = arith.constant 0.000000e+00 : f32
    %127 = vector.broadcast %cst_115 : f32 to vector<5x17xf32>
    %c0_116 = arith.constant 0 : index
    %c529 = arith.constant 529 : index
    %128 = vector.load %arg5[%c0_116, %c529] : memref<5x546xf32, #tpu.memory_space<vmem>>, vector<5x17xf32>
    tpu.vector_store %arg5[%c0_116, %c529], %127 {strides = array<i32>} : memref<5x546xf32, #tpu.memory_space<vmem>>, vector<5x17xf32>,
    %129 = vector.broadcast %24 : vector<1x512xf32> to vector<5x512xf32>
    %130 = arith.mulf %124, %129 : vector<5x512xf32>
    %c0_117 = arith.constant 0 : index
    %c17_118 = arith.constant 17 : index
    %131 = vector.load %arg5[%c0_117, %c17_118] : memref<5x546xf32, #tpu.memory_space<vmem>>, vector<5x512xf32>
    tpu.vector_store %arg5[%c0_117, %c17_118], %130 {strides = array<i32>} : memref<5x546xf32, #tpu.memory_space<vmem>>, vector<5x512xf32>,
    %cst_119 = arith.constant 0.000000e+00 : f32
    %132 = vector.broadcast %cst_119 : f32 to vector<3x512xf32>
    %c45 = arith.constant 45 : index
    %c0_120 = arith.constant 0 : index
    %133 = vector.load %arg6[%c45, %c0_120] : memref<48x512xf32, #tpu.memory_space<vmem>>, vector<3x512xf32>
    tpu.vector_store %arg6[%c45, %c0_120], %132 {strides = array<i32>} : memref<48x512xf32, #tpu.memory_space<vmem>>, vector<3x512xf32>,
    %c0_121 = arith.constant 0 : index
    %c0_122 = arith.constant 0 : index
    %134 = vector.load %arg5[%c0_121, %c0_122] : memref<5x546xf32, #tpu.memory_space<vmem>>, vector<5x512xf32>
    %c0_123 = arith.constant 0 : index
    %c0_124 = arith.constant 0 : index
    %135 = vector.load %arg6[%c0_123, %c0_124] : memref<48x512xf32, #tpu.memory_space<vmem>>, vector<5x512xf32>
    tpu.vector_store %arg6[%c0_123, %c0_124], %134 {strides = array<i32>} : memref<48x512xf32, #tpu.memory_space<vmem>>, vector<5x512xf32>,
    %c0_125 = arith.constant 0 : index
    %c1_126 = arith.constant 1 : index
    %136 = vector.load %arg5[%c0_125, %c1_126] : memref<5x546xf32, #tpu.memory_space<vmem>>, vector<5x512xf32>
    %c5_127 = arith.constant 5 : index
    %c0_128 = arith.constant 0 : index
    %137 = vector.load %arg6[%c5_127, %c0_128] : memref<48x512xf32, #tpu.memory_space<vmem>>, vector<5x512xf32>
    tpu.vector_store %arg6[%c5_127, %c0_128], %136 {strides = array<i32>} : memref<48x512xf32, #tpu.memory_space<vmem>>, vector<5x512xf32>,
    %c0_129 = arith.constant 0 : index
    %c2_130 = arith.constant 2 : index
    %138 = vector.load %arg5[%c0_129, %c2_130] : memref<5x546xf32, #tpu.memory_space<vmem>>, vector<5x512xf32>
    %c10_131 = arith.constant 10 : index
    %c0_132 = arith.constant 0 : index
    %139 = vector.load %arg6[%c10_131, %c0_132] : memref<48x512xf32, #tpu.memory_space<vmem>>, vector<5x512xf32>
    tpu.vector_store %arg6[%c10_131, %c0_132], %138 {strides = array<i32>} : memref<48x512xf32, #tpu.memory_space<vmem>>, vector<5x512xf32>,
    %c0_133 = arith.constant 0 : index
    %c16_134 = arith.constant 16 : index
    %140 = vector.load %arg5[%c0_133, %c16_134] : memref<5x546xf32, #tpu.memory_space<vmem>>, vector<5x512xf32>
    %c15_135 = arith.constant 15 : index
    %c0_136 = arith.constant 0 : index
    %141 = vector.load %arg6[%c15_135, %c0_136] : memref<48x512xf32, #tpu.memory_space<vmem>>, vector<5x512xf32>
    tpu.vector_store %arg6[%c15_135, %c0_136], %140 {strides = array<i32>} : memref<48x512xf32, #tpu.memory_space<vmem>>, vector<5x512xf32>,
    %c0_137 = arith.constant 0 : index
    %c17_138 = arith.constant 17 : index
    %142 = vector.load %arg5[%c0_137, %c17_138] : memref<5x546xf32, #tpu.memory_space<vmem>>, vector<5x512xf32>
    %c20_139 = arith.constant 20 : index
    %c0_140 = arith.constant 0 : index
    %143 = vector.load %arg6[%c20_139, %c0_140] : memref<48x512xf32, #tpu.memory_space<vmem>>, vector<5x512xf32>
    tpu.vector_store %arg6[%c20_139, %c0_140], %142 {strides = array<i32>} : memref<48x512xf32, #tpu.memory_space<vmem>>, vector<5x512xf32>,
    %c0_141 = arith.constant 0 : index
    %c18_142 = arith.constant 18 : index
    %144 = vector.load %arg5[%c0_141, %c18_142] : memref<5x546xf32, #tpu.memory_space<vmem>>, vector<5x512xf32>
    %c25_143 = arith.constant 25 : index
    %c0_144 = arith.constant 0 : index
    %145 = vector.load %arg6[%c25_143, %c0_144] : memref<48x512xf32, #tpu.memory_space<vmem>>, vector<5x512xf32>
    tpu.vector_store %arg6[%c25_143, %c0_144], %144 {strides = array<i32>} : memref<48x512xf32, #tpu.memory_space<vmem>>, vector<5x512xf32>,
    %c0_145 = arith.constant 0 : index
    %c32_146 = arith.constant 32 : index
    %146 = vector.load %arg5[%c0_145, %c32_146] : memref<5x546xf32, #tpu.memory_space<vmem>>, vector<5x512xf32>
    %c30 = arith.constant 30 : index
    %c0_147 = arith.constant 0 : index
    %147 = vector.load %arg6[%c30, %c0_147] : memref<48x512xf32, #tpu.memory_space<vmem>>, vector<5x512xf32>
    tpu.vector_store %arg6[%c30, %c0_147], %146 {strides = array<i32>} : memref<48x512xf32, #tpu.memory_space<vmem>>, vector<5x512xf32>,
    %c0_148 = arith.constant 0 : index
    %c33_149 = arith.constant 33 : index
    %148 = vector.load %arg5[%c0_148, %c33_149] : memref<5x546xf32, #tpu.memory_space<vmem>>, vector<5x512xf32>
    %c35_150 = arith.constant 35 : index
    %c0_151 = arith.constant 0 : index
    %149 = vector.load %arg6[%c35_150, %c0_151] : memref<48x512xf32, #tpu.memory_space<vmem>>, vector<5x512xf32>
    tpu.vector_store %arg6[%c35_150, %c0_151], %148 {strides = array<i32>} : memref<48x512xf32, #tpu.memory_space<vmem>>, vector<5x512xf32>,
    %c0_152 = arith.constant 0 : index
    %c34_153 = arith.constant 34 : index
    %150 = vector.load %arg5[%c0_152, %c34_153] : memref<5x546xf32, #tpu.memory_space<vmem>>, vector<5x512xf32>
    %c40 = arith.constant 40 : index
    %c0_154 = arith.constant 0 : index
    %151 = vector.load %arg6[%c40, %c0_154] : memref<48x512xf32, #tpu.memory_space<vmem>>, vector<5x512xf32>
    tpu.vector_store %arg6[%c40, %c0_154], %150 {strides = array<i32>} : memref<48x512xf32, #tpu.memory_space<vmem>>, vector<5x512xf32>,
    %c0_155 = arith.constant 0 : index
    %c68_156 = arith.constant 68 : index
    %152 = vector.load %arg2[%c0_155, %c68_156] : memref<32x414xf32, #tpu.memory_space<vmem>>, vector<5x48xf32>
    %c0_157 = arith.constant 0 : index
    %c0_158 = arith.constant 0 : index
    %153 = vector.load %arg6[%c0_157, %c0_158] : memref<48x512xf32, #tpu.memory_space<vmem>>, vector<48x512xf32>
    %cst_159 = arith.constant dense<0.000000e+00> : vector<5x512xf32>
    %154 = tpu.matmul %152, %153, %cst_159 {dimension_numbers = #tpu.dot_dimension_numbers<[1], [0], [0], [1], [0, 0, 1, 1], [], []>} : vector<5x48xf32>, vector<48x512xf32>, vector<5x512xf32> -> vector<5x512xf32>
    %c0_160 = arith.constant 0 : index
    %c116 = arith.constant 116 : index
    %155 = vector.load %arg2[%c0_160, %c116] : memref<32x414xf32, #tpu.memory_space<vmem>>, vector<5x1xf32>
    %156 = vector.broadcast %155 : vector<5x1xf32> to vector<5x512xf32>
    %157 = arith.addf %154, %156 : vector<5x512xf32>
    %cst_161 = arith.constant 0.000000e+00 : f32
    %158 = vector.broadcast %cst_161 : f32 to vector<5x512xf32>
    %159 = arith.cmpf ogt, %157, %158 : vector<5x512xf32>
    %c0_162 = arith.constant 0 : index
    %c117 = arith.constant 117 : index
    %160 = vector.load %arg2[%c0_162, %c117] : memref<32x414xf32, #tpu.memory_space<vmem>>, vector<5x1xf32>
    %161 = vector.broadcast %160 : vector<5x1xf32> to vector<5x512xf32>
    %162 = arith.mulf %161, %157 : vector<5x512xf32>
    %163 = arith.select %159, %157, %162 : vector<5x512xi1>, vector<5x512xf32>
    %c0_163 = arith.constant 0 : index
    %c118 = arith.constant 118 : index
    %164 = vector.load %arg2[%c0_163, %c118] : memref<32x414xf32, #tpu.memory_space<vmem>>, vector<32x5xf32>
    %cst_164 = arith.constant dense<0.000000e+00> : vector<32x512xf32>
    %165 = tpu.matmul %164, %163, %cst_164 {dimension_numbers = #tpu.dot_dimension_numbers<[1], [0], [0], [1], [0, 0, 1, 1], [], []>} : vector<32x5xf32>, vector<5x512xf32>, vector<32x512xf32> -> vector<32x512xf32>
    %c0_165 = arith.constant 0 : index
    %c123 = arith.constant 123 : index
    %166 = vector.load %arg2[%c0_165, %c123] : memref<32x414xf32, #tpu.memory_space<vmem>>, vector<32x1xf32>
    %167 = vector.broadcast %166 : vector<32x1xf32> to vector<32x512xf32>
    %168 = arith.addf %165, %167 : vector<32x512xf32>
    %cst_166 = arith.constant 0.000000e+00 : f32
    %169 = vector.broadcast %cst_166 : f32 to vector<32x512xf32>
    %170 = arith.cmpf ogt, %168, %169 : vector<32x512xf32>
    %c0_167 = arith.constant 0 : index
    %c124 = arith.constant 124 : index
    %171 = vector.load %arg2[%c0_167, %c124] : memref<32x414xf32, #tpu.memory_space<vmem>>, vector<32x1xf32>
    %172 = vector.broadcast %171 : vector<32x1xf32> to vector<32x512xf32>
    %173 = arith.mulf %172, %168 : vector<32x512xf32>
    %174 = arith.select %170, %168, %173 : vector<32x512xi1>, vector<32x512xf32>
    %cst_168 = arith.constant 0.000000e+00 : f32
    %175 = vector.broadcast %cst_168 : f32 to vector<32x34xf32>
    %c0_169 = arith.constant 0 : index
    %c0_170 = arith.constant 0 : index
    %176 = vector.load %arg7[%c0_169, %c0_170] : memref<32x580xf32, #tpu.memory_space<vmem>>, vector<32x34xf32>
    tpu.vector_store %arg7[%c0_169, %c0_170], %175 {strides = array<i32>} : memref<32x580xf32, #tpu.memory_space<vmem>>, vector<32x34xf32>,
    %cst_171 = arith.constant 0.000000e+00 : f32
    %177 = vector.broadcast %cst_171 : f32 to vector<32x34xf32>
    %c0_172 = arith.constant 0 : index
    %c546 = arith.constant 546 : index
    %178 = vector.load %arg7[%c0_172, %c546] : memref<32x580xf32, #tpu.memory_space<vmem>>, vector<32x34xf32>
    tpu.vector_store %arg7[%c0_172, %c546], %177 {strides = array<i32>} : memref<32x580xf32, #tpu.memory_space<vmem>>, vector<32x34xf32>,
    %179 = vector.broadcast %24 : vector<1x512xf32> to vector<32x512xf32>
    %180 = arith.mulf %174, %179 : vector<32x512xf32>
    %c0_173 = arith.constant 0 : index
    %c34_174 = arith.constant 34 : index
    %181 = vector.load %arg7[%c0_173, %c34_174] : memref<32x580xf32, #tpu.memory_space<vmem>>, vector<32x512xf32>
    tpu.vector_store %arg7[%c0_173, %c34_174], %180 {strides = array<i32>} : memref<32x580xf32, #tpu.memory_space<vmem>>, vector<32x512xf32>,
    %c0_175 = arith.constant 0 : index
    %c0_176 = arith.constant 0 : index
    %182 = vector.load %arg7[%c0_175, %c0_176] : memref<32x580xf32, #tpu.memory_space<vmem>>, vector<32x512xf32>
    %c0_177 = arith.constant 0 : index
    %c0_178 = arith.constant 0 : index
    %183 = vector.load %arg8[%c0_177, %c0_178] : memref<288x512xf32, #tpu.memory_space<vmem>>, vector<32x512xf32>
    tpu.vector_store %arg8[%c0_177, %c0_178], %182 {strides = array<i32>} : memref<288x512xf32, #tpu.memory_space<vmem>>, vector<32x512xf32>,
    %c0_179 = arith.constant 0 : index
    %c1_180 = arith.constant 1 : index
    %184 = vector.load %arg7[%c0_179, %c1_180] : memref<32x580xf32, #tpu.memory_space<vmem>>, vector<32x512xf32>
    %c32_181 = arith.constant 32 : index
    %c0_182 = arith.constant 0 : index
    %185 = vector.load %arg8[%c32_181, %c0_182] : memref<288x512xf32, #tpu.memory_space<vmem>>, vector<32x512xf32>
    tpu.vector_store %arg8[%c32_181, %c0_182], %184 {strides = array<i32>} : memref<288x512xf32, #tpu.memory_space<vmem>>, vector<32x512xf32>,
    %c0_183 = arith.constant 0 : index
    %c2_184 = arith.constant 2 : index
    %186 = vector.load %arg7[%c0_183, %c2_184] : memref<32x580xf32, #tpu.memory_space<vmem>>, vector<32x512xf32>
    %c64_185 = arith.constant 64 : index
    %c0_186 = arith.constant 0 : index
    %187 = vector.load %arg8[%c64_185, %c0_186] : memref<288x512xf32, #tpu.memory_space<vmem>>, vector<32x512xf32>
    tpu.vector_store %arg8[%c64_185, %c0_186], %186 {strides = array<i32>} : memref<288x512xf32, #tpu.memory_space<vmem>>, vector<32x512xf32>,
    %c0_187 = arith.constant 0 : index
    %c16_188 = arith.constant 16 : index
    %188 = vector.load %arg7[%c0_187, %c16_188] : memref<32x580xf32, #tpu.memory_space<vmem>>, vector<32x512xf32>
    %c96 = arith.constant 96 : index
    %c0_189 = arith.constant 0 : index
    %189 = vector.load %arg8[%c96, %c0_189] : memref<288x512xf32, #tpu.memory_space<vmem>>, vector<32x512xf32>
    tpu.vector_store %arg8[%c96, %c0_189], %188 {strides = array<i32>} : memref<288x512xf32, #tpu.memory_space<vmem>>, vector<32x512xf32>,
    %c0_190 = arith.constant 0 : index
    %c17_191 = arith.constant 17 : index
    %190 = vector.load %arg7[%c0_190, %c17_191] : memref<32x580xf32, #tpu.memory_space<vmem>>, vector<32x512xf32>
    %c128 = arith.constant 128 : index
    %c0_192 = arith.constant 0 : index
    %191 = vector.load %arg8[%c128, %c0_192] : memref<288x512xf32, #tpu.memory_space<vmem>>, vector<32x512xf32>
    tpu.vector_store %arg8[%c128, %c0_192], %190 {strides = array<i32>} : memref<288x512xf32, #tpu.memory_space<vmem>>, vector<32x512xf32>,
    %c0_193 = arith.constant 0 : index
    %c18_194 = arith.constant 18 : index
    %192 = vector.load %arg7[%c0_193, %c18_194] : memref<32x580xf32, #tpu.memory_space<vmem>>, vector<32x512xf32>
    %c160 = arith.constant 160 : index
    %c0_195 = arith.constant 0 : index
    %193 = vector.load %arg8[%c160, %c0_195] : memref<288x512xf32, #tpu.memory_space<vmem>>, vector<32x512xf32>
    tpu.vector_store %arg8[%c160, %c0_195], %192 {strides = array<i32>} : memref<288x512xf32, #tpu.memory_space<vmem>>, vector<32x512xf32>,
    %c0_196 = arith.constant 0 : index
    %c32_197 = arith.constant 32 : index
    %194 = vector.load %arg7[%c0_196, %c32_197] : memref<32x580xf32, #tpu.memory_space<vmem>>, vector<32x512xf32>
    %c192 = arith.constant 192 : index
    %c0_198 = arith.constant 0 : index
    %195 = vector.load %arg8[%c192, %c0_198] : memref<288x512xf32, #tpu.memory_space<vmem>>, vector<32x512xf32>
    tpu.vector_store %arg8[%c192, %c0_198], %194 {strides = array<i32>} : memref<288x512xf32, #tpu.memory_space<vmem>>, vector<32x512xf32>,
    %c0_199 = arith.constant 0 : index
    %c33_200 = arith.constant 33 : index
    %196 = vector.load %arg7[%c0_199, %c33_200] : memref<32x580xf32, #tpu.memory_space<vmem>>, vector<32x512xf32>
    %c224 = arith.constant 224 : index
    %c0_201 = arith.constant 0 : index
    %197 = vector.load %arg8[%c224, %c0_201] : memref<288x512xf32, #tpu.memory_space<vmem>>, vector<32x512xf32>
    tpu.vector_store %arg8[%c224, %c0_201], %196 {strides = array<i32>} : memref<288x512xf32, #tpu.memory_space<vmem>>, vector<32x512xf32>,
    %c0_202 = arith.constant 0 : index
    %c34_203 = arith.constant 34 : index
    %198 = vector.load %arg7[%c0_202, %c34_203] : memref<32x580xf32, #tpu.memory_space<vmem>>, vector<32x512xf32>
    %c256 = arith.constant 256 : index
    %c0_204 = arith.constant 0 : index
    %199 = vector.load %arg8[%c256, %c0_204] : memref<288x512xf32, #tpu.memory_space<vmem>>, vector<32x512xf32>
    tpu.vector_store %arg8[%c256, %c0_204], %198 {strides = array<i32>} : memref<288x512xf32, #tpu.memory_space<vmem>>, vector<32x512xf32>,
    %c0_205 = arith.constant 0 : index
    %c125 = arith.constant 125 : index
    %200 = vector.load %arg2[%c0_205, %c125] : memref<32x414xf32, #tpu.memory_space<vmem>>, vector<9x288xf32>
    %c0_206 = arith.constant 0 : index
    %c0_207 = arith.constant 0 : index
    %201 = vector.load %arg8[%c0_206, %c0_207] : memref<288x512xf32, #tpu.memory_space<vmem>>, vector<288x512xf32>
    %cst_208 = arith.constant dense<0.000000e+00> : vector<9x512xf32>
    %202 = tpu.matmul %200, %201, %cst_208 {dimension_numbers = #tpu.dot_dimension_numbers<[1], [0], [0], [1], [0, 0, 1, 1], [], []>} : vector<9x288xf32>, vector<288x512xf32>, vector<9x512xf32> -> vector<9x512xf32>
    %c0_209 = arith.constant 0 : index
    %c413 = arith.constant 413 : index
    %203 = vector.load %arg2[%c0_209, %c413] : memref<32x414xf32, #tpu.memory_space<vmem>>, vector<1x1xf32>
    %204 = vector.broadcast %203 : vector<1x1xf32> to vector<9x512xf32>
    %205 = arith.addf %202, %204 : vector<9x512xf32>
    %206 = vector.shape_cast %205 : vector<9x512xf32> to vector<1x9x512xf32>
    %c0_210 = arith.constant 0 : index
    %c0_211 = arith.constant 0 : index
    %c0_212 = arith.constant 0 : index
    %207 = vector.load %arg3[%c0_210, %c0_211, %c0_212] : memref<1x9x512xf32, #tpu.memory_space<vmem>>, vector<1x9x512xf32>
    tpu.vector_store %arg3[%c0_210, %c0_211, %c0_212], %206 {strides = array<i32>} : memref<1x9x512xf32, #tpu.memory_space<vmem>>, vector<1x9x512xf32>,
    return
  }
  func.func @transform_0(%arg0: i32) -> (i32, i32, i32) {
    %c0_i32 = arith.constant 0 : i32
    %c0_i32_0 = arith.constant 0 : i32
    %c0_i32_1 = arith.constant 0 : i32
    return %arg0, %c0_i32, %c0_i32_0 : i32, i32, i32
  }
  func.func @transform_1(%arg0: i32) -> (i32, i32) {
    %c0_i32 = arith.constant 0 : i32
    %c0_i32_0 = arith.constant 0 : i32
    %c0_i32_1 = arith.constant 0 : i32
    return %c0_i32, %c0_i32_0 : i32, i32
  }
  func.func @transform_2(%arg0: i32) -> (i32, i32, i32) {
    %c0_i32 = arith.constant 0 : i32
    %c0_i32_0 = arith.constant 0 : i32
    %c0_i32_1 = arith.constant 0 : i32
    return %arg0, %c0_i32, %c0_i32_0 : i32, i32, i32
  }
}

</mosaic_0001>

<bundles_post_ra>
// kernel: fsrcnn_forward.1
= control target key start
LH: loop header
LB: loop body
LE: loop exit
PB: predicated region body
PF: predicated region fallthrough
CT: control target
= control target key end

     0   :  { %7 = vsyncpa [#allocation8], 0  ;;  %s3490_s9 = smov [#allocation7]   ;;  %s5082_s0 = inlined_call_operand.vmem [shape: f32[1,1,580], index: 0, kind: input, shape index: {}]   ;;  %s5083_s1 = inlined_call_operand.hbm [shape: f32[32,414], index: 1, kind: input, shape index: {}]   ;;  %s5084_s2 = inlined_call_operand.vmem [shape: f32[1,9,512], index: 2, kind: output, shape index: {}]  }
   0x1   :  { %s15_s10 = sshll.u32 %s3490_s9, 4  ;;  %s16_s10 = int_to_ptr.vmem [resolvable:$true] %s15_s10 }
   0x2   :  { %s3476_s11 = scalar_lea.vmem %s16_s10, 2048  ;;  %p3481_p1 = scmp.lt.s32.totalorder %s16_s10, %s16_s10 }
   0x3   :  { %p3477_p0 = scmp.ne.s32.totalorder %s16_s10, %s3476_s11  ;;  %p3482_p2 = scmp.lt.s32.totalorder %s3476_s11, %s3476_s11 }
   0x5   :  { %p3483_p3 = por %p3482_p2, %p3481_p1 }
   0x7   :  { %p3484_p4 = pnand %p3483_p3, %p3477_p0 }
   0x9   :  { %3487 = shalt.err (!%p3484_p4)
}
   0xa   :  { %s3491_s12 = smov 512   ;;  %s3492_s13 = smov 32  }
   0xb   :  { %21 = dma.hbm_to_vmem [thread:$0]  %s5083_s1, 2048, %s16_s10, [#allocation8], %s3491_s12, %s3491_s12, %s3492_s13  }
   0xc   :  { %3488 = dma.done.wait [#allocation8], 2048  }
   0xd   :  { %3489 = vsyncadd [#allocation8], 4294965248  ;;  %v5090_v0 = vmov 0.0   ;;  %v358_v1 = vld [vmem:[%s5082_s0] sm:$0x1f]  ;;  %s3494_s19 = smov 60   ;;  %v25_v19 = vlaneseq }
   0xe   :  { %95 = vst [vmem:[#allocation2 + $0x68] sm:$0xfe] %v5090_v0  ;;  %94 = vst [vmem:[#allocation2 + $0x60] sm:$0xfe] %v5090_v0  ;;  %482 = vmatprep.mubr.f32.mxu0 %v5090_v0  ;;  %571 = vmatprep.mubr.f32.mxu1 %v5090_v0  ;;  %v281_v2 = vld [vmem:[%s5082_s0] sm:$0x1f] }
   0xf   :  { %96 = vst [vmem:[#allocation2 + $0x70] sm:$0xfe] %v5090_v0  ;;  %97 = vst [vmem:[#allocation2 + $0x78] sm:$0xfe] %v5090_v0  ;;  %360 = vrot.lane.b32.xlu0 %v358_v1, %s3494_s19  ;;  %s3495_s20 = smov 78   ;;  %s3496_s25 = smov 77  }
  0x10   :  { %863 = vst [vmem:[#allocation4 + $0x90] sm:$0xe0] %v5090_v0  ;;  %864 = vst [vmem:[#allocation4 + $0xa0] sm:$0xe0] %v5090_v0  ;;  %283 = vrot.lane.b32.xlu1 %v281_v2, %s3495_s20  ;;  %v292_v3 = vld [vmem:[%s5082_s0] sm:$0x1f] }
  0x11   :  { %865 = vst [vmem:[#allocation4 + $0xb0] sm:$0xe0] %v5090_v0  ;;  %866 = vst [vmem:[#allocation4 + $0x28] sm:$0xe0] %v5090_v0  ;;  %v270_v4 = vld [vmem:[%s5082_s0] sm:$0x1f] }
  0x12   :  { %s3497_s26 = smov 79   ;;  %v314_v5 = vld [vmem:[%s5082_s0] sm:$0x1f]  ;;  %s3498_s3 = smov 64   ;;  %vm3625_vm0 = vcmp.lt.s32.totalorder %v25_v19, 512  ;;  %v3650_v28 = vld [vmem:[#allocation7 + $0x40] sm:$0xff] }
  0x13   :  { %272 = vrot.lane.b32.xlu0 %v270_v4, %s3497_s26  ;;  %v303_v6 = vld [vmem:[%s5082_s0] sm:$0x1f]  ;;  %s3499_s4 = smov 76   ;;  %s3500_s9 = smov 62   ;;  %v3652_v29 = vld [vmem:[#allocation7 + $0x60] sm:$0xff]  ;;  %v3518_v30 = vmov 32  }
  0x14   :  { %294 = vrot.lane.b32.xlu1 %v292_v3, %s3496_s25  ;;  %v336_v7 = vld [vmem:[%s5082_s0] sm:$0x1f]  ;;  %s3501_s10 = smov 63   ;;  %s3502_s15 = smov 61   ;;  %3445 = vset.pattern.permute.xlu0 %v3518_v30  ;;  %v3656_v31 = vld [vmem:[#allocation7 + $0x20] sm:$0xff]  ;;  %v3519_v32 = vmov 33  }
  0x15   :  { %v325_v8 = vld [vmem:[%s5082_s0] sm:$0x1f]  ;;  %s3503_s1 = smov 109   ;;  %s3504_s21 = smov 108   ;;  %3446 = vset.pattern.permute.xlu1 %v3518_v30  ;;  %v3660_v33 = vld [vmem:[#allocation7] sm:$0xff]  ;;  %vm363_vm1 = vcmask 490496  }
  0x16   :  { %v347_v9 = vld [vmem:[%s5082_s0] sm:$0x1f]  ;;  %s3505_s22 = smov 96   ;;  %s3506_s27 = smov 95   ;;  %v3666_v34 = vld [vmem:[#allocation7] sm:$0x1f] }
  0x17   :  { %305 = vrot.lane.b32.xlu0 %v303_v6, %s3499_s4  ;;  %v182_v10 = vld [vmem:[%s5082_s0] sm:$0x1f]  ;;  %s3507_s28 = smov 94   ;;  %s3508_s5 = smov 93   ;;  %vm286_vm2 = vcmask 637952   ;;  %vm297_vm3 = vcmask 629760  }
  0x18   :  { %316 = vrot.lane.b32.xlu1 %v314_v5, %s3498_s3  ;;  %v193_v11 = vld [vmem:[%s5082_s0] sm:$0x1f]  ;;  %s3509_s6 = smov 92   ;;  %s3510_s11 = smov 80   ;;  %vm275_vm4 = vcmask 646144   ;;  %vm319_vm5 = vcmask 523264  }
  0x19   :  { %v204_v12 = vld [vmem:[%s5082_s0] sm:$0x1f]  ;;  %s3511_s12 = smov 127   ;;  %s3512_s18 = smov 126   ;;  %vm308_vm6 = vcmask 621568   ;;  %vm341_vm7 = vcmask 506880  }
  0x1a   :  { %v215_v13 = vld [vmem:[%s5082_s0] sm:$0x1f]  ;;  %s3513_s20 = smov 125   ;;  %s3514_s26 = smov 124   ;;  %vm330_vm8 = vcmask 515072   ;;  %vm352_vm9 = vcmask 498688  }
  0x1b   :  { %327 = vrot.lane.b32.xlu0 %v325_v8, %s3501_s10  ;;  %v226_v14 = vld [vmem:[%s5082_s0] sm:$0x1f]  ;;  %s3515_s29 = smov 112   ;;  %s3517_s7 = smov 110   ;;  %vm187_vm10 = vcmask 891904   ;;  %vm198_vm11 = vcmask 883712  }
  0x1c   :  { %338 = vrot.lane.b32.xlu1 %v336_v7, %s3500_s9  ;;  %v237_v15 = vld [vmem:[%s5082_s0] sm:$0x1f]  ;;  %vm209_vm12 = vcmask 785408   ;;  %vm220_vm13 = vcmask 777216   ;;  %vm231_vm14 = vcmask 769024   ;;  %vm242_vm15 = vcmask 760832  }
  0x1d   :  { %v248_v16 = vld [vmem:[%s5082_s0] sm:$0x1f]  ;;  %v3520_v22 = vmov 66   ;;  %s3525_s8 = smov 10   ;;  %s3529_s9 = smov 34  }
  0x1e   :  { %v259_v17 = vld [vmem:[%s5082_s0] sm:$0x1f] }
  0x1f   :  { %349 = vrot.lane.b32.xlu0 %v347_v9, %s3502_s15  ;;  %v105_v18 = vld [vmem:[%s5082_s0] sm:$0x1f] }
  0x20   :  { %184 = vrot.lane.b32.xlu1 %v182_v10, %s3503_s1  ;;  %v116_v20 = vld [vmem:[%s5082_s0] sm:$0x1f] }
  0x21   :  { %v127_v21 = vld [vmem:[%s5082_s0] sm:$0x1f] }
  0x22   :  { %v98_v23 = vld [vmem:[%s5082_s0] sm:$0xf] }
  0x23   :  { %195 = vrot.lane.b32.xlu0 %v193_v11, %s3504_s21  ;;  %103 = vst.msk [vmem:[#allocation2] ss:$8 sm:$0xf] %vm3625_vm0, %v98_v23  ;;  %v138_v24 = vld [vmem:[%s5082_s0] sm:$0x1f] }
  0x24   :  { %206 = vrot.lane.b32.xlu1 %v204_v12, %s3505_s22  ;;  %v149_v25 = vld [vmem:[%s5082_s0] sm:$0x1f] }
  0x25   :  { %v160_v26 = vld [vmem:[%s5082_s0] sm:$0x1f] }
  0x26   :  { %v171_v27 = vld [vmem:[%s5082_s0] sm:$0x1f]  ;;  %s3522_s0 = smov 17  }
  0x27   :  { %217 = vrot.lane.b32.xlu0 %v215_v13, %s3506_s27 }
  0x28   :  { %228 = vrot.lane.b32.xlu1 %v226_v14, %s3507_s28 }
  0x2b   :  { %239 = vrot.lane.b32.xlu0 %v237_v15, %s3508_s5 }
  0x2c   :  { %250 = vrot.lane.b32.xlu1 %v248_v16, %s3509_s6  ;;  %s3516_s6 = smov 111  }
  0x2f   :  { %261 = vrot.lane.b32.xlu0 %v259_v17, %s3510_s11 }
  0x30   :  { %107 = vrot.lane.b32.xlu1 %v105_v18, %s3511_s12 }
  0x33   :  { %118 = vrot.lane.b32.xlu0 %v116_v20, %s3512_s18 }
  0x34   :  { %129 = vrot.lane.b32.xlu1 %v127_v21, %s3513_s20 }
  0x37   :  { %140 = vrot.lane.b32.xlu0 %v138_v24, %s3514_s26 }
  0x38   :  { %151 = vrot.lane.b32.xlu1 %v149_v25, %s3515_s29 }
  0x3b   :  { %162 = vrot.lane.b32.xlu0 %v160_v26, %s3516_s6 }
  0x3c   :  { %173 = vrot.lane.b32.xlu1 %v171_v27, %s3517_s7 }
  0x3f   :  { %406 = vperm.xlu0 %3445, %v3652_v29  }
  0x40   :  { %401 = vperm.xlu1 %3446, %v3650_v28  }
  0x43   :  { %396 = vperm.xlu0 %3445, %v3656_v31  }
  0x44   :  { %3447 = vset.pattern.permute.xlu1 %v3519_v32 }
  0x45   :  { %625 = vperm.xlu1 %3447, %v3652_v29  }
  0x47   :  { %391 = vperm.xlu0 %3445, %v3660_v33  }
  0x49   :  { %621 = vperm.xlu1 %3447, %v3650_v28  }
  0x4b   :  { %3448 = vset.pattern.permute.xlu0 %v3519_v32 }
  0x4c   :  { %613 = vperm.xlu0 %3448, %v3660_v33  }
  0x4d   :  { %617 = vperm.xlu1 %3447, %v3656_v31  }
  0x51   :  { %666 = vrot.lane.b32.xlu1 %v3666_v34, %s3507_s28 }
  0x52   :  { %3449 = vset.pattern.permute.xlu1 %v3520_v22 }
  0x55   :  { %663 = vperm.xlu1 %3449, %v3666_v34  }
  0x81   :  { %v361_v35 = vpop.permute.xlu0 %360 }
  0x82   :  { %v284_v36 = vpop.permute.xlu1 %283  ;;  %v362_v37 = vrot.slane %v361_v35, 1 }
  0x83   :  { %v285_v38 = vrot.slane %v284_v36, 1 }
  0x84   :  { %v364_v39 = vsel %vm363_vm1, %v361_v35, %v362_v37  ;;  %vm253_vm1 = vcmask 752640  }
  0x85   :  { %v287_v40 = vsel %vm286_vm2, %v284_v36, %v285_v38  ;;  %367 = vst.msk [vmem:[#allocation2 + $0x60] ss:$8 sm:$0xf] %vm3625_vm0, %v364_v39  ;;  %v273_v42 = vpop.permute.xlu0 %272  ;;  %vm264_vm2 = vcmask 654336  }
  0x86   :  { %290 = vst.msk [vmem:[#allocation2 + $0x41] ss:$8 sm:$0xf] %vm3625_vm0, %v287_v40  ;;  %v295_v41 = vpop.permute.xlu1 %294  ;;  %v274_v44 = vrot.slane %v273_v42, 1 }
  0x87   :  { %v296_v43 = vrot.slane %v295_v41, 1 }
  0x88   :  { %v276_v46 = vsel %vm275_vm4, %v273_v42, %v274_v44  ;;  %vm5085_vm4 = vcmask 1031168  }
  0x89   :  { %v298_v45 = vsel %vm297_vm3, %v295_v41, %v296_v43  ;;  %279 = vst.msk [vmem:[#allocation2 + $0x40] ss:$8 sm:$0xf] %vm3625_vm0, %v276_v46  ;;  %v306_v48 = vpop.permute.xlu0 %305  ;;  %vm5086_vm3 = vcmask 1039360  }
  0x8a   :  { %301 = vst.msk [vmem:[#allocation2 + $0x42] ss:$8 sm:$0xf] %vm3625_vm0, %v298_v45  ;;  %v317_v47 = vpop.permute.xlu1 %316  ;;  %v307_v50 = vrot.slane %v306_v48, 1 }
  0x8b   :  { %v318_v49 = vrot.slane %v317_v47, 1 }
  0x8c   :  { %v309_v52 = vsel %vm308_vm6, %v306_v48, %v307_v50  ;;  %v386_v53 = vld [vmem:[#allocation2 + $0x68] sm:$0xff]  ;;  %v388_v54 = vld [vmem:[#allocation2 + $0x78] sm:$0xff]  ;;  %v385_v55 = vld [vmem:[#allocation2 + $0x60] sm:$0xff]  ;;  %vm143_vm6 = vcmask 1014784  }
  0x8d   :  { %v320_v51 = vsel %vm319_vm5, %v317_v47, %v318_v49  ;;  %312 = vst.msk [vmem:[#allocation2 + $0x43] ss:$8 sm:$0xf] %vm3625_vm0, %v309_v52  ;;  %v328_v57 = vpop.permute.xlu0 %327  ;;  %442 = vmatprep.subr.mxu0 %v386_v53  ;;  %531 = vmatprep.subr.mxu1 %v388_v54  ;;  %v387_v58 = vld [vmem:[#allocation2 + $0x70] sm:$0xff]  ;;  %vm132_vm5 = vcmask 1022976  }
  0x8e   :  { %323 = vst.msk [vmem:[#allocation2 + $0x44] ss:$8 sm:$0xf] %vm3625_vm0, %v320_v51  ;;  %v339_v56 = vpop.permute.xlu1 %338  ;;  %v329_v60 = vrot.slane %v328_v57, 1  ;;  %443 = vmatpush1.msra.mxu0 %v385_v55  ;;  %532 = vmatpush1.msra.mxu1 %v387_v58 }
  0x8f   :  { %v340_v59 = vrot.slane %v339_v56, 1 }
  0x90   :  { %v331_v62 = vsel %vm330_vm8, %v328_v57, %v329_v60  ;;  %vm5089_vm8 = vcmask 908288  }
  0x91   :  { %v342_v61 = vsel %vm341_vm7, %v339_v56, %v340_v59  ;;  %334 = vst.msk [vmem:[#allocation2 + $0x45] ss:$8 sm:$0xf] %vm3625_vm0, %v331_v62  ;;  %v350_v63 = vpop.permute.xlu0 %349  ;;  %vm5087_vm7 = vcmask 916480  }
  0x92   :  { %345 = vst.msk [vmem:[#allocation2 + $0x46] ss:$8 sm:$0xf] %vm3625_vm0, %v342_v61  ;;  %v185_v1 = vpop.permute.xlu1 %184  ;;  %v351_v2 = vrot.slane %v350_v63, 1 }
  0x93   :  { %v186_v3 = vrot.slane %v185_v1, 1 }
  0x94   :  { %v353_v4 = vsel %vm352_vm9, %v350_v63, %v351_v2  ;;  %vm5088_vm9 = vcmask 900096  }
  0x95   :  { %v188_v5 = vsel %vm187_vm10, %v185_v1, %v186_v3  ;;  %356 = vst.msk [vmem:[#allocation2 + $0x47] ss:$8 sm:$0xf] %vm3625_vm0, %v353_v4  ;;  %v196_v6 = vpop.permute.xlu0 %195  ;;  %vm409_vm10 = vcmask 261120  }
  0x96   :  { %191 = vst.msk [vmem:[#allocation2 + $0x20] ss:$8 sm:$0xf] %vm3625_vm0, %v188_v5  ;;  %v207_v7 = vpop.permute.xlu1 %206  ;;  %v197_v8 = vrot.slane %v196_v6, 1 }
  0x97   :  { %v208_v9 = vrot.slane %v207_v7, 1 }
  0x98   :  { %v199_v10 = vsel %vm198_vm11, %v196_v6, %v197_v8 }
  0x99   :  { %v210_v11 = vsel %vm209_vm12, %v207_v7, %v208_v9  ;;  %202 = vst.msk [vmem:[#allocation2 + $0x21] ss:$8 sm:$0xf] %vm3625_vm0, %v199_v10  ;;  %v218_v12 = vpop.permute.xlu0 %217 }
  0x9a   :  { %213 = vst.msk [vmem:[#allocation2 + $0x22] ss:$8 sm:$0xf] %vm3625_vm0, %v210_v11  ;;  %v229_v13 = vpop.permute.xlu1 %228  ;;  %v219_v14 = vrot.slane %v218_v12, 1 }
  0x9b   :  { %v230_v15 = vrot.slane %v229_v13, 1 }
  0x9c   :  { %v221_v16 = vsel %vm220_vm13, %v218_v12, %v219_v14  ;;  %v382_v18 = vld [vmem:[#allocation2 + $0x48] sm:$0xff]  ;;  %v384_v20 = vld [vmem:[#allocation2 + $0x58] sm:$0xff]  ;;  %v381_v21 = vld [vmem:[#allocation2 + $0x40] sm:$0xff] }
  0x9d   :  { %v232_v17 = vsel %vm231_vm14, %v229_v13, %v230_v15  ;;  %224 = vst.msk [vmem:[#allocation2 + $0x23] ss:$8 sm:$0xf] %vm3625_vm0, %v221_v16  ;;  %v240_v23 = vpop.permute.xlu0 %239  ;;  %444 = vmatprep.subr.mxu0 %v382_v18  ;;  %533 = vmatprep.subr.mxu1 %v384_v20  ;;  %v383_v25 = vld [vmem:[#allocation2 + $0x50] sm:$0xff] }
  0x9e   :  { %235 = vst.msk [vmem:[#allocation2 + $0x24] ss:$8 sm:$0xf] %vm3625_vm0, %v232_v17  ;;  %v251_v24 = vpop.permute.xlu1 %250  ;;  %v241_v26 = vrot.slane %v240_v23, 1  ;;  %445 = vmatpush1.msra.mxu0 %v381_v21  ;;  %534 = vmatpush1.msra.mxu1 %v383_v25 }
  0x9f   :  { %v252_v27 = vrot.slane %v251_v24, 1 }
  0xa0   :  { %v243_v30 = vsel %vm242_vm15, %v240_v23, %v241_v26 }
  0xa1   :  { %v254_v32 = vsel %vm253_vm1, %v251_v24, %v252_v27  ;;  %246 = vst.msk [vmem:[#allocation2 + $0x25] ss:$8 sm:$0xf] %vm3625_vm0, %v243_v30  ;;  %v262_v35 = vpop.permute.xlu0 %261 }
  0xa2   :  { %257 = vst.msk [vmem:[#allocation2 + $0x26] ss:$8 sm:$0xf] %vm3625_vm0, %v254_v32  ;;  %v108_v36 = vpop.permute.xlu1 %107  ;;  %v263_v37 = vrot.slane %v262_v35, 1 }
  0xa3   :  { %v109_v38 = vrot.slane %v108_v36, 1 }
  0xa4   :  { %v265_v39 = vsel %vm264_vm2, %v262_v35, %v263_v37 }
  0xa5   :  { %v111_v40 = vsel %vm5086_vm3, %v108_v36, %v109_v38  ;;  %268 = vst.msk [vmem:[#allocation2 + $0x27] ss:$8 sm:$0xf] %vm3625_vm0, %v265_v39  ;;  %v119_v41 = vpop.permute.xlu0 %118 }
  0xa6   :  { %114 = vst.msk [vmem:[#allocation2 + $0x1] ss:$8 sm:$0xf] %vm3625_vm0, %v111_v40  ;;  %v130_v42 = vpop.permute.xlu1 %129  ;;  %v120_v43 = vrot.slane %v119_v41, 1 }
  0xa7   :  { %v131_v44 = vrot.slane %v130_v42, 1 }
  0xa8   :  { %v122_v45 = vsel %vm5085_vm4, %v119_v41, %v120_v43 }
  0xa9   :  { %v133_v46 = vsel %vm132_vm5, %v130_v42, %v131_v44  ;;  %125 = vst.msk [vmem:[#allocation2 + $0x2] ss:$8 sm:$0xf] %vm3625_vm0, %v122_v45  ;;  %v141_v47 = vpop.permute.xlu0 %140 }
  0xaa   :  { %136 = vst.msk [vmem:[#allocation2 + $0x3] ss:$8 sm:$0xf] %vm3625_vm0, %v133_v46  ;;  %v152_v48 = vpop.permute.xlu1 %151  ;;  %v142_v49 = vrot.slane %v141_v47, 1 }
  0xab   :  { %v153_v50 = vrot.slane %v152_v48, 1 }
  0xac   :  { %v144_v51 = vsel %vm143_vm6, %v141_v47, %v142_v49  ;;  %v378_v53 = vld [vmem:[#allocation2 + $0x28] sm:$0xff]  ;;  %v380_v54 = vld [vmem:[#allocation2 + $0x38] sm:$0xff]  ;;  %v377_v55 = vld [vmem:[#allocation2 + $0x20] sm:$0xff] }
  0xad   :  { %v155_v52 = vsel %vm5087_vm7, %v152_v48, %v153_v50  ;;  %147 = vst.msk [vmem:[#allocation2 + $0x4] ss:$8 sm:$0xf] %vm3625_vm0, %v144_v51  ;;  %v163_v56 = vpop.permute.xlu0 %162  ;;  %446 = vmatprep.subr.mxu0 %v378_v53  ;;  %535 = vmatprep.subr.mxu1 %v380_v54  ;;  %v379_v58 = vld [vmem:[#allocation2 + $0x30] sm:$0xff] }
  0xae   :  { %158 = vst.msk [vmem:[#allocation2 + $0x5] ss:$8 sm:$0xf] %vm3625_vm0, %v155_v52  ;;  %v174_v57 = vpop.permute.xlu1 %173  ;;  %v164_v59 = vrot.slane %v163_v56, 1  ;;  %447 = vmatpush1.msra.mxu0 %v377_v55  ;;  %536 = vmatpush1.msra.mxu1 %v379_v58 }
  0xaf   :  { %v175_v60 = vrot.slane %v174_v57, 1 }
  0xb0   :  { %v166_v61 = vsel %vm5089_vm8, %v163_v56, %v164_v59 }
  0xb1   :  { %v177_v62 = vsel %vm5088_vm9, %v174_v57, %v175_v60  ;;  %169 = vst.msk [vmem:[#allocation2 + $0x6] ss:$8 sm:$0xf] %vm3625_vm0, %v166_v61 }
  0xb2   :  { %180 = vst.msk [vmem:[#allocation2 + $0x7] ss:$8 sm:$0xf] %vm3625_vm0, %v177_v62 }
  0xb9   :  { %v374_v63 = vld [vmem:[#allocation2 + $0x8] sm:$0xff]  ;;  %v376_v1 = vld [vmem:[#allocation2 + $0x18] sm:$0xff]  ;;  %v373_v2 = vld [vmem:[#allocation2] sm:$0xff] }
  0xba   :  { %448 = vmatprep.subr.mxu0 %v374_v63  ;;  %537 = vmatprep.subr.mxu1 %v376_v1  ;;  %v375_v3 = vld [vmem:[#allocation2 + $0x10] sm:$0xff] }
  0xbb   :  { %449 = vmatpush1.msra.mxu0 %v373_v2  ;;  %538 = vmatpush1.msra.mxu1 %v375_v3 }
  0xbc   :  { %3376 = vmatmul.mubr.msk.f32.vlgmr.msra.gmra.mxu0 %vm409_vm10, %v3660_v33  ;;  %3380 = vmatmul.mubr.msk.f32.vlgmr.msra.gmra.mxu1 %vm409_vm10, %v3660_v33  ;;  %v402_v33 = vpop.permute.xlu1 %401 }
  0xbd   :  { %488 = vmatprep.mubr.f32.mxu0 %v5090_v0  ;;  %577 = vmatprep.mubr.f32.mxu1 %v5090_v0 }
  0xc0   :  { %3377 = vmatmul.mubr.msk.f32.gmra.mxu0 %vm409_vm10, %v3656_v31  ;;  %3381 = vmatmul.mubr.msk.f32.gmra.mxu1 %vm409_vm10, %v3656_v31  ;;  %v3521_v31 = vmov 67   ;;  %v626_v5 = vpop.permute.xlu1 %625 }
  0xc1   :  { %494 = vmatprep.mubr.f32.mxu0 %v5090_v0  ;;  %583 = vmatprep.mubr.f32.mxu1 %v5090_v0 }
  0xc2   :  { %3450 = vset.pattern.permute.xlu0 %v3521_v31 }
  0xc3   :  { %817 = vperm.xlu0 %3450, %v3666_v34  }
  0xc4   :  { %3378 = vmatmul.mubr.msk.f32.gmra.mxu0 %vm409_vm10, %v3650_v28  ;;  %3382 = vmatmul.mubr.msk.f32.gmra.mxu1 %vm409_vm10, %v3650_v28  ;;  %v407_v28 = vpop.permute.xlu0 %406  ;;  %v622_v12 = vpop.permute.xlu1 %621 }
  0xc5   :  { %500 = vmatprep.mubr.f32.mxu0 %v5090_v0  ;;  %589 = vmatprep.mubr.f32.mxu1 %v5090_v0 }
  0xc8   :  { %3379 = vmatmul.mubr.msk.f32.gmra.mxu0 %vm409_vm10, %v3652_v29  ;;  %3383 = vmatmul.mubr.msk.f32.gmra.mxu1 %vm409_vm10, %v3652_v29  ;;  %v397_v4 = vpop.permute.xlu0 %396  ;;  %v618_v27 = vpop.permute.xlu1 %617 }
  0xc9   :  { %734 = vmatprep.mubr.f32.mxu0 %v5090_v0  ;;  %805 = vmatprep.mubr.f32.mxu1 %v5090_v0 }
  0xcc   :  { %v392_v9 = vpop.permute.xlu0 %391 }
  0xd0   :  { %v614_v34 = vpop.permute.xlu0 %613 }
 0x17c   :  { %v484_v6 = vpop.f32.mrf.mxu0  ;;  %v573_v7 = vpop.f32.mrf.mxu1 }
 0x17d   :  { %v3752_v17 = vadd.f32 %v484_v6, %v392_v9  ;;  %v3754_v18 = vadd.f32 %v573_v7, %v392_v9 }
 0x17e   :  { %v486_v8 = vpop.f32.mrf.mxu0  ;;  %v575_v29 = vpop.f32.mrf.mxu1 }
 0x17f   :  { %v3756_v20 = vadd.f32 %v486_v8, %v392_v9  ;;  %v3758_v21 = vadd.f32 %v575_v29, %v392_v9  ;;  %v3769_v41 = vmul.f32 %v614_v34, %v3752_v17  ;;  %v3772_v42 = vmul.f32 %v614_v34, %v3754_v18  ;;  %v667_v9 = vpop.permute.xlu1 %666 }
 0x180   :  { %v490_v10 = vpop.f32.mrf.mxu0  ;;  %v579_v11 = vpop.f32.mrf.mxu1 }
 0x181   :  { %v3760_v23 = vadd.f32 %v490_v10, %v397_v4  ;;  %v3762_v24 = vadd.f32 %v579_v11, %v397_v4  ;;  %v629_v43 = vmul.f32 %v614_v34, %v3756_v20  ;;  %v631_v44 = vmul.f32 %v614_v34, %v3758_v21 }
 0x182   :  { %v492_v13 = vpop.f32.mrf.mxu0  ;;  %v581_v14 = vpop.f32.mrf.mxu1 }
 0x183   :  { %v3764_v30 = vadd.f32 %v492_v13, %v397_v4  ;;  %v3766_v32 = vadd.f32 %v581_v14, %v397_v4  ;;  %v632_v47 = vmul.f32 %v618_v27, %v3760_v23  ;;  %v634_v48 = vmul.f32 %v618_v27, %v3762_v24 }
 0x184   :  { %v496_v15 = vpop.f32.mrf.mxu0  ;;  %v585_v16 = vpop.f32.mrf.mxu1  ;;  %vm600_vm9 = vcmp.gt.f32.partialorder %v3760_v23, 0.0  ;;  %vm602_vm8 = vcmp.gt.f32.partialorder %v3762_v24, 0.0 }
 0x185   :  { %v633_v49 = vmul.f32 %v618_v27, %v3764_v30  ;;  %v635_v50 = vmul.f32 %v618_v27, %v3766_v32  ;;  %v497_v51 = vadd.f32 %v496_v15, %v402_v33  ;;  %v586_v52 = vadd.f32 %v585_v16, %v402_v33 }
 0x186   :  { %v498_v25 = vpop.f32.mrf.mxu0  ;;  %v587_v26 = vpop.f32.mrf.mxu1  ;;  %vm601_vm3 = vcmp.gt.f32.partialorder %v3764_v30, 0.0  ;;  %vm603_vm7 = vcmp.gt.f32.partialorder %v3766_v32, 0.0  ;;  %v648_v6 = vsel %vm600_vm9, %v3760_v23, %v632_v47  ;;  %v650_v7 = vsel %vm602_vm8, %v3762_v24, %v634_v48 }
 0x187   :  { %v499_v35 = vadd.f32 %v498_v25, %v402_v33  ;;  %v588_v36 = vadd.f32 %v587_v26, %v402_v33  ;;  %v636_v61 = vmul.f32 %v622_v12, %v497_v51  ;;  %v638_v62 = vmul.f32 %v622_v12, %v586_v52 }
 0x188   :  { %v502_v37 = vpop.f32.mrf.mxu0  ;;  %v591_v38 = vpop.f32.mrf.mxu1  ;;  %vm604_vm6 = vcmp.gt.f32.partialorder %v497_v51, 0.0  ;;  %vm606_vm4 = vcmp.gt.f32.partialorder %v586_v52, 0.0  ;;  %v649_v4 = vsel %vm601_vm3, %v3764_v30, %v633_v49  ;;  %vm828_vm3 = vcmask 135168  }
 0x189   :  { %v503_v39 = vadd.f32 %v502_v37, %v407_v28  ;;  %v592_v40 = vadd.f32 %v591_v38, %v407_v28  ;;  %v637_v53 = vmul.f32 %v622_v12, %v499_v35  ;;  %v639_v54 = vmul.f32 %v622_v12, %v588_v36  ;;  %829 = vst.msk [vmem:[#allocation3] sm:$0x1f] %vm828_vm3, %v5090_v0 }
 0x18a   :  { %v504_v45 = vpop.f32.mrf.mxu0  ;;  %v593_v46 = vpop.f32.mrf.mxu1  ;;  %vm605_vm2 = vcmp.gt.f32.partialorder %v499_v35, 0.0  ;;  %vm607_vm5 = vcmp.gt.f32.partialorder %v588_v36, 0.0  ;;  %v654_v33 = vsel %vm606_vm4, %v586_v52, %v638_v62  ;;  %v26_v12 = vand.u32 127, %v25_v19 }
 0x18b   :  { %v505_v55 = vadd.f32 %v504_v45, %v407_v28  ;;  %v594_v56 = vadd.f32 %v593_v46, %v407_v28  ;;  %vm608_vm0 = vcmp.gt.f32.partialorder %v503_v39, 0.0  ;;  %v640_v57 = vmul.f32 %v626_v5, %v503_v39 }
 0x18c   :  { %vm610_vm11 = vcmp.gt.f32.partialorder %v592_v40, 0.0  ;;  %v642_v58 = vmul.f32 %v626_v5, %v592_v40  ;;  %v653_v22 = vsel %vm605_vm2, %v499_v35, %v637_v53  ;;  %v655_v31 = vsel %vm607_vm5, %v588_v36, %v639_v54 }
 0x18d   :  { %v641_v59 = vmul.f32 %v626_v5, %v505_v55  ;;  %v643_v60 = vmul.f32 %v626_v5, %v594_v56  ;;  %vm609_vm15 = vcmp.gt.f32.partialorder %v505_v55, 0.0  ;;  %vm611_vm1 = vcmp.gt.f32.partialorder %v594_v56, 0.0 }
 0x18e   :  { %v656_v2 = vsel %vm608_vm0, %v503_v39, %v640_v57  ;;  %v658_v3 = vsel %vm610_vm11, %v592_v40, %v642_v58  ;;  %v652_v28 = vsel %vm604_vm6, %v497_v51, %v636_v61  ;;  %vm597_vm0 = vcmp.gt.f32.partialorder %v3756_v20, 0.0  ;;  %v664_v61 = vpop.permute.xlu1 %663 }
 0x18f   :  { %v657_v63 = vsel %vm609_vm15, %v505_v55, %v641_v59  ;;  %v659_v1 = vsel %vm611_vm1, %v594_v56, %v643_v60  ;;  %vm599_vm11 = vcmp.gt.f32.partialorder %v3758_v21, 0.0  ;;  %vm596_vm15 = vcmp.gt.f32.partialorder %v3752_v17, 0.0 }
 0x190   :  { %694 = vmatprep.subr.mxu0 %v657_v63  ;;  %765 = vmatprep.subr.mxu1 %v659_v1  ;;  %vm598_vm1 = vcmp.gt.f32.partialorder %v3754_v18, 0.0  ;;  %v651_v5 = vsel %vm603_vm7, %v3766_v32, %v635_v50  ;;  %v645_v8 = vsel %vm597_vm0, %v3756_v20, %v629_v43  ;;  %v647_v29 = vsel %vm599_vm11, %v3758_v21, %v631_v44  ;;  %v818_v1 = vpop.permute.xlu0 %817 }
 0x191   :  { %695 = vmatpush1.msra.mxu0 %v656_v2  ;;  %766 = vmatpush1.msra.mxu1 %v658_v3  ;;  %v644_v10 = vsel %vm596_vm15, %v3752_v17, %v3769_v41  ;;  %v646_v11 = vsel %vm598_vm1, %v3754_v18, %v3772_v42  ;;  %v28_v13 = vadd.s32 256, %v26_v12  ;;  %v30_v14 = vcvt.s32.f32 %v26_v12 }
 0x192   :  { %696 = vmatprep.subr.mxu0 %v653_v22  ;;  %767 = vmatprep.subr.mxu1 %v655_v31  ;;  %v27_v16 = vadd.s32 128, %v26_v12  ;;  %v29_v18 = vadd.s32 384, %v26_v12  ;;  %vm830_vm11 = vcmask 274568  }
 0x193   :  { %697 = vmatpush1.msra.mxu0 %v652_v28  ;;  %768 = vmatpush1.msra.mxu1 %v654_v33  ;;  %v32_v15 = vcvt.s32.f32 %v28_v13  ;;  %v34_v17 = vadd.f32 0.5, %v30_v14  ;;  %831 = vst.msk [vmem:[#allocation3 + $0x20] sm:$0x1f] %vm830_vm11, %v5090_v0  ;;  %vm5130_vm11 = vcmask 900096  }
 0x194   :  { %698 = vmatprep.subr.mxu0 %v649_v4  ;;  %769 = vmatprep.subr.mxu1 %v651_v5  ;;  %v31_v20 = vcvt.s32.f32 %v27_v16  ;;  %v33_v23 = vcvt.s32.f32 %v29_v18 }
 0x195   :  { %699 = vmatpush1.msra.mxu0 %v648_v6  ;;  %770 = vmatpush1.msra.mxu1 %v650_v7  ;;  %v36_v34 = vadd.f32 0.5, %v32_v15  ;;  %v38_v21 = vmul.f32 0.0625, %v34_v17 }
 0x196   :  { %700 = vmatprep.subr.mxu0 %v645_v8  ;;  %771 = vmatprep.subr.mxu1 %v647_v29  ;;  %v35_v25 = vadd.f32 0.5, %v31_v20  ;;  %v37_v27 = vadd.f32 0.5, %v33_v23 }
 0x197   :  { %701 = vmatpush1.msra.mxu0 %v644_v10  ;;  %772 = vmatpush1.msra.mxu1 %v646_v11  ;;  %v40_v24 = vmul.f32 0.0625, %v36_v34  ;;  %v42_v26 = vfloor.f32 %v38_v21 }
 0x198   :  { %3384 = vmatmul.mubr.msk.f32.vlgmr.msra.gmra.mxu0 %vm409_vm10, %v667_v9  ;;  %3385 = vmatmul.mubr.msk.f32.vlgmr.msra.gmra.mxu1 %vm409_vm10, %v667_v9  ;;  %v39_v32 = vmul.f32 0.0625, %v35_v25  ;;  %v41_v36 = vmul.f32 0.0625, %v37_v27 }
 0x199   :  { %1281 = vmatprep.mubr.f32.mxu0 %v5090_v0  ;;  %1352 = vmatprep.mubr.f32.mxu1 %v5090_v0  ;;  %v44_v30 = vfloor.f32 %v40_v24  ;;  %v54_v35 = vadd.f32 0.5, %v42_v26  ;;  %v46_v46 = vmul.f32 16.0, %v42_v26 }
 0x19a   :  { %v43_v19 = vfloor.f32 %v39_v32  ;;  %v45_v39 = vfloor.f32 %v41_v36 }
 0x19b   :  { %v56_v37 = vadd.f32 0.5, %v44_v30  ;;  %v58_v38 = vmul.f32 0.0625, %v54_v35  ;;  %v48_v49 = vmul.f32 16.0, %v44_v30  ;;  %v50_v52 = vsub.f32 %v30_v14, %v46_v46 }
 0x19c   :  { %v55_v41 = vadd.f32 0.5, %v43_v19  ;;  %v57_v43 = vadd.f32 0.5, %v45_v39  ;;  %v47_v57 = vmul.f32 16.0, %v43_v19  ;;  %v49_v59 = vmul.f32 16.0, %v45_v39 }
 0x19d   :  { %v60_v40 = vmul.f32 0.0625, %v56_v37  ;;  %v62_v42 = vfloor.f32 %v58_v38  ;;  %v52_v55 = vsub.f32 %v32_v15, %v48_v49  ;;  %vm74_vm4 = vcmp.lt.f32.partialorder %v50_v52, 12.0 }
 0x19e   :  { %v59_v45 = vmul.f32 0.0625, %v55_v41  ;;  %v61_v48 = vmul.f32 0.0625, %v57_v43  ;;  %v51_v62 = vsub.f32 %v31_v20, %v47_v57  ;;  %v53_v4 = vsub.f32 %v33_v23, %v49_v59 }
 0x19f   :  { %v64_v44 = vfloor.f32 %v60_v40  ;;  %v66_v47 = vmul.f32 16.0, %v62_v42  ;;  %vm76_vm8 = vcmp.lt.f32.partialorder %v52_v55, 12.0 }
 0x1a0   :  { %v63_v51 = vfloor.f32 %v59_v45  ;;  %v65_v54 = vfloor.f32 %v61_v48  ;;  %vm75_vm6 = vcmp.lt.f32.partialorder %v51_v62, 12.0 }
 0x1a1   :  { %v68_v50 = vmul.f32 16.0, %v64_v44  ;;  %v70_v53 = vsub.f32 %v42_v26, %v66_v47 }
 0x1a2   :  { %v67_v58 = vmul.f32 16.0, %v63_v51  ;;  %v69_v60 = vmul.f32 16.0, %v65_v54 }
 0x1a3   :  { %v72_v56 = vsub.f32 %v44_v30, %v68_v50  ;;  %vm78_vm7 = vcmp.lt.f32.partialorder %v70_v53, 12.0 }
 0x1a4   :  { %v71_v63 = vsub.f32 %v43_v19, %v67_v58  ;;  %vm3823_vm2 = vmand %vm74_vm4, %vm78_vm7  ;;  %v73_v7 = vsub.f32 %v45_v39, %v69_v60 }
 0x1a5   :  { %vm80_vm9 = vcmp.lt.f32.partialorder %v72_v56, 12.0  ;;  %v3835_v11 = vsel %vm3823_vm2, 1.0, %v5090_v0 }
 0x1a6   :  { %vm3827_vm5 = vmand %vm76_vm8, %vm80_vm9  ;;  %vm79_vm0 = vcmp.lt.f32.partialorder %v71_v63, 12.0  ;;  %vm77_vm8 = vcmp.lt.f32.partialorder %v53_v4, 12.0  ;;  %vm81_vm9 = vcmp.lt.f32.partialorder %v73_v7, 12.0 }
 0x1a7   :  { %v3840_v12 = vsel %vm3827_vm5, 1.0, %v5090_v0  ;;  %vm83_vm4 = vmand %vm75_vm6, %vm79_vm0  ;;  %vm857_vm6 = vcmask 1044616   ;;  %vm848_vm0 = vcmask 138240  }
 0x1a8   :  { %v3846_v34 = vsel %vm83_vm4, 1.0, %v5090_v0  ;;  %vm85_vm5 = vmand %vm77_vm8, %vm81_vm9  ;;  %vm5133_vm4 = vcmask 916480  }
 0x1a9   :  { %v3850_v23 = vsel %vm85_vm5, 1.0, %v5090_v0 }
 0x258   :  { %v736_v2 = vpop.f32.mrf.mxu0  ;;  %v807_v3 = vpop.f32.mrf.mxu1 }
 0x259   :  { %v737_v31 = vadd.f32 %v736_v2, %v664_v61  ;;  %v808_v28 = vadd.f32 %v807_v3, %v664_v61 }
 0x25a   :  { %v738_v5 = vpop.f32.mrf.mxu0  ;;  %v809_v6 = vpop.f32.mrf.mxu1 }
 0x25b   :  { %vm812_vm15 = vcmp.gt.f32.partialorder %v737_v31, 0.0  ;;  %vm814_vm1 = vcmp.gt.f32.partialorder %v808_v28, 0.0  ;;  %v820_v8 = vmul.f32 %v818_v1, %v737_v31  ;;  %v822_v29 = vmul.f32 %v818_v1, %v808_v28 }
 0x25c   :  { %v739_v9 = vadd.f32 %v738_v5, %v664_v61  ;;  %v810_v10 = vadd.f32 %v809_v6, %v664_v61 }
 0x25d   :  { %v824_v13 = vsel %vm812_vm15, %v737_v31, %v820_v8  ;;  %v826_v14 = vsel %vm814_vm1, %v808_v28, %v822_v29  ;;  %vm5132_vm1 = vmmov %vm5130_vm11 }
 0x25e   :  { %vm813_vm7 = vcmp.gt.f32.partialorder %v739_v9, 0.0  ;;  %v821_v15 = vmul.f32 %v818_v1, %v739_v9  ;;  %v832_v16 = vmul.f32 %v3835_v11, %v824_v13  ;;  %v834_v17 = vmul.f32 %v3840_v12, %v826_v14  ;;  %vm5138_vm5 = vmmov %vm5132_vm1 }
 0x25f   :  { %v823_v18 = vmul.f32 %v818_v1, %v810_v10  ;;  %vm815_vm2 = vcmp.gt.f32.partialorder %v810_v10, 0.0 }
 0x260   :  { %v825_v20 = vsel %vm813_vm7, %v739_v9, %v821_v15  ;;  %840 = vrot.lane.b32.xlu1 %v832_v16, %s3522_s0  ;;  %844 = vrot.lane.b32.xlu0 %v834_v17, %s3522_s0  ;;  %vm5134_vm7 = vmmov %vm5133_vm4 }
 0x261   :  { %v833_v21 = vmul.f32 %v3846_v34, %v825_v20  ;;  %v827_v24 = vsel %vm815_vm2, %v810_v10, %v823_v18  ;;  %vm5137_vm2 = vcmask 1039360  }
 0x262   :  { %v835_v25 = vmul.f32 %v3850_v23, %v827_v24 }
 0x264   :  { %842 = vrot.lane.b32.xlu1 %v833_v21, %s3522_s0 }
 0x268   :  { %846 = vrot.lane.b32.xlu1 %v835_v25, %s3522_s0 }
 0x2d2   :  { %v841_v26 = vpop.permute.xlu1 %840  ;;  %v845_v27 = vpop.permute.xlu0 %844 }
 0x2d3   :  { %858 = vst.msk [vmem:[#allocation3] sm:$0x1f] %vm857_vm6, %v841_v26  ;;  %vm5139_vm6 = vmmov %vm5132_vm1 }
 0x2d6   :  { %v843_v30 = vpop.permute.xlu1 %842 }
 0x2d7   :  { %v849_v32 = vsel %vm848_vm0, %v841_v26, %v843_v30  ;;  %v850_v35 = vsel %vm848_vm0, %v843_v30, %v845_v27 }
 0x2d8   :  { %859 = vst [vmem:[#allocation3 + $0x8] sm:$0x1f] %v849_v32  ;;  %860 = vst [vmem:[#allocation3 + $0x10] sm:$0x1f] %v850_v35 }
 0x2da   :  { %v867_v36 = vld [vmem:[#allocation3] sm:$0x1f]  ;;  %v847_v37 = vpop.permute.xlu1 %846 }
 0x2db   :  { %v1072_v19 = vld [vmem:[#allocation3] sm:$0x1f]  ;;  %871 = vst [vmem:[#allocation4 + $0x40] sm:$0x1f] %v867_v36  ;;  %v851_v39 = vsel %vm848_vm0, %v845_v27, %v847_v37  ;;  %862 = vst.msk [vmem:[#allocation3 + $0x20] sm:$0x1f] %vm828_vm3, %v847_v37 }
 0x2dc   :  { %v1150_v38 = vld [vmem:[#allocation3] sm:$0x1f]  ;;  %v1082_v40 = vrot.slane %v1072_v19, 2  ;;  %861 = vst [vmem:[#allocation3 + $0x18] sm:$0x1f] %v851_v39  ;;  %vm5129_vm3 = vcmask 908288  }
 0x2dd   :  { %1160 = vrot.lane.b32.xlu0 %v1150_v38, %s3507_s28  ;;  %v994_v41 = vld [vmem:[#allocation3] sm:$0x1f]  ;;  %vm5131_vm15 = vmmov %vm5129_vm3  ;;  %vm5140_vm0 = vcmask 1031168  }
 0x2de   :  { %1087 = vrot.lane.b32.xlu1 %v1082_v40, %s3505_s22  ;;  %v1004_v42 = vrot.slane %v994_v41, 4  ;;  %v953_v43 = vld [vmem:[#allocation3] sm:$0x1f]  ;;  %vm5135_vm8 = vmmov %vm5129_vm3 }
 0x2df   :  { %v1113_v45 = vld [vmem:[#allocation3] sm:$0x1f]  ;;  %v963_v46 = vrot.slane %v953_v43, 1  ;;  %v1152_v53 = vld [vmem:[#allocation3 + $0x10] sm:$0x1f]  ;;  %vm5136_vm9 = vmmov %vm5129_vm3 }
 0x2e0   :  { %v916_v47 = vld [vmem:[#allocation3] sm:$0x1f]  ;;  %v1123_v48 = vrot.slane %v1113_v45, 5  ;;  %v868_v55 = vld [vmem:[#allocation3 + $0x8] sm:$0x1f] }
 0x2e1   :  { %v1035_v49 = vld [vmem:[#allocation3] sm:$0x1f]  ;;  %v926_v50 = vrot.slane %v916_v47, 6  ;;  %872 = vst [vmem:[#allocation4 + $0x8] sm:$0x1f] %v868_v55 }
 0x2e2   :  { %1009 = vrot.lane.b32.xlu1 %v1004_v42, %s3516_s6  ;;  %v1154_v44 = vld [vmem:[#allocation3 + $0x20] sm:$0x1f]  ;;  %v1045_v51 = vrot.slane %v1035_v49, 7  ;;  %v869_v57 = vld [vmem:[#allocation3 + $0x10] sm:$0x1f] }
 0x2e3   :  { %1168 = vrot.lane.b32.xlu0 %v1154_v44, %s3507_s28  ;;  %v875_v52 = vld [vmem:[#allocation3] sm:$0x1f]  ;;  %v870_v56 = vld [vmem:[#allocation3 + $0x18] sm:$0x1f]  ;;  %873 = vst [vmem:[#allocation4 + $0x20] sm:$0x1f] %v869_v57 }
 0x2e4   :  { %v885_v54 = vrot.slane %v875_v52, 3  ;;  %v1153_v58 = vld [vmem:[#allocation3 + $0x18] sm:$0x1f]  ;;  %v957_v59 = vld [vmem:[#allocation3 + $0x20] sm:$0x1f] }
 0x2e5   :  { %874 = vst [vmem:[#allocation4 + $0x58] sm:$0x1f] %v870_v56  ;;  %v1151_v60 = vld [vmem:[#allocation3 + $0x8] sm:$0x1f]  ;;  %v1076_v61 = vld [vmem:[#allocation3 + $0x20] sm:$0x1f] }
 0x2e6   :  { %968 = vrot.lane.b32.xlu1 %v963_v46, %s3515_s29  ;;  %v967_v62 = vrot.slane %v957_v59, 1  ;;  %v879_v63 = vld [vmem:[#allocation3 + $0x20] sm:$0x1f]  ;;  %v1086_v1 = vrot.slane %v1076_v61, 2  ;;  %v1073_v22 = vld [vmem:[#allocation3 + $0x8] sm:$0x1f] }
 0x2e7   :  { %1128 = vrot.lane.b32.xlu0 %v1123_v48, %s3506_s27  ;;  %v1117_v2 = vld [vmem:[#allocation3 + $0x20] sm:$0x1f]  ;;  %v889_v3 = vrot.slane %v879_v63, 3  ;;  %v1083_v33 = vrot.slane %v1073_v22, 2  ;;  %v1114_v4 = vld [vmem:[#allocation3 + $0x8] sm:$0x1f] }
 0x2e8   :  { %v1127_v31 = vrot.slane %v1117_v2, 5  ;;  %v998_v28 = vld [vmem:[#allocation3 + $0x20] sm:$0x1f]  ;;  %v1124_v7 = vrot.slane %v1114_v4, 5  ;;  %v995_v8 = vld [vmem:[#allocation3 + $0x8] sm:$0x1f] }
 0x2e9   :  { %v1008_v5 = vrot.slane %v998_v28, 4  ;;  %v1039_v6 = vld [vmem:[#allocation3 + $0x20] sm:$0x1f]  ;;  %v1074_v9 = vld [vmem:[#allocation3 + $0x10] sm:$0x1f]  ;;  %v1005_v10 = vrot.slane %v995_v8, 4 }
 0x2ea   :  { %931 = vrot.lane.b32.xlu1 %v926_v50, %s3512_s18  ;;  %v1049_v29 = vrot.slane %v1039_v6, 7  ;;  %v1036_v13 = vld [vmem:[#allocation3 + $0x8] sm:$0x1f]  ;;  %v1084_v14 = vrot.slane %v1074_v9, 2  ;;  %v1115_v15 = vld [vmem:[#allocation3 + $0x10] sm:$0x1f] }
 0x2eb   :  { %1050 = vrot.lane.b32.xlu0 %v1045_v51, %s3517_s7  ;;  %v1046_v16 = vrot.slane %v1036_v13, 7  ;;  %v1075_v17 = vld [vmem:[#allocation3 + $0x18] sm:$0x1f]  ;;  %v1125_v18 = vrot.slane %v1115_v15, 5  ;;  %v996_v20 = vld [vmem:[#allocation3 + $0x10] sm:$0x1f] }
 0x2ec   :  { %v1085_v21 = vrot.slane %v1075_v17, 2  ;;  %v1116_v24 = vld [vmem:[#allocation3 + $0x18] sm:$0x1f]  ;;  %v1006_v25 = vrot.slane %v996_v20, 4  ;;  %v1037_v26 = vld [vmem:[#allocation3 + $0x10] sm:$0x1f] }
 0x2ed   :  { %v1126_v27 = vrot.slane %v1116_v24, 5  ;;  %v954_v30 = vld [vmem:[#allocation3 + $0x8] sm:$0x1f]  ;;  %v1047_v32 = vrot.slane %v1037_v26, 7  ;;  %v955_v35 = vld [vmem:[#allocation3 + $0x10] sm:$0x1f] }
 0x2ee   :  { %1164 = vrot.lane.b32.xlu1 %v1152_v53, %s3507_s28  ;;  %v964_v36 = vrot.slane %v954_v30, 1  ;;  %v997_v37 = vld [vmem:[#allocation3 + $0x18] sm:$0x1f]  ;;  %v965_v19 = vrot.slane %v955_v35, 1  ;;  %v876_v38 = vld [vmem:[#allocation3 + $0x8] sm:$0x1f] }
 0x2ef   :  { %890 = vrot.lane.b32.xlu0 %v885_v54, %s3511_s12  ;;  %v1007_v39 = vrot.slane %v997_v37, 4  ;;  %v1038_v40 = vld [vmem:[#allocation3 + $0x18] sm:$0x1f]  ;;  %v886_v41 = vrot.slane %v876_v38, 3  ;;  %v917_v42 = vld [vmem:[#allocation3 + $0x8] sm:$0x1f] }
 0x2f0   :  { %v1048_v43 = vrot.slane %v1038_v40, 7  ;;  %v877_v44 = vld [vmem:[#allocation3 + $0x10] sm:$0x1f]  ;;  %v927_v45 = vrot.slane %v917_v42, 6  ;;  %v956_v46 = vld [vmem:[#allocation3 + $0x18] sm:$0x1f] }
 0x2f1   :  { %v887_v47 = vrot.slane %v877_v44, 3  ;;  %v918_v48 = vld [vmem:[#allocation3 + $0x10] sm:$0x1f]  ;;  %v966_v49 = vrot.slane %v956_v46, 1  ;;  %v878_v50 = vld [vmem:[#allocation3 + $0x18] sm:$0x1f] }
 0x2f2   :  { %1166 = vrot.lane.b32.xlu1 %v1153_v58, %s3507_s28  ;;  %v928_v51 = vrot.slane %v918_v48, 6  ;;  %v920_v52 = vld [vmem:[#allocation3 + $0x20] sm:$0x1f]  ;;  %v888_v53 = vrot.slane %v878_v50, 3  ;;  %v919_v54 = vld [vmem:[#allocation3 + $0x18] sm:$0x1f] }
 0x2f3   :  { %1162 = vrot.lane.b32.xlu0 %v1151_v60, %s3507_s28  ;;  %v930_v55 = vrot.slane %v920_v52, 6  ;;  %v929_v56 = vrot.slane %v919_v54, 6  ;;  %v1182_v57 = vld [vmem:[#allocation7] sm:$0x1f]  ;;  %v3523_v58 = vmov 116   ;;  %v3524_v59 = vmov 117  }
 0x2f4   :  { %3451 = vset.pattern.permute.xlu1 %v3523_v58  ;;  %3452 = vset.pattern.permute.xlu0 %v3524_v59  ;;  %v3894_v60 = vld [vmem:[#allocation7] sm:$0xff] }
 0x2f5   :  { %v3898_v61 = vld [vmem:[#allocation7 + $0x20] sm:$0xff] }
 0x2f6   :  { %976 = vrot.lane.b32.xlu1 %v967_v62, %s3515_s29  ;;  %v3900_v62 = vld [vmem:[#allocation7 + $0x40] sm:$0xff] }
 0x2f7   :  { %1095 = vrot.lane.b32.xlu0 %v1086_v1, %s3505_s22  ;;  %v3903_v63 = vld [vmem:[#allocation7 + $0x60] sm:$0xff] }
 0x2fa   :  { %898 = vrot.lane.b32.xlu1 %v889_v3, %s3511_s12 }
 0x2fb   :  { %1136 = vrot.lane.b32.xlu0 %v1127_v31, %s3506_s27 }
 0x2fe   :  { %1089 = vrot.lane.b32.xlu1 %v1083_v33, %s3505_s22 }
 0x2ff   :  { %1017 = vrot.lane.b32.xlu0 %v1008_v5, %s3516_s6 }
 0x302   :  { %1130 = vrot.lane.b32.xlu1 %v1124_v7, %s3506_s27 }
 0x303   :  { %1058 = vrot.lane.b32.xlu0 %v1049_v29, %s3517_s7 }
 0x306   :  { %1011 = vrot.lane.b32.xlu1 %v1005_v10, %s3516_s6 }
 0x307   :  { %1091 = vrot.lane.b32.xlu0 %v1084_v14, %s3505_s22 }
 0x30a   :  { %1052 = vrot.lane.b32.xlu1 %v1046_v16, %s3517_s7 }
 0x30b   :  { %1132 = vrot.lane.b32.xlu0 %v1125_v18, %s3506_s27 }
 0x30e   :  { %1093 = vrot.lane.b32.xlu1 %v1085_v21, %s3505_s22 }
 0x30f   :  { %1013 = vrot.lane.b32.xlu0 %v1006_v25, %s3516_s6 }
 0x312   :  { %1134 = vrot.lane.b32.xlu1 %v1126_v27, %s3506_s27 }
 0x313   :  { %1054 = vrot.lane.b32.xlu0 %v1047_v32, %s3517_s7 }
 0x316   :  { %970 = vrot.lane.b32.xlu1 %v964_v36, %s3515_s29 }
 0x317   :  { %972 = vrot.lane.b32.xlu0 %v965_v19, %s3515_s29 }
 0x31a   :  { %1015 = vrot.lane.b32.xlu1 %v1007_v39, %s3516_s6 }
 0x31b   :  { %892 = vrot.lane.b32.xlu0 %v886_v41, %s3511_s12 }
 0x31e   :  { %1056 = vrot.lane.b32.xlu1 %v1048_v43, %s3517_s7 }
 0x31f   :  { %933 = vrot.lane.b32.xlu0 %v927_v45, %s3512_s18 }
 0x322   :  { %894 = vrot.lane.b32.xlu1 %v887_v47, %s3511_s12 }
 0x323   :  { %974 = vrot.lane.b32.xlu0 %v966_v49, %s3515_s29 }
 0x326   :  { %935 = vrot.lane.b32.xlu1 %v928_v51, %s3512_s18 }
 0x327   :  { %896 = vrot.lane.b32.xlu0 %v888_v53, %s3511_s12 }
 0x32a   :  { %939 = vrot.lane.b32.xlu1 %v930_v55, %s3512_s18 }
 0x32b   :  { %937 = vrot.lane.b32.xlu0 %v929_v56, %s3512_s18 }
 0x32e   :  { %1209 = vperm.xlu1 %3451, %v1182_v57  }
 0x32f   :  { %1212 = vrot.lane.b32.xlu0 %v1182_v57, %s3494_s19  ;;  %s3528_s19 = smov 3  }
 0x332   :  { %1399 = vrot.lane.b32.xlu1 %v3894_v60, %s3525_s8 }
 0x333   :  { %1364 = vperm.xlu0 %3452, %v1182_v57  }
 0x336   :  { %1401 = vrot.lane.b32.xlu1 %v3898_v61, %s3525_s8 }
 0x337   :  { %1403 = vrot.lane.b32.xlu0 %v3900_v62, %s3525_s8 }
 0x33a   :  { %1405 = vrot.lane.b32.xlu1 %v3903_v63, %s3525_s8 }
 0x34f   :  { %v1161_v2 = vpop.permute.xlu0 %1160 }
 0x350   :  { %v1088_v1 = vpop.permute.xlu1 %1087 }
 0x354   :  { %v1010_v3 = vpop.permute.xlu1 %1009 }
 0x355   :  { %v1169_v22 = vpop.permute.xlu0 %1168 }
 0x358   :  { %v3907_v31 = vpop.permute.xlu1 %968 }
 0x359   :  { %v1129_v28 = vpop.permute.xlu0 %1128 }
 0x35c   :  { %v3909_v33 = vpop.permute.xlu1 %931 }
 0x35d   :  { %v1051_v4 = vpop.permute.xlu0 %1050 }
 0x360   :  { %v1165_v5 = vpop.permute.xlu1 %1164 }
 0x361   :  { %v3911_v6 = vpop.permute.xlu0 %890 }
 0x364   :  { %v1167_v7 = vpop.permute.xlu1 %1166 }
 0x365   :  { %v1172_v8 = vsel %vm231_vm14, %v1165_v5, %v1167_v7  ;;  %v1173_v29 = vsel %vm231_vm14, %v1167_v7, %v1169_v22  ;;  %v1163_v9 = vpop.permute.xlu0 %1162 }
 0x366   :  { %1180 = vst [vmem:[#allocation4 + $0xb0] sm:$0x1f] %v1172_v8  ;;  %1181 = vst [vmem:[#allocation4 + $0x28] sm:$0x1f] %v1173_v29  ;;  %v1170_v10 = vsel %vm231_vm14, %v1161_v2, %v1163_v9  ;;  %v1171_v13 = vsel %vm231_vm14, %v1163_v9, %v1165_v5 }
 0x367   :  { %1178 = vst [vmem:[#allocation4 + $0x90] sm:$0x1f] %v1170_v10  ;;  %1179 = vst [vmem:[#allocation4 + $0xa0] sm:$0x1f] %v1171_v13 }
 0x368   :  { %v3917_v14 = vpop.permute.xlu1 %976 }
 0x369   :  { %v1096_v15 = vpop.permute.xlu0 %1095 }
 0x36c   :  { %v3919_v16 = vpop.permute.xlu1 %898 }
 0x36d   :  { %v1206_v17 = vld [vmem:[#allocation4 + $0x28] sm:$0xff]  ;;  %v1205_v18 = vld [vmem:[#allocation4 + $0xb0] sm:$0xff]  ;;  %v1137_v20 = vpop.permute.xlu0 %1136 }
 0x36e   :  { %1308 = vmatprep.subr.mxu1 %v1206_v17  ;;  %v1204_v21 = vld [vmem:[#allocation4 + $0xa0] sm:$0xff]  ;;  %v1203_v24 = vld [vmem:[#allocation4 + $0x90] sm:$0xff] }
 0x36f   :  { %1309 = vmatpush1.msra.mxu1 %v1205_v18  ;;  %1237 = vmatprep.subr.mxu0 %v1204_v21 }
 0x370   :  { %v1090_v25 = vpop.permute.xlu1 %1089  ;;  %1238 = vmatpush1.msra.mxu0 %v1203_v24 }
 0x371   :  { %v1097_v26 = vsel %vm209_vm12, %v1088_v1, %v1090_v25  ;;  %v1018_v27 = vpop.permute.xlu0 %1017 }
 0x372   :  { %1105 = vst [vmem:[#allocation4 + $0x60] ss:$44 sps:$4 sm:$0xc7] %v1097_v26  }
 0x374   :  { %v1131_v30 = vpop.permute.xlu1 %1130 }
 0x375   :  { %v1138_v32 = vsel %vm220_vm13, %v1129_v28, %v1131_v30  ;;  %v1059_v35 = vpop.permute.xlu0 %1058 }
 0x376   :  { %1146 = vst [vmem:[#allocation4 + $0x60] sm:$0xf8] %v1138_v32 }
 0x378   :  { %v1012_v36 = vpop.permute.xlu1 %1011 }
 0x379   :  { %v1019_v37 = vsel %vm5129_vm3, %v1010_v3, %v1012_v36  ;;  %v1092_v19 = vpop.permute.xlu0 %1091  ;;  %vm5141_vm3 = vmmov %vm5137_vm2 }
 0x37a   :  { %1027 = vst [vmem:[#allocation4 + $0x88] ss:$-108 sps:$4 sm:$0xf1] %v1019_v37   ;;  %v1098_v38 = vsel %vm209_vm12, %v1090_v25, %v1092_v19 }
 0x37b   :  { %1106 = vst [vmem:[#allocation4 + $0x98] ss:$-76 sps:$4 sm:$0xc7] %v1098_v38  }
 0x37c   :  { %v1053_v39 = vpop.permute.xlu1 %1052 }
 0x37d   :  { %v1060_v40 = vsel %vm5130_vm11, %v1051_v4, %v1053_v39  ;;  %v1133_v41 = vpop.permute.xlu0 %1132  ;;  %v1199_v55 = vld [vmem:[#allocation4 + $0x60] sm:$0xff]  ;;  %vm5142_vm11 = vmmov %vm5133_vm4 }
 0x37e   :  { %1068 = vst [vmem:[#allocation4 + $0x88] sm:$0x3e] %v1060_v40  ;;  %v1139_v42 = vsel %vm220_vm13, %v1131_v30, %v1133_v41 }
 0x37f   :  { %1147 = vst [vmem:[#allocation4 + $0x98] sm:$0xf8] %v1139_v42 }
 0x380   :  { %v1094_v43 = vpop.permute.xlu1 %1093 }
 0x381   :  { %v1099_v44 = vsel %vm209_vm12, %v1092_v19, %v1094_v43  ;;  %v1100_v45 = vsel %vm209_vm12, %v1094_v43, %v1096_v15  ;;  %v1014_v46 = vpop.permute.xlu0 %1013 }
 0x382   :  { %1107 = vst [vmem:[#allocation4] ss:$20 sps:$4 sm:$0xc7] %v1099_v44   ;;  %1108 = vst [vmem:[#allocation4 + $0xa8] ss:$-108 sps:$4 sm:$0xc7] %v1100_v45   ;;  %v1020_v47 = vsel %vm5131_vm15, %v1012_v36, %v1014_v46 }
 0x383   :  { %1028 = vst [vmem:[#allocation4 + $0x48] ss:$-20 sps:$4 sm:$0xf1] %v1020_v47   ;;  %vm5143_vm15 = vmmov %vm5133_vm4  ;;  %v3526_v47 = vmov 123  }
 0x384   :  { %v1135_v48 = vpop.permute.xlu1 %1134  ;;  %3453 = vset.pattern.permute.xlu0 %v3526_v47  ;;  %3454 = vset.pattern.permute.xlu1 %v3526_v47 }
 0x385   :  { %v1140_v49 = vsel %vm220_vm13, %v1133_v41, %v1135_v48  ;;  %v1141_v50 = vsel %vm220_vm13, %v1135_v48, %v1137_v20  ;;  %v1055_v51 = vpop.permute.xlu0 %1054  ;;  %v1195_v7 = vld [vmem:[#allocation4 + $0x88] sm:$0xff]  ;;  %1396 = vperm.xlu0 %3453, %v3903_v63   ;;  %1391 = vperm.xlu1 %3454, %v3900_v62   ;;  %v3527_v48 = vmov 124  }
 0x386   :  { %1148 = vst [vmem:[#allocation4] sm:$0xf8] %v1140_v49  ;;  %1149 = vst [vmem:[#allocation4 + $0xa8] sm:$0xf8] %v1141_v50  ;;  %v1061_v52 = vsel %vm5132_vm1, %v1053_v39, %v1055_v51  ;;  %v1200_v53 = vld [vmem:[#allocation4 + $0x98] sm:$0xff] }
 0x387   :  { %1069 = vst [vmem:[#allocation4 + $0x48] sm:$0x3e] %v1061_v52  ;;  %1239 = vmatprep.subr.mxu0 %v1200_v53  ;;  %vm5144_vm1 = vmmov %vm5140_vm0 }
 0x388   :  { %v971_v54 = vpop.permute.xlu1 %970  ;;  %1240 = vmatpush1.msra.mxu0 %v1199_v55 }
 0x389   :  { %v978_v56 = vsel %vm5133_vm4, %v3907_v31, %v971_v54  ;;  %v973_v57 = vpop.permute.xlu0 %972  ;;  %vm5145_vm4 = vmmov %vm5137_vm2  ;;  %1386 = vperm.xlu0 %3453, %v3898_v61   ;;  %3455 = vset.pattern.permute.xlu1 %v3527_v48 }
 0x38a   :  { %986 = vst [vmem:[#allocation4 + $0x18] ss:$84 sps:$4 sm:$0x8f] %v978_v56   ;;  %v979_v58 = vsel %vm5134_vm7, %v971_v54, %v973_v57  ;;  %vm5146_vm7 = vmmov %vm5137_vm2  ;;  %1636 = vperm.xlu1 %3455, %v3903_v63  }
 0x38b   :  { %987 = vst [vmem:[#allocation4 + $0x30] ss:$68 sps:$4 sm:$0x8f] %v979_v58  }
 0x38c   :  { %v1016_v59 = vpop.permute.xlu1 %1015 }
 0x38d   :  { %v1021_v1 = vsel %vm5135_vm8, %v1014_v46, %v1016_v59  ;;  %v1022_v2 = vsel %vm5136_vm9, %v1016_v59, %v1018_v27  ;;  %v1202_v3 = vld [vmem:[#allocation4 + $0xa8] sm:$0xff]  ;;  %v1201_v22 = vld [vmem:[#allocation4] sm:$0xff]  ;;  %v893_v28 = vpop.permute.xlu0 %892  ;;  %vm5147_vm8 = vmmov %vm5140_vm0  ;;  %1381 = vperm.xlu0 %3453, %v3894_v60  }
 0x38e   :  { %1029 = vst [vmem:[#allocation4 + $0x10] ss:$68 sps:$4 sm:$0xf1] %v1021_v1   ;;  %1030 = vst [vmem:[#allocation4 + $0x38] ss:$76 sps:$4 sm:$0xf1] %v1022_v2   ;;  %1310 = vmatprep.subr.mxu1 %v1202_v3  ;;  %v900_v31 = vsel %vm5137_vm2, %v3911_v6, %v893_v28  ;;  %1632 = vperm.xlu1 %3455, %v3900_v62  }
 0x38f   :  { %1311 = vmatpush1.msra.mxu1 %v1201_v22  ;;  %v1196_v4 = vld [vmem:[#allocation4 + $0x48] sm:$0xff]  ;;  %908 = vst [vmem:[#allocation4 + $0x68] ss:$-36 sps:$4 sm:$0xe3] %v900_v31   ;;  %vm5148_vm9 = vmmov %vm5140_vm0  ;;  %vm1214_vm2 = vcmask 392192  }
 0x390   :  { %1241 = vmatprep.subr.mxu0 %v1196_v4  ;;  %v1057_v5 = vpop.permute.xlu1 %1056 }
 0x391   :  { %v1062_v8 = vsel %vm5138_vm5, %v1055_v51, %v1057_v5  ;;  %v1063_v29 = vsel %vm5139_vm6, %v1057_v5, %v1059_v35  ;;  %1242 = vmatpush1.msra.mxu0 %v1195_v7  ;;  %v934_v9 = vpop.permute.xlu0 %933  ;;  %v1191_v15 = vld [vmem:[#allocation4 + $0x18] sm:$0xff]  ;;  %3456 = vset.pattern.permute.xlu0 %v3527_v48  ;;  %vm1416_vm6 = vcmask 1044480   ;;  %v2856_v5 = vld [vmem:[#allocation7 + $0x10] sm:$0xff] }
 0x392   :  { %1070 = vst [vmem:[#allocation4 + $0x10] sm:$0x3e] %v1062_v8  ;;  %1071 = vst [vmem:[#allocation4 + $0x38] sm:$0x3e] %v1063_v29  ;;  %v941_v10 = vsel %vm5140_vm0, %v3909_v33, %v934_v9  ;;  %v1192_v13 = vld [vmem:[#allocation4 + $0x30] sm:$0xff]  ;;  %1624 = vperm.xlu0 %3456, %v3894_v60   ;;  %1628 = vperm.xlu1 %3455, %v3898_v61   ;;  %v2857_v7 = vld [vmem:[#allocation7 + $0x18] sm:$0xff] }
 0x393   :  { %949 = vst [vmem:[#allocation4 + $0x68] sm:$0x7c] %v941_v10  ;;  %1243 = vmatprep.subr.mxu0 %v1192_v13 }
 0x394   :  { %v895_v6 = vpop.permute.xlu1 %894  ;;  %1244 = vmatpush1.msra.mxu0 %v1191_v15 }
 0x395   :  { %v901_v17 = vsel %vm5141_vm3, %v893_v28, %v895_v6  ;;  %v975_v18 = vpop.permute.xlu0 %974  ;;  %vm1407_vm3 = vcmask 39936  }
 0x396   :  { %909 = vst [vmem:[#allocation4 + $0x70] ss:$-100 sps:$4 sm:$0xe3] %v901_v17   ;;  %v980_v20 = vsel %vm5142_vm11, %v973_v57, %v975_v18  ;;  %v981_v21 = vsel %vm5143_vm15, %v975_v18, %v3917_v14  ;;  %v1183_v42 = vld [vmem:[#allocation4 + $0x40] sm:$0xff]  ;;  %3024 = vrot.lane.b32.xlu1 %v2856_v5, %s3528_s19  ;;  %3026 = vrot.lane.b32.xlu0 %v2857_v7, %s3528_s19 }
 0x397   :  { %988 = vst [vmem:[#allocation4 + $0x50] ss:$108 sps:$4 sm:$0x8f] %v980_v20   ;;  %989 = vst [vmem:[#allocation4 + $0x80] ss:$-4 sps:$4 sm:$0x8f] %v981_v21  }
 0x398   :  { %v936_v24 = vpop.permute.xlu1 %935 }
 0x399   :  { %v942_v33 = vsel %vm5144_vm1, %v934_v9, %v936_v24  ;;  %v1198_v25 = vld [vmem:[#allocation4 + $0x38] sm:$0xff]  ;;  %v1197_v26 = vld [vmem:[#allocation4 + $0x10] sm:$0xff]  ;;  %v897_v27 = vpop.permute.xlu0 %896  ;;  %vm1671_vm1 = vcmask 277504  }
 0x39a   :  { %950 = vst [vmem:[#allocation4 + $0x70] sm:$0x7c] %v942_v33  ;;  %1312 = vmatprep.subr.mxu1 %v1198_v25  ;;  %v902_v30 = vsel %vm5145_vm4, %v895_v6, %v897_v27  ;;  %v903_v32 = vsel %vm5146_vm7, %v897_v27, %v3919_v16  ;;  %v1187_v40 = vld [vmem:[#allocation4 + $0x68] sm:$0xff]  ;;  %1672 = vst.msk [vmem:[#allocation5] sm:$0xff] %vm1671_vm1, %v5090_v0 }
 0x39b   :  { %1313 = vmatpush1.msra.mxu1 %v1197_v26  ;;  %910 = vst [vmem:[#allocation4 + $0xb8] ss:$-148 sps:$4 sm:$0xe3] %v902_v30   ;;  %911 = vst [vmem:[#allocation4 + $0x78] ss:$-28 sps:$4 sm:$0xe3] %v903_v32  }
 0x39c   :  { %v940_v35 = vpop.permute.xlu1 %939  ;;  %1673 = vst.msk [vmem:[#allocation5 + $0x28] sm:$0xff] %vm1671_vm1, %v5090_v0  ;;  %1674 = vst.msk [vmem:[#allocation5 + $0x50] sm:$0xff] %vm1671_vm1, %v5090_v0 }
 0x39d   :  { %v938_v14 = vpop.permute.xlu0 %937  ;;  %v1184_v16 = vld [vmem:[#allocation4 + $0x8] sm:$0xff]  ;;  %1675 = vst.msk [vmem:[#allocation5 + $0x78] sm:$0xff] %vm1671_vm1, %v5090_v0 }
 0x39e   :  { %v943_v36 = vsel %vm5147_vm8, %v936_v24, %v938_v14  ;;  %v944_v37 = vsel %vm5148_vm9, %v938_v14, %v940_v35  ;;  %v1194_v19 = vld [vmem:[#allocation4 + $0x80] sm:$0xff]  ;;  %v1193_v38 = vld [vmem:[#allocation4 + $0x50] sm:$0xff] }
 0x39f   :  { %951 = vst [vmem:[#allocation4 + $0xb8] sm:$0x7c] %v943_v36  ;;  %952 = vst [vmem:[#allocation4 + $0x78] sm:$0x7c] %v944_v37  ;;  %1314 = vmatprep.subr.mxu1 %v1194_v19 }
 0x3a0   :  { %1315 = vmatpush1.msra.mxu1 %v1193_v38 }
 0x3a1   :  { %v1188_v39 = vld [vmem:[#allocation4 + $0x70] sm:$0xff]  ;;  %v1213_v41 = vpop.permute.xlu0 %1212 }
 0x3a2   :  { %1245 = vmatprep.subr.mxu0 %v1188_v39  ;;  %v1186_v45 = vld [vmem:[#allocation4 + $0x58] sm:$0xff]  ;;  %v1185_v46 = vld [vmem:[#allocation4 + $0x20] sm:$0xff] }
 0x3a3   :  { %1246 = vmatpush1.msra.mxu0 %v1187_v40 }
 0x3a4   :  { %1247 = vmatprep.subr.mxu0 %v1184_v16 }
 0x3a5   :  { %1248 = vmatpush1.msra.mxu0 %v1183_v42 }
 0x3a6   :  { %3386 = vmatmul.mubr.msk.f32.vlgmr.msra.gmra.mxu0 %vm1214_vm2, %v1213_v41  ;;  %v1190_v43 = vld [vmem:[#allocation4 + $0x78] sm:$0xff] }
 0x3a7   :  { %v1189_v44 = vld [vmem:[#allocation4 + $0xb8] sm:$0xff]  ;;  %1493 = vmatprep.mubr.f32.mxu0 %v5090_v0  ;;  %1316 = vmatprep.subr.mxu1 %v1190_v43 }
 0x3a8   :  { %1317 = vmatpush1.msra.mxu1 %v1189_v44 }
 0x3a9   :  { %1318 = vmatprep.subr.mxu1 %v1186_v45  ;;  %v1210_v49 = vpop.permute.xlu1 %1209 }
 0x3aa   :  { %1319 = vmatpush1.msra.mxu1 %v1185_v46 }
 0x3ab   :  { %3387 = vmatmul.mubr.msk.f32.vlgmr.msra.gmra.mxu1 %vm1214_vm2, %v1213_v41 }
 0x3ac   :  { %1582 = vmatprep.mubr.f32.mxu1 %v5090_v0 }
 0x3ad   :  { %v1400_v63 = vpop.permute.xlu1 %1399 }
 0x3ae   :  { %v1365_v52 = vpop.permute.xlu0 %1364 }
 0x3b1   :  { %v1402_v3 = vpop.permute.xlu1 %1401 }
 0x3b2   :  { %v1404_v31 = vpop.permute.xlu0 %1403 }
 0x3b5   :  { %v1406_v4 = vpop.permute.xlu1 %1405 }
 0x400   :  { %v3993_v8 = vpop.permute.xlu0 %1396  ;;  %v3995_v29 = vpop.permute.xlu1 %1391 }
 0x404   :  { %v1387_v9 = vpop.permute.xlu0 %1386 }
 0x405   :  { %v3997_v10 = vpop.permute.xlu1 %1636 }
 0x408   :  { %v1382_v13 = vpop.permute.xlu0 %1381 }
 0x409   :  { %v3999_v6 = vpop.permute.xlu1 %1632 }
 0x40d   :  { %v1625_v17 = vpop.permute.xlu0 %1624  ;;  %v1629_v25 = vpop.permute.xlu1 %1628 }
 0x466   :  { %v1283_v50 = vpop.f32.mrf.mxu0 }
 0x467   :  { %v1284_v51 = vadd.f32 %v1283_v50, %v1210_v49 }
 0x468   :  { %v1285_v53 = vpop.f32.mrf.mxu0 }
 0x469   :  { %v1286_v54 = vadd.f32 %v1285_v53, %v1210_v49  ;;  %v1367_v55 = vmul.f32 %v1365_v52, %v1284_v51  ;;  %vm1359_vm0 = vcmp.gt.f32.partialorder %v1284_v51, 0.0 }
 0x46b   :  { %vm1360_vm5 = vcmp.gt.f32.partialorder %v1286_v54, 0.0  ;;  %v1368_v56 = vmul.f32 %v1365_v52, %v1286_v54  ;;  %v1354_v57 = vpop.f32.mrf.mxu1  ;;  %v1371_v60 = vsel %vm1359_vm0, %v1284_v51, %v1367_v55 }
 0x46c   :  { %v1355_v58 = vadd.f32 %v1354_v57, %v1210_v49 }
 0x46d   :  { %v1372_v62 = vsel %vm1360_vm5, %v1286_v54, %v1368_v56  ;;  %v1356_v59 = vpop.f32.mrf.mxu1 }
 0x46e   :  { %3388 = vmatprep.subr.msk.mxu0 %vm1416_vm6, %v1372_v62  ;;  %v1357_v61 = vadd.f32 %v1356_v59, %v1210_v49  ;;  %v1369_v1 = vmul.f32 %v1365_v52, %v1355_v58  ;;  %vm1361_vm11 = vcmp.gt.f32.partialorder %v1355_v58, 0.0 }
 0x46f   :  { %3389 = vmatpush1.msk.msra.mxu0 %vm1416_vm6, %v1371_v60 }
 0x470   :  { %3390 = vmatmul.mubr.msk.f32.vlgmr.msra.gmra.mxu0 %vm1407_vm3, %v1400_v63  ;;  %vm1362_vm15 = vcmp.gt.f32.partialorder %v1357_v61, 0.0  ;;  %v1370_v2 = vmul.f32 %v1365_v52, %v1357_v61  ;;  %v1373_v28 = vsel %vm1361_vm11, %v1355_v58, %v1369_v1 }
 0x471   :  { %1499 = vmatprep.mubr.f32.mxu0 %v5090_v0 }
 0x472   :  { %v1374_v22 = vsel %vm1362_vm15, %v1357_v61, %v1370_v2 }
 0x473   :  { %3394 = vmatprep.subr.msk.mxu1 %vm1416_vm6, %v1374_v22 }
 0x474   :  { %3391 = vmatmul.mubr.msk.f32.gmra.mxu0 %vm1407_vm3, %v1402_v3  ;;  %3395 = vmatpush1.msk.msra.mxu1 %vm1416_vm6, %v1373_v28 }
 0x475   :  { %1505 = vmatprep.mubr.f32.mxu0 %v5090_v0  ;;  %3396 = vmatmul.mubr.msk.f32.vlgmr.msra.gmra.mxu1 %vm1407_vm3, %v1400_v63 }
 0x476   :  { %1588 = vmatprep.mubr.f32.mxu1 %v5090_v0 }
 0x478   :  { %3392 = vmatmul.mubr.msk.f32.gmra.mxu0 %vm1407_vm3, %v1404_v31 }
 0x479   :  { %1511 = vmatprep.mubr.f32.mxu0 %v5090_v0  ;;  %3397 = vmatmul.mubr.msk.f32.gmra.mxu1 %vm1407_vm3, %v1402_v3 }
 0x47a   :  { %1594 = vmatprep.mubr.f32.mxu1 %v5090_v0 }
 0x47c   :  { %3393 = vmatmul.mubr.msk.f32.gmra.mxu0 %vm1407_vm3, %v1406_v4 }
 0x47d   :  { %3398 = vmatmul.mubr.msk.f32.gmra.mxu1 %vm1407_vm3, %v1404_v31 }
 0x47e   :  { %1600 = vmatprep.mubr.f32.mxu1 %v5090_v0 }
 0x481   :  { %3399 = vmatmul.mubr.msk.f32.gmra.mxu1 %vm1407_vm3, %v1406_v4 }
 0x482   :  { %3192 = vmatprep.mubr.f32.mxu1 %v5090_v0 }
 0x530   :  { %v1495_v15 = vpop.f32.mrf.mxu0 }
 0x531   :  { %v1496_v18 = vadd.f32 %v1495_v15, %v1382_v13 }
 0x532   :  { %v1497_v20 = vpop.f32.mrf.mxu0 }
 0x533   :  { %vm1607_vm4 = vcmp.gt.f32.partialorder %v1496_v18, 0.0  ;;  %v1639_v21 = vmul.f32 %v1625_v17, %v1496_v18  ;;  %v1498_v24 = vadd.f32 %v1497_v20, %v1382_v13 }
 0x534   :  { %v1501_v33 = vpop.f32.mrf.mxu0 }
 0x535   :  { %vm1608_vm7 = vcmp.gt.f32.partialorder %v1498_v24, 0.0  ;;  %v1640_v26 = vmul.f32 %v1625_v17, %v1498_v24  ;;  %v1502_v27 = vadd.f32 %v1501_v33, %v1387_v9  ;;  %v1655_v30 = vsel %vm1607_vm4, %v1496_v18, %v1639_v21  ;;  %v1584_v32 = vpop.f32.mrf.mxu1 }
 0x536   :  { %v1681_v35 = vmul.f32 %v3835_v11, %v1655_v30  ;;  %v1585_v14 = vadd.f32 %v1584_v32, %v1382_v13  ;;  %v1503_v37 = vpop.f32.mrf.mxu0  ;;  %vm1676_vm4 = vcmask 556304  }
 0x537   :  { %v1643_v36 = vmul.f32 %v1629_v25, %v1502_v27  ;;  %vm1611_vm8 = vcmp.gt.f32.partialorder %v1502_v27, 0.0  ;;  %v1586_v19 = vpop.f32.mrf.mxu1  ;;  %v1656_v38 = vsel %vm1608_vm7, %v1498_v24, %v1640_v26  ;;  %v1504_v50 = vadd.f32 %v1503_v37, %v1387_v9  ;;  %1677 = vst.msk [vmem:[#allocation5 + $0x20] sm:$0xff] %vm1676_vm4, %v5090_v0  ;;  %1678 = vst.msk [vmem:[#allocation5 + $0x48] sm:$0xff] %vm1676_vm4, %v5090_v0 }
 0x538   :  { %1713 = vrot.lane.b32.xlu1 %v1681_v35, %s3529_s9  ;;  %vm1609_vm9 = vcmp.gt.f32.partialorder %v1585_v14, 0.0  ;;  %v1641_v39 = vmul.f32 %v1625_v17, %v1585_v14  ;;  %v1587_v40 = vadd.f32 %v1586_v19, %v1382_v13  ;;  %v1682_v16 = vmul.f32 %v3846_v34, %v1656_v38  ;;  %v1507_v47 = vpop.f32.mrf.mxu0  ;;  %1679 = vst.msk [vmem:[#allocation5 + $0x70] sm:$0xff] %vm1676_vm4, %v5090_v0 }
 0x539   :  { %v1590_v41 = vpop.f32.mrf.mxu1  ;;  %v1659_v44 = vsel %vm1611_vm8, %v1502_v27, %v1643_v36  ;;  %v1508_v49 = vadd.f32 %v1507_v47, %v3995_v29  ;;  %v1644_v59 = vmul.f32 %v1629_v25, %v1504_v50  ;;  %vm1612_vm0 = vcmp.gt.f32.partialorder %v1504_v50, 0.0  ;;  %1680 = vst.msk [vmem:[#allocation5 + $0x98] sm:$0xff] %vm1676_vm4, %v5090_v0 }
 0x53a   :  { %v1657_v42 = vsel %vm1609_vm9, %v1585_v14, %v1641_v39  ;;  %v1591_v43 = vadd.f32 %v1590_v41, %v1387_v9  ;;  %vm1610_vm2 = vcmp.gt.f32.partialorder %v1587_v40, 0.0  ;;  %v1642_v46 = vmul.f32 %v1625_v17, %v1587_v40  ;;  %1715 = vrot.lane.b32.xlu0 %v1682_v16, %s3529_s9  ;;  %v1509_v63 = vpop.f32.mrf.mxu0 }
 0x53b   :  { %v1683_v45 = vmul.f32 %v3840_v12, %v1657_v42  ;;  %v1592_v48 = vpop.f32.mrf.mxu1  ;;  %v1685_v53 = vmul.f32 %v3835_v11, %v1659_v44  ;;  %v1647_v58 = vmul.f32 %v3999_v6, %v1508_v49  ;;  %v1510_v62 = vadd.f32 %v1509_v63, %v3995_v29 }
 0x53c   :  { %v1658_v51 = vsel %vm1610_vm2, %v1587_v40, %v1642_v46  ;;  %v1645_v54 = vmul.f32 %v1629_v25, %v1591_v43  ;;  %v1593_v55 = vadd.f32 %v1592_v48, %v1387_v9  ;;  %vm1613_vm5 = vcmp.gt.f32.partialorder %v1591_v43, 0.0  ;;  %v1513_v20 = vpop.f32.mrf.mxu0 }
 0x53d   :  { %1717 = vrot.lane.b32.xlu1 %v1683_v45, %s3529_s9  ;;  %v1596_v52 = vpop.f32.mrf.mxu1  ;;  %v1684_v56 = vmul.f32 %v3850_v23, %v1658_v51  ;;  %vm1615_vm6 = vcmp.gt.f32.partialorder %v1508_v49, 0.0  ;;  %vm1616_vm11 = vcmp.gt.f32.partialorder %v1510_v62, 0.0  ;;  %v1648_v22 = vmul.f32 %v3999_v6, %v1510_v62 }
 0x53e   :  { %1721 = vrot.lane.b32.xlu0 %v1685_v53, %s3529_s9  ;;  %v1597_v60 = vadd.f32 %v1596_v52, %v3995_v29  ;;  %v1646_v61 = vmul.f32 %v1629_v25, %v1593_v55  ;;  %v1661_v1 = vsel %vm1613_vm5, %v1591_v43, %v1645_v54  ;;  %vm1614_vm3 = vcmp.gt.f32.partialorder %v1593_v55, 0.0  ;;  %v4053_v43 = vpop.permute.xlu1 %3024 }
 0x53f   :  { %v1598_v57 = vpop.f32.mrf.mxu1  ;;  %v1663_v3 = vsel %vm1615_vm6, %v1508_v49, %v1647_v58  ;;  %v1687_v4 = vmul.f32 %v3840_v12, %v1661_v1  ;;  %v1660_v5 = vsel %vm1612_vm0, %v1504_v50, %v1644_v59  ;;  %v1664_v18 = vsel %vm1616_vm11, %v1510_v62, %v1648_v22 }
 0x540   :  { %v1649_v28 = vmul.f32 %v3999_v6, %v1597_v60  ;;  %v1599_v31 = vadd.f32 %v1598_v57, %v3995_v29  ;;  %v1662_v7 = vsel %vm1614_vm3, %v1593_v55, %v1646_v61  ;;  %vm1617_vm15 = vcmp.gt.f32.partialorder %v1597_v60, 0.0 }
 0x541   :  { %1719 = vrot.lane.b32.xlu1 %v1684_v56, %s3529_s9  ;;  %v1602_v2 = vpop.f32.mrf.mxu1  ;;  %v1686_v13 = vmul.f32 %v3846_v34, %v1660_v5  ;;  %v1689_v17 = vmul.f32 %v3835_v11, %v1663_v3  ;;  %v1688_v29 = vmul.f32 %v3850_v23, %v1662_v7  ;;  %v1690_v26 = vmul.f32 %v3846_v34, %v1664_v18 }
 0x542   :  { %v1603_v9 = vadd.f32 %v1602_v2, %v3993_v8  ;;  %1725 = vrot.lane.b32.xlu0 %v1687_v4, %s3529_s9  ;;  %v1665_v21 = vsel %vm1617_vm15, %v1597_v60, %v1649_v28  ;;  %v1650_v24 = vmul.f32 %v3999_v6, %v1599_v31  ;;  %vm1618_vm7 = vcmp.gt.f32.partialorder %v1599_v31, 0.0  ;;  %v1515_v6 = vpop.f32.mrf.mxu0 }
 0x543   :  { %v1604_v15 = vpop.f32.mrf.mxu1  ;;  %v1514_v27 = vadd.f32 %v1513_v20, %v3993_v8  ;;  %v1691_v30 = vmul.f32 %v3840_v12, %v1665_v21  ;;  %v1516_v37 = vadd.f32 %v1515_v6, %v3993_v8  ;;  %vm1777_vm6 = vcmask 1047824  }
 0x544   :  { %v1653_v33 = vmul.f32 %v3997_v10, %v1603_v9  ;;  %v1605_v25 = vadd.f32 %v1604_v15, %v3993_v8  ;;  %vm1621_vm8 = vcmp.gt.f32.partialorder %v1603_v9, 0.0  ;;  %v1666_v32 = vsel %vm1618_vm7, %v1599_v31, %v1650_v24 }
 0x545   :  { %1723 = vrot.lane.b32.xlu1 %v1686_v13, %s3529_s9  ;;  %v1651_v36 = vmul.f32 %v3997_v10, %v1514_v27  ;;  %vm1619_vm2 = vcmp.gt.f32.partialorder %v1514_v27, 0.0  ;;  %v1692_v19 = vmul.f32 %v3850_v23, %v1666_v32  ;;  %v1652_v16 = vmul.f32 %v3997_v10, %v1516_v37 }
 0x546   :  { %1727 = vrot.lane.b32.xlu0 %v1688_v29, %s3529_s9  ;;  %v1669_v35 = vsel %vm1621_vm8, %v1603_v9, %v1653_v33  ;;  %v1654_v14 = vmul.f32 %v3997_v10, %v1605_v25  ;;  %vm1622_vm9 = vcmp.gt.f32.partialorder %v1605_v25, 0.0  ;;  %vm1620_vm5 = vcmp.gt.f32.partialorder %v1516_v37, 0.0  ;;  %v4055_v10 = vpop.permute.xlu0 %3026 }
 0x547   :  { %v1695_v38 = vmul.f32 %v3840_v12, %v1669_v35  ;;  %v1667_v40 = vsel %vm1619_vm2, %v1514_v27, %v1651_v36  ;;  %v1668_v42 = vsel %vm1620_vm5, %v1516_v37, %v1652_v16  ;;  %vm5201_vm3 = vcmask 916480  }
 0x548   :  { %v1670_v39 = vsel %vm1622_vm9, %v1605_v25, %v1654_v14  ;;  %v1693_v41 = vmul.f32 %v3835_v11, %v1667_v40  ;;  %v1694_v12 = vmul.f32 %v3846_v34, %v1668_v42  ;;  %vm5202_vm11 = vcmask 1031168   ;;  %vm5207_vm7 = vmmov %vm5201_vm3 }
 0x549   :  { %1729 = vrot.lane.b32.xlu1 %v1689_v17, %s3529_s9  ;;  %v1696_v8 = vmul.f32 %v3850_v23, %v1670_v39  ;;  %vm5203_vm15 = vcmask 1039360   ;;  %vm5209_vm8 = vmmov %vm5201_vm3 }
 0x54a   :  { %1731 = vrot.lane.b32.xlu0 %v1690_v26, %s3529_s9  ;;  %vm5205_vm4 = vmmov %vm5203_vm15 }
 0x54b   :  { %vm5210_vm9 = vmmov %vm5201_vm3 }
 0x54c   :  { %vm5211_vm2 = vmmov %vm5202_vm11 }
 0x54d   :  { %1733 = vrot.lane.b32.xlu1 %v1691_v30, %s3529_s9  ;;  %vm5213_vm5 = vmmov %vm5211_vm2 }
 0x54e   :  { %1741 = vrot.lane.b32.xlu0 %v1695_v38, %s3529_s9 }
 0x551   :  { %1735 = vrot.lane.b32.xlu1 %v1692_v19, %s3529_s9 }
 0x552   :  { %1743 = vrot.lane.b32.xlu0 %v1696_v8, %s3529_s9 }
 0x555   :  { %1737 = vrot.lane.b32.xlu1 %v1693_v41, %s3529_s9 }
 0x559   :  { %1739 = vrot.lane.b32.xlu1 %v1694_v12, %s3529_s9 }
 0x5aa   :  { %v1714_v44 = vpop.permute.xlu1 %1713 }
 0x5ab   :  { %1778 = vst.msk [vmem:[#allocation5] sm:$0xff] %vm1777_vm6, %v1714_v44 }
 0x5ac   :  { %v1716_v23 = vpop.permute.xlu0 %1715 }
 0x5ad   :  { %v4059_v11 = vsel %vm1671_vm1, %v1714_v44, %v1716_v23 }
 0x5ae   :  { %1779 = vst [vmem:[#allocation5 + $0x8] sm:$0xff] %v4059_v11 }
 0x5af   :  { %v1718_v45 = vpop.permute.xlu1 %1717 }
 0x5b0   :  { %v4063_v46 = vsel %vm1671_vm1, %v1716_v23, %v1718_v45  ;;  %v1722_v34 = vpop.permute.xlu0 %1721 }
 0x5b1   :  { %1780 = vst [vmem:[#allocation5 + $0x10] sm:$0xff] %v4063_v46  ;;  %1783 = vst.msk [vmem:[#allocation5 + $0x28] sm:$0xff] %vm1777_vm6, %v1722_v34 }
 0x5b2   :  { %v2726_v47 = vld [vmem:[#allocation5] sm:$0xff] }
 0x5b3   :  { %2766 = vrot.lane.b32.xlu1 %v2726_v47, %s3507_s28  ;;  %1870 = vrot.lane.b32.xlu0 %v2726_v47, %s3511_s12  ;;  %v1720_v48 = vpop.permute.xlu1 %1719 }
 0x5b4   :  { %v4070_v49 = vsel %vm1671_vm1, %v1718_v45, %v1720_v48  ;;  %1782 = vst.msk [vmem:[#allocation5 + $0x20] sm:$0xff] %vm1671_vm1, %v1720_v48  ;;  %v1726_v50 = vpop.permute.xlu0 %1725 }
 0x5b5   :  { %1781 = vst [vmem:[#allocation5 + $0x18] sm:$0xff] %v4070_v49 }
 0x5b7   :  { %2638 = vrot.lane.b32.xlu1 %v2726_v47, %s3506_s27  ;;  %2126 = vrot.lane.b32.xlu0 %v2726_v47, %s3515_s29  ;;  %v1724_v51 = vpop.permute.xlu1 %1723 }
 0x5b8   :  { %v4079_v52 = vsel %vm1671_vm1, %v1722_v34, %v1724_v51  ;;  %v4082_v53 = vsel %vm1671_vm1, %v1724_v51, %v1726_v50  ;;  %v1728_v54 = vpop.permute.xlu0 %1727  ;;  %v2091_v5 = vld [vmem:[#allocation5 + $0x28] sm:$0xff] }
 0x5b9   :  { %1784 = vst [vmem:[#allocation5 + $0x30] sm:$0xff] %v4079_v52  ;;  %1785 = vst [vmem:[#allocation5 + $0x38] sm:$0xff] %v4082_v53  ;;  %v4089_v56 = vsel %vm1671_vm1, %v1726_v50, %v1728_v54 }
 0x5ba   :  { %1787 = vst.msk [vmem:[#allocation5 + $0x48] sm:$0xff] %vm1671_vm1, %v1728_v54  ;;  %1786 = vst [vmem:[#allocation5 + $0x40] sm:$0xff] %v4089_v56 }
 0x5bb   :  { %2510 = vrot.lane.b32.xlu1 %v2726_v47, %s3505_s22  ;;  %1998 = vrot.lane.b32.xlu0 %v2726_v47, %s3512_s18  ;;  %v4086_v55 = vld [vmem:[#allocation5 + $0x20] sm:$0xff]  ;;  %v1730_v63 = vpop.permute.xlu1 %1729 }
 0x5bc   :  { %1788 = vst.msk [vmem:[#allocation5 + $0x50] sm:$0xff] %vm1777_vm6, %v1730_v63  ;;  %v1732_v57 = vpop.permute.xlu0 %1731 }
 0x5bd   :  { %v4098_v58 = vsel %vm1671_vm1, %v1730_v63, %v1732_v57 }
 0x5be   :  { %1789 = vst [vmem:[#allocation5 + $0x58] sm:$0xff] %v4098_v58 }
 0x5bf   :  { %2382 = vrot.lane.b32.xlu1 %v2726_v47, %s3517_s7  ;;  %2134 = vrot.lane.b32.xlu0 %v4086_v55, %s3515_s29  ;;  %v1734_v62 = vpop.permute.xlu1 %1733 }
 0x5c0   :  { %v4105_v59 = vsel %vm1671_vm1, %v1732_v57, %v1734_v62  ;;  %v1742_v60 = vpop.permute.xlu0 %1741 }
 0x5c1   :  { %1790 = vst [vmem:[#allocation5 + $0x60] sm:$0xff] %v4105_v59  ;;  %v4187_v7 = vld [vmem:[#allocation5 + $0x48] sm:$0xff] }
 0x5c3   :  { %2254 = vrot.lane.b32.xlu1 %v2726_v47, %s3516_s6  ;;  %2006 = vrot.lane.b32.xlu0 %v4086_v55, %s3512_s18  ;;  %v1736_v61 = vpop.permute.xlu1 %1735  ;;  %v4277_v35 = vld [vmem:[#allocation5 + $0x50] sm:$0xff] }
 0x5c4   :  { %v4113_v1 = vsel %vm1671_vm1, %v1734_v62, %v1736_v61  ;;  %1792 = vst.msk [vmem:[#allocation5 + $0x70] sm:$0xff] %vm1671_vm1, %v1736_v61  ;;  %v1744_v2 = vpop.permute.xlu0 %1743  ;;  %5158 = vst [vmem:[#allocation19_spill] sm:$0xff] %v4277_v35 }
 0x5c5   :  { %1791 = vst [vmem:[#allocation5 + $0x68] sm:$0xff] %v4113_v1  ;;  %v4118_v3 = vsel %vm1671_vm1, %v1742_v60, %v1744_v2  ;;  %1797 = vst.msk [vmem:[#allocation5 + $0x98] sm:$0xff] %vm1671_vm1, %v1744_v2 }
 0x5c6   :  { %1796 = vst [vmem:[#allocation5 + $0x90] sm:$0xff] %v4118_v3 }
 0x5c7   :  { %1874 = vrot.lane.b32.xlu0 %v4063_v46, %s3511_s12  ;;  %1878 = vrot.lane.b32.xlu1 %v4086_v55, %s3511_s12  ;;  %v1738_v22 = vpop.permute.xlu1 %1737 }
 0x5c8   :  { %1793 = vst.msk [vmem:[#allocation5 + $0x78] sm:$0xff] %vm1777_vm6, %v1738_v22  ;;  %vm5214_vm6 = vmmov %vm5211_vm2 }
 0x5cb   :  { %2768 = vrot.lane.b32.xlu0 %v4059_v11, %s3507_s28  ;;  %2646 = vrot.lane.b32.xlu1 %v4086_v55, %s3506_s27  ;;  %v1740_v28 = vpop.permute.xlu1 %1739  ;;  %v4303_v40 = vld [vmem:[#allocation5 + $0x70] sm:$0xff] }
 0x5cc   :  { %v4132_v31 = vsel %vm1671_vm1, %v1738_v22, %v1740_v28  ;;  %v4135_v4 = vsel %vm1671_vm1, %v1740_v28, %v1742_v60  ;;  %vm5195_vm1 = vcmask 900096  }
 0x5cd   :  { %1794 = vst [vmem:[#allocation5 + $0x80] sm:$0xff] %v4132_v31  ;;  %1795 = vst [vmem:[#allocation5 + $0x88] sm:$0xff] %v4135_v4 }
 0x5ce   :  { %vm5197_vm0 = vmmov %vm5195_vm1 }
 0x5cf   :  { %2128 = vrot.lane.b32.xlu0 %v4059_v11, %s3515_s29  ;;  %2518 = vrot.lane.b32.xlu1 %v4086_v55, %s3505_s22 }
 0x5d3   :  { %2000 = vrot.lane.b32.xlu0 %v4059_v11, %s3512_s18  ;;  %2390 = vrot.lane.b32.xlu1 %v4086_v55, %s3517_s7 }
 0x5d7   :  { %1872 = vrot.lane.b32.xlu1 %v4059_v11, %s3511_s12  ;;  %1876 = vrot.lane.b32.xlu0 %v4070_v49, %s3511_s12 }
 0x5db   :  { %2770 = vrot.lane.b32.xlu1 %v4063_v46, %s3507_s28  ;;  %2642 = vrot.lane.b32.xlu0 %v4063_v46, %s3506_s27 }
 0x5df   :  { %2130 = vrot.lane.b32.xlu1 %v4063_v46, %s3515_s29  ;;  %2644 = vrot.lane.b32.xlu0 %v4070_v49, %s3506_s27 }
 0x5e3   :  { %2132 = vrot.lane.b32.xlu1 %v4070_v49, %s3515_s29  ;;  %2514 = vrot.lane.b32.xlu0 %v4063_v46, %s3505_s22 }
 0x5e7   :  { %2002 = vrot.lane.b32.xlu1 %v4063_v46, %s3512_s18  ;;  %2516 = vrot.lane.b32.xlu0 %v4070_v49, %s3505_s22 }
 0x5eb   :  { %2004 = vrot.lane.b32.xlu1 %v4070_v49, %s3512_s18  ;;  %2386 = vrot.lane.b32.xlu0 %v4063_v46, %s3517_s7 }
 0x5ef   :  { %2640 = vrot.lane.b32.xlu1 %v4059_v11, %s3506_s27  ;;  %2388 = vrot.lane.b32.xlu0 %v4070_v49, %s3517_s7 }
 0x5f3   :  { %2512 = vrot.lane.b32.xlu1 %v4059_v11, %s3505_s22  ;;  %2258 = vrot.lane.b32.xlu0 %v4063_v46, %s3516_s6 }
 0x5f7   :  { %2384 = vrot.lane.b32.xlu1 %v4059_v11, %s3517_s7  ;;  %2136 = vrot.lane.b32.xlu0 %v2091_v5, %s3515_s29 }
 0x5fb   :  { %2256 = vrot.lane.b32.xlu1 %v4059_v11, %s3516_s6  ;;  %2648 = vrot.lane.b32.xlu0 %v2091_v5, %s3506_s27 }
 0x5ff   :  { %2776 = vrot.lane.b32.xlu1 %v2091_v5, %s3507_s28  ;;  %2520 = vrot.lane.b32.xlu0 %v2091_v5, %s3505_s22 }
 0x603   :  { %2008 = vrot.lane.b32.xlu1 %v2091_v5, %s3512_s18  ;;  %2392 = vrot.lane.b32.xlu0 %v2091_v5, %s3517_s7 }
 0x607   :  { %1880 = vrot.lane.b32.xlu1 %v2091_v5, %s3511_s12  ;;  %2264 = vrot.lane.b32.xlu0 %v2091_v5, %s3516_s6 }
 0x60b   :  { %2144 = vrot.lane.b32.xlu1 %v4187_v7, %s3515_s29  ;;  %2656 = vrot.lane.b32.xlu0 %v4187_v7, %s3506_s27 }
 0x60f   :  { %2016 = vrot.lane.b32.xlu1 %v4187_v7, %s3512_s18  ;;  %2528 = vrot.lane.b32.xlu0 %v4187_v7, %s3505_s22 }
 0x613   :  { %1888 = vrot.lane.b32.xlu1 %v4187_v7, %s3511_s12  ;;  %2400 = vrot.lane.b32.xlu0 %v4187_v7, %s3517_s7 }
 0x617   :  { %2780 = vrot.lane.b32.xlu1 %v4082_v53, %s3507_s28  ;;  %2778 = vrot.lane.b32.xlu0 %v4079_v52, %s3507_s28 }
 0x61b   :  { %2140 = vrot.lane.b32.xlu1 %v4082_v53, %s3515_s29  ;;  %2138 = vrot.lane.b32.xlu0 %v4079_v52, %s3515_s29 }
 0x61f   :  { %2142 = vrot.lane.b32.xlu0 %v4089_v56, %s3515_s29  ;;  %2010 = vrot.lane.b32.xlu1 %v4079_v52, %s3512_s18 }
 0x623   :  { %2012 = vrot.lane.b32.xlu0 %v4082_v53, %s3512_s18  ;;  %1882 = vrot.lane.b32.xlu1 %v4079_v52, %s3511_s12 }
 0x625   :  { %v4217_v9 = vpop.permute.xlu0 %1870  ;;  %v4219_v13 = vpop.permute.xlu1 %2766 }
 0x626   :  { %5149 = vst [vmem:[#allocation10_spill] sm:$0xff] %v4217_v9  ;;  %v2858_v9 = vld [vmem:[#allocation7 + $0x20] sm:$0x1] }
 0x627   :  { %2014 = vrot.lane.b32.xlu0 %v4089_v56, %s3512_s18  ;;  %2652 = vrot.lane.b32.xlu1 %v4082_v53, %s3506_s27 }
 0x629   :  { %v4225_v15 = vpop.permute.xlu0 %2126  ;;  %v4227_v17 = vpop.permute.xlu1 %2638 }
 0x62a   :  { %5150 = vst [vmem:[#allocation11_spill] sm:$0xff] %v4227_v17 }
 0x62b   :  { %1884 = vrot.lane.b32.xlu0 %v4082_v53, %s3511_s12  ;;  %2654 = vrot.lane.b32.xlu1 %v4089_v56, %s3506_s27 }
 0x62d   :  { %v4233_v18 = vpop.permute.xlu0 %1998  ;;  %v4235_v20 = vpop.permute.xlu1 %2510 }
 0x62e   :  { %5151 = vst [vmem:[#allocation12_spill] sm:$0xff] %v4235_v20 }
 0x62f   :  { %1886 = vrot.lane.b32.xlu0 %v4089_v56, %s3511_s12  ;;  %2524 = vrot.lane.b32.xlu1 %v4082_v53, %s3505_s22 }
 0x631   :  { %v4241_v29 = vpop.permute.xlu0 %2134  ;;  %v4243_v21 = vpop.permute.xlu1 %2382 }
 0x632   :  { %5152 = vst [vmem:[#allocation13_spill] sm:$0xff] %v4243_v21 }
 0x633   :  { %2650 = vrot.lane.b32.xlu0 %v4079_v52, %s3506_s27  ;;  %2526 = vrot.lane.b32.xlu1 %v4089_v56, %s3505_s22 }
 0x635   :  { %v4249_v24 = vpop.permute.xlu0 %2006  ;;  %v4251_v33 = vpop.permute.xlu1 %2254 }
 0x636   :  { %5153 = vst [vmem:[#allocation14_spill] sm:$0xff] %v4251_v33  ;;  %v4417_v33 = vld [vmem:[#allocation5 + $0x78] sm:$0xff] }
 0x637   :  { %2522 = vrot.lane.b32.xlu0 %v4079_v52, %s3505_s22  ;;  %2396 = vrot.lane.b32.xlu1 %v4082_v53, %s3517_s7  ;;  %5183 = vst [vmem:[#allocation44_spill] sm:$0xff] %v4417_v33 }
 0x639   :  { %v4257_v25 = vpop.permute.xlu0 %1874  ;;  %v4259_v26 = vpop.permute.xlu1 %1878 }
 0x63a   :  { %5154 = vst [vmem:[#allocation15_spill] sm:$0xff] %v4257_v25  ;;  %5155 = vst [vmem:[#allocation16_spill] sm:$0xff] %v4259_v26 }
 0x63b   :  { %2394 = vrot.lane.b32.xlu0 %v4079_v52, %s3517_s7  ;;  %2398 = vrot.lane.b32.xlu1 %v4089_v56, %s3517_s7 }
 0x63d   :  { %v4265_v27 = vpop.permute.xlu0 %2768  ;;  %v4267_v6 = vpop.permute.xlu1 %2646 }
 0x63e   :  { %5156 = vst [vmem:[#allocation17_spill] sm:$0xff] %v4267_v6 }
 0x63f   :  { %2266 = vrot.lane.b32.xlu0 %v4079_v52, %s3516_s6  ;;  %2268 = vrot.lane.b32.xlu1 %v4082_v53, %s3516_s6 }
 0x641   :  { %v4273_v30 = vpop.permute.xlu0 %2128  ;;  %v4275_v32 = vpop.permute.xlu1 %2518 }
 0x642   :  { %5157 = vst [vmem:[#allocation18_spill] sm:$0xff] %v4275_v32  ;;  %v4459_v32 = vld [vmem:[#allocation5 + $0x98] sm:$0xff] }
 0x643   :  { %2786 = vrot.lane.b32.xlu1 %v4277_v35, %s3507_s28  ;;  %2146 = vrot.lane.b32.xlu0 %v4277_v35, %s3515_s29 }
 0x645   :  { %v4283_v14 = vpop.permute.xlu0 %2000  ;;  %v4285_v36 = vpop.permute.xlu1 %2390 }
 0x646   :  { %5159 = vst [vmem:[#allocation20_spill] sm:$0xff] %v4285_v36 }
 0x647   :  { %2658 = vrot.lane.b32.xlu1 %v4277_v35, %s3506_s27  ;;  %2018 = vrot.lane.b32.xlu0 %v4277_v35, %s3512_s18 }
 0x649   :  { %v4291_v37 = vpop.permute.xlu0 %1876  ;;  %v4293_v19 = vpop.permute.xlu1 %1872 }
 0x64a   :  { %5160 = vst [vmem:[#allocation21_spill] sm:$0xff] %v4291_v37  ;;  %5161 = vst [vmem:[#allocation22_spill] sm:$0xff] %v4293_v19  ;;  %v2859_v19 = vld [vmem:[#allocation7 + $0x28] sm:$0x1] }
 0x64b   :  { %2530 = vrot.lane.b32.xlu1 %v4277_v35, %s3505_s22  ;;  %1890 = vrot.lane.b32.xlu0 %v4277_v35, %s3511_s12 }
 0x64d   :  { %v4299_v38 = vpop.permute.xlu0 %2642  ;;  %v4301_v39 = vpop.permute.xlu1 %2770 }
 0x64e   :  { %5162 = vst [vmem:[#allocation23_spill] sm:$0xff] %v4299_v38 }
 0x64f   :  { %2402 = vrot.lane.b32.xlu1 %v4277_v35, %s3517_s7  ;;  %2154 = vrot.lane.b32.xlu0 %v4303_v40, %s3515_s29 }
 0x651   :  { %v4309_v16 = vpop.permute.xlu0 %2644  ;;  %v4311_v8 = vpop.permute.xlu1 %2130 }
 0x652   :  { %5163 = vst [vmem:[#allocation24_spill] sm:$0xff] %v4309_v16 }
 0x653   :  { %2274 = vrot.lane.b32.xlu1 %v4277_v35, %s3516_s6  ;;  %2026 = vrot.lane.b32.xlu0 %v4303_v40, %s3512_s18 }
 0x655   :  { %v4317_v41 = vpop.permute.xlu0 %2514  ;;  %v4319_v42 = vpop.permute.xlu1 %2132 }
 0x656   :  { %5164 = vst [vmem:[#allocation25_spill] sm:$0xff] %v4317_v41 }
 0x657   :  { %2788 = vrot.lane.b32.xlu0 %v4098_v58, %s3507_s28  ;;  %1898 = vrot.lane.b32.xlu1 %v4303_v40, %s3511_s12 }
 0x659   :  { %v4325_v12 = vpop.permute.xlu0 %2516  ;;  %v4327_v44 = vpop.permute.xlu1 %2002 }
 0x65a   :  { %5165 = vst [vmem:[#allocation26_spill] sm:$0xff] %v4325_v12 }
 0x65b   :  { %2148 = vrot.lane.b32.xlu0 %v4098_v58, %s3515_s29  ;;  %2666 = vrot.lane.b32.xlu1 %v4303_v40, %s3506_s27 }
 0x65d   :  { %v4333_v23 = vpop.permute.xlu0 %2386  ;;  %v4335_v11 = vpop.permute.xlu1 %2004 }
 0x65e   :  { %5166 = vst [vmem:[#allocation27_spill] sm:$0xff] %v4333_v23  ;;  %5167 = vst [vmem:[#allocation28_spill] sm:$0xff] %v4335_v11 }
 0x65f   :  { %2020 = vrot.lane.b32.xlu0 %v4098_v58, %s3512_s18  ;;  %2538 = vrot.lane.b32.xlu1 %v4303_v40, %s3505_s22 }
 0x661   :  { %v4341_v45 = vpop.permute.xlu0 %2388  ;;  %v4343_v46 = vpop.permute.xlu1 %2640 }
 0x662   :  { %5168 = vst [vmem:[#allocation29_spill] sm:$0xff] %v4341_v45  ;;  %5169 = vst [vmem:[#allocation30_spill] sm:$0xff] %v4343_v46 }
 0x663   :  { %1892 = vrot.lane.b32.xlu0 %v4098_v58, %s3511_s12  ;;  %2410 = vrot.lane.b32.xlu1 %v4303_v40, %s3517_s7 }
 0x665   :  { %v4349_v34 = vpop.permute.xlu0 %2258  ;;  %v4351_v47 = vpop.permute.xlu1 %2512 }
 0x666   :  { %5170 = vst [vmem:[#allocation31_spill] sm:$0xff] %v4349_v34  ;;  %5171 = vst [vmem:[#allocation32_spill] sm:$0xff] %v4351_v47 }
 0x667   :  { %2790 = vrot.lane.b32.xlu1 %v4105_v59, %s3507_s28  ;;  %1896 = vrot.lane.b32.xlu0 %v4113_v1, %s3511_s12 }
 0x669   :  { %v4357_v48 = vpop.permute.xlu0 %2136  ;;  %v4359_v50 = vpop.permute.xlu1 %2384 }
 0x66a   :  { %5172 = vst [vmem:[#allocation33_spill] sm:$0xff] %v4359_v50 }
 0x66b   :  { %2150 = vrot.lane.b32.xlu1 %v4105_v59, %s3515_s29  ;;  %2662 = vrot.lane.b32.xlu0 %v4105_v59, %s3506_s27 }
 0x66d   :  { %v4365_v51 = vpop.permute.xlu0 %2648  ;;  %v4367_v52 = vpop.permute.xlu1 %2256 }
 0x66e   :  { %5173 = vst [vmem:[#allocation34_spill] sm:$0xff] %v4365_v51  ;;  %5174 = vst [vmem:[#allocation35_spill] sm:$0xff] %v4367_v52 }
 0x66f   :  { %2664 = vrot.lane.b32.xlu0 %v4113_v1, %s3506_s27  ;;  %2152 = vrot.lane.b32.xlu1 %v4113_v1, %s3515_s29 }
 0x671   :  { %v4373_v53 = vpop.permute.xlu0 %2520  ;;  %v4375_v54 = vpop.permute.xlu1 %2776 }
 0x672   :  { %5175 = vst [vmem:[#allocation36_spill] sm:$0xff] %v4373_v53 }
 0x673   :  { %2534 = vrot.lane.b32.xlu0 %v4105_v59, %s3505_s22  ;;  %2022 = vrot.lane.b32.xlu1 %v4105_v59, %s3512_s18 }
 0x675   :  { %v4381_v63 = vpop.permute.xlu0 %2392  ;;  %v4383_v57 = vpop.permute.xlu1 %2008 }
 0x676   :  { %5176 = vst [vmem:[#allocation37_spill] sm:$0xff] %v4381_v63 }
 0x677   :  { %2536 = vrot.lane.b32.xlu0 %v4113_v1, %s3505_s22  ;;  %2024 = vrot.lane.b32.xlu1 %v4113_v1, %s3512_s18 }
 0x679   :  { %v4389_v62 = vpop.permute.xlu0 %2264  ;;  %v4391_v60 = vpop.permute.xlu1 %1880 }
 0x67a   :  { %5177 = vst [vmem:[#allocation38_spill] sm:$0xff] %v4389_v62  ;;  %5178 = vst [vmem:[#allocation39_spill] sm:$0xff] %v4391_v60 }
 0x67b   :  { %2406 = vrot.lane.b32.xlu0 %v4105_v59, %s3517_s7  ;;  %1894 = vrot.lane.b32.xlu1 %v4105_v59, %s3511_s12 }
 0x67d   :  { %v4397_v61 = vpop.permute.xlu0 %2656  ;;  %v4399_v2 = vpop.permute.xlu1 %2144 }
 0x67e   :  { %5179 = vst [vmem:[#allocation40_spill] sm:$0xff] %v4397_v61 }
 0x67f   :  { %2408 = vrot.lane.b32.xlu0 %v4113_v1, %s3517_s7  ;;  %2660 = vrot.lane.b32.xlu1 %v4098_v58, %s3506_s27 }
 0x681   :  { %v4405_v22 = vpop.permute.xlu0 %2528  ;;  %v4407_v28 = vpop.permute.xlu1 %2016 }
 0x682   :  { %5180 = vst [vmem:[#allocation41_spill] sm:$0xff] %v4405_v22 }
 0x683   :  { %2278 = vrot.lane.b32.xlu0 %v4105_v59, %s3516_s6  ;;  %2532 = vrot.lane.b32.xlu1 %v4098_v58, %s3505_s22 }
 0x685   :  { %v4413_v5 = vpop.permute.xlu0 %2400  ;;  %v4415_v0 = vpop.permute.xlu1 %1888 }
 0x686   :  { %5181 = vst [vmem:[#allocation42_spill] sm:$0xff] %v4413_v5  ;;  %5182 = vst [vmem:[#allocation43_spill] sm:$0xff] %v4415_v0 }
 0x687   :  { %2156 = vrot.lane.b32.xlu0 %v4417_v33, %s3515_s29  ;;  %2404 = vrot.lane.b32.xlu1 %v4098_v58, %s3517_s7 }
 0x689   :  { %v4423_v45 = vpop.permute.xlu0 %2778  ;;  %v4425_v36 = vpop.permute.xlu1 %2780 }
 0x68b   :  { %2668 = vrot.lane.b32.xlu0 %v4417_v33, %s3506_s27  ;;  %2276 = vrot.lane.b32.xlu1 %v4098_v58, %s3516_s6 }
 0x68d   :  { %v4431_v59 = vpop.permute.xlu0 %2138  ;;  %v4433_v52 = vpop.permute.xlu1 %2140 }
 0x68f   :  { %2540 = vrot.lane.b32.xlu0 %v4417_v33, %s3505_s22  ;;  %2796 = vrot.lane.b32.xlu1 %v4417_v33, %s3507_s28 }
 0x691   :  { %v4439_v34 = vpop.permute.xlu0 %2142  ;;  %v4441_v5 = vpop.permute.xlu1 %2010 }
 0x693   :  { %2412 = vrot.lane.b32.xlu0 %v4417_v33, %s3517_s7  ;;  %2028 = vrot.lane.b32.xlu1 %v4417_v33, %s3512_s18 }
 0x695   :  { %v4447_v58 = vpop.permute.xlu0 %2012  ;;  %v4449_v62 = vpop.permute.xlu1 %1882 }
 0x696   :  { %5184 = vst [vmem:[#allocation45_spill] sm:$0xff] %v4449_v62 }
 0x697   :  { %2284 = vrot.lane.b32.xlu0 %v4417_v33, %s3516_s6  ;;  %1900 = vrot.lane.b32.xlu1 %v4417_v33, %s3511_s12 }
 0x699   :  { %v4455_v21 = vpop.permute.xlu0 %2014  ;;  %v4457_v12 = vpop.permute.xlu1 %2652 }
 0x69a   :  { %5185 = vst [vmem:[#allocation46_spill] sm:$0xff] %v4457_v12 }
 0x69b   :  { %2676 = vrot.lane.b32.xlu0 %v4459_v32, %s3506_s27  ;;  %2164 = vrot.lane.b32.xlu1 %v4459_v32, %s3515_s29 }
 0x69d   :  { %v4465_v50 = vpop.permute.xlu0 %1884  ;;  %v4467_v23 = vpop.permute.xlu1 %2654 }
 0x69e   :  { %5186 = vst [vmem:[#allocation47_spill] sm:$0xff] %v4465_v50  ;;  %5187 = vst [vmem:[#allocation48_spill] sm:$0xff] %v4467_v23 }
 0x69f   :  { %2548 = vrot.lane.b32.xlu0 %v4459_v32, %s3505_s22  ;;  %2036 = vrot.lane.b32.xlu1 %v4459_v32, %s3512_s18 }
 0x6a1   :  { %v4473_v63 = vpop.permute.xlu0 %1886  ;;  %v4475_v22 = vpop.permute.xlu1 %2524 }
 0x6a2   :  { %5188 = vst [vmem:[#allocation49_spill] sm:$0xff] %v4473_v63  ;;  %5189 = vst [vmem:[#allocation50_spill] sm:$0xff] %v4475_v22 }
 0x6a3   :  { %2420 = vrot.lane.b32.xlu0 %v4459_v32, %s3517_s7  ;;  %1908 = vrot.lane.b32.xlu1 %v4459_v32, %s3511_s12 }
 0x6a5   :  { %v4481_v20 = vpop.permute.xlu0 %2650  ;;  %v4483_v16 = vpop.permute.xlu1 %2526 }
 0x6a6   :  { %5190 = vst [vmem:[#allocation51_spill] sm:$0xff] %v4481_v20  ;;  %5191 = vst [vmem:[#allocation52_spill] sm:$0xff] %v4483_v16 }
 0x6a7   :  { %2292 = vrot.lane.b32.xlu0 %v4459_v32, %s3516_s6  ;;  %2798 = vrot.lane.b32.xlu1 %v4132_v31, %s3507_s28 }
 0x6a9   :  { %v4489_v6 = vpop.permute.xlu0 %2522  ;;  %v2397_v47 = vpop.permute.xlu1 %2396 }
 0x6aa   :  { %5192 = vst [vmem:[#allocation53_spill] sm:$0xff] %v4489_v6 }
 0x6ab   :  { %2800 = vrot.lane.b32.xlu0 %v4135_v4, %s3507_s28  ;;  %2160 = vrot.lane.b32.xlu1 %v4135_v4, %s3515_s29 }
 0x6ad   :  { %v4495_v41 = vpop.permute.xlu0 %2394  ;;  %v4497_v53 = vpop.permute.xlu1 %2398 }
 0x6ae   :  { %5193 = vst [vmem:[#allocation54_spill] sm:$0xff] %v4495_v41  ;;  %5194 = vst [vmem:[#allocation55_spill] sm:$0xff] %v4497_v53  ;;  %v4501_v16 = vsel %vm5195_vm1, %v2397_v47, %v4497_v53  ;;  %v4505_v23 = vsel %vm5197_vm0, %v4495_v41, %v2397_v47 }
 0x6af   :  { %5196 = vst [vmem:[#allocation56_spill] sm:$0xff] %v4501_v16  ;;  %5198 = vst [vmem:[#allocation57_spill] sm:$0xff] %v4505_v23  ;;  %2158 = vrot.lane.b32.xlu0 %v4132_v31, %s3515_s29  ;;  %2030 = vrot.lane.b32.xlu1 %v4132_v31, %s3512_s18 }
 0x6b0   :  { %vm5216_vm1 = vmmov %vm5205_vm4 }
 0x6b1   :  { %v4511_v61 = vpop.permute.xlu0 %2266  ;;  %v4513_v6 = vpop.permute.xlu1 %2268  ;;  %vm5217_vm0 = vmmov %vm5216_vm1 }
 0x6b2   :  { %5199 = vst [vmem:[#allocation58_spill] sm:$0xff] %v4511_v61  ;;  %5200 = vst [vmem:[#allocation59_spill] sm:$0xff] %v4513_v6  ;;  %v2854_v61 = vld [vmem:[#allocation7] sm:$0xff]  ;;  %v2855_v6 = vld [vmem:[#allocation7 + $0x8] sm:$0xff] }
 0x6b3   :  { %2162 = vrot.lane.b32.xlu0 %v4118_v3, %s3515_s29  ;;  %1902 = vrot.lane.b32.xlu1 %v4132_v31, %s3511_s12  ;;  %v3457_v17 = vpack.i.bf16 %v2854_v61, %v2855_v6 }
 0x6b5   :  { %v2147_v16 = vpop.permute.xlu0 %2146  ;;  %v2787_v53 = vpop.permute.xlu1 %2786 }
 0x6b7   :  { %2032 = vrot.lane.b32.xlu0 %v4135_v4, %s3512_s18  ;;  %2280 = vrot.lane.b32.xlu1 %v4113_v1, %s3516_s6 }
 0x6b9   :  { %v2019_v47 = vpop.permute.xlu0 %2018  ;;  %v4523_v23 = vpop.permute.xlu1 %2658 }
 0x6bb   :  { %2034 = vrot.lane.b32.xlu0 %v4118_v3, %s3512_s18  ;;  %2270 = vrot.lane.b32.xlu1 %v4089_v56, %s3516_s6 }
 0x6bd   :  { %v1891_v41 = vpop.permute.xlu0 %1890  ;;  %v4529_v22 = vpop.permute.xlu1 %2530 }
 0x6bf   :  { %1904 = vrot.lane.b32.xlu0 %v4135_v4, %s3511_s12  ;;  %2672 = vrot.lane.b32.xlu1 %v4135_v4, %s3506_s27 }
 0x6c1   :  { %v2155_v46 = vpop.permute.xlu0 %2154  ;;  %v4535_v38 = vpop.permute.xlu1 %2402 }
 0x6c3   :  { %3458 = vrot.lane.b32.xlu0 %v3457_v17, %s3528_s19  ;;  %2674 = vrot.lane.b32.xlu1 %v4118_v3, %s3506_s27 }
 0x6c5   :  { %v2027_v51 = vpop.permute.xlu0 %2026  ;;  %v4540_v20 = vpop.permute.xlu1 %2274 }
 0x6c7   :  { %1906 = vrot.lane.b32.xlu0 %v4118_v3, %s3511_s12  ;;  %2792 = vrot.lane.b32.xlu1 %v4113_v1, %s3507_s28  ;;  %v2860_v1 = vld [vmem:[#allocation7 + $0x30] sm:$0x1] }
 0x6c9   :  { %v4546_v12 = vpop.permute.xlu0 %2788  ;;  %v1899_v6 = vpop.permute.xlu1 %1898 }
 0x6ca   :  { %v4550_v61 = vsel %vm231_vm14, %v2787_v53, %v4546_v12 }
 0x6cb   :  { %2282 = vrot.lane.b32.xlu0 %v4303_v40, %s3516_s6  ;;  %2544 = vrot.lane.b32.xlu1 %v4135_v4, %s3505_s22 }
 0x6cd   :  { %v2149_v17 = vpop.permute.xlu0 %2148  ;;  %v2667_v37 = vpop.permute.xlu1 %2666 }
 0x6ce   :  { %v4557_v26 = vsel %vm5201_vm3, %v2147_v16, %v2149_v17  ;;  %vm5218_vm3 = vcmask 900096  }
 0x6cf   :  { %2670 = vrot.lane.b32.xlu0 %v4132_v31, %s3506_s27  ;;  %2546 = vrot.lane.b32.xlu1 %v4118_v3, %s3505_s22 }
 0x6d1   :  { %v2021_v53 = vpop.permute.xlu0 %2020  ;;  %v2539_v63 = vpop.permute.xlu1 %2538 }
 0x6d2   :  { %v4564_v0 = vsel %vm5202_vm11, %v2019_v47, %v2021_v53  ;;  %vm5220_vm11 = vmmov %vm5218_vm3 }
 0x6d3   :  { %2804 = vrot.lane.b32.xlu0 %v4459_v32, %s3507_s28  ;;  %3032 = vrot.lane.b32.xlu1 %v2860_v1, %s3528_s19 }
 0x6d5   :  { %v1893_v35 = vpop.permute.xlu0 %1892  ;;  %v2411_v16 = vpop.permute.xlu1 %2410 }
 0x6d6   :  { %v4570_v33 = vsel %vm5203_vm15, %v1891_v41, %v1893_v35  ;;  %v3462_v41 = vpack.i.bf16 %v2858_v9, %v2859_v19  ;;  %vm5224_vm15 = vmmov %vm5218_vm3 }
 0x6d7   :  { %5204 = vst [vmem:[#allocation60_spill] sm:$0xff] %v4570_v33  ;;  %2542 = vrot.lane.b32.xlu0 %v4132_v31, %s3505_s22  ;;  %2416 = vrot.lane.b32.xlu1 %v4135_v4, %s3517_s7 }
 0x6d9   :  { %v1897_v47 = vpop.permute.xlu0 %1896  ;;  %v4576_v25 = vpop.permute.xlu1 %2790 }
 0x6da   :  { %v4579_v32 = vsel %vm5205_vm4, %v1897_v47, %v1899_v6  ;;  %vm5226_vm4 = vmmov %vm5218_vm3 }
 0x6db   :  { %5206 = vst [vmem:[#allocation61_spill] sm:$0xff] %v4579_v32  ;;  %2272 = vrot.lane.b32.xlu0 %v4187_v7, %s3516_s6  ;;  %2418 = vrot.lane.b32.xlu1 %v4118_v3, %s3517_s7 }
 0x6dd   :  { %v2663_v1 = vpop.permute.xlu0 %2662  ;;  %v2151_v60 = vpop.permute.xlu1 %2150 }
 0x6de   :  { %v4586_v62 = vsel %vm5207_vm7, %v2149_v17, %v2151_v60  ;;  %vm5228_vm7 = vcmask 908288  }
 0x6df   :  { %2414 = vrot.lane.b32.xlu0 %v4132_v31, %s3517_s7  ;;  %3463 = vrot.lane.b32.xlu1 %v3462_v41, %s3528_s19 }
 0x6e1   :  { %v2665_v50 = vpop.permute.xlu0 %2664  ;;  %v2153_v6 = vpop.permute.xlu1 %2152 }
 0x6e2   :  { %v4592_v32 = vsel %vm220_vm13, %v2663_v1, %v2665_v50  ;;  %v4595_v33 = vsel %vm5209_vm8, %v2151_v60, %v2153_v6  ;;  %v4598_v9 = vsel %vm5210_vm9, %v2153_v6, %v2155_v46  ;;  %v4601_v19 = vsel %vm220_vm13, %v2665_v50, %v2667_v37  ;;  %v2861_v46 = vld [vmem:[#allocation7 + $0x38] sm:$0x1]  ;;  %vm5230_vm8 = vmmov %vm5228_vm7 }
 0x6e3   :  { %5208 = vst [vmem:[#allocation62_spill] sm:$0xff] %v4592_v32  ;;  %2794 = vrot.lane.b32.xlu0 %v4303_v40, %s3507_s28  ;;  %2262 = vrot.lane.b32.xlu1 %v4086_v55, %s3516_s6  ;;  %vm3036_vm9 = vcmask 23552  }
 0x6e5   :  { %v2535_v17 = vpop.permute.xlu0 %2534  ;;  %v2023_v41 = vpop.permute.xlu1 %2022 }
 0x6e6   :  { %v4608_v11 = vsel %vm5211_vm2, %v2021_v53, %v2023_v41  ;;  %vm5237_vm2 = vcmask 916480  }
 0x6e7   :  { %2286 = vrot.lane.b32.xlu0 %v4132_v31, %s3516_s6  ;;  %2288 = vrot.lane.b32.xlu1 %v4135_v4, %s3516_s6 }
 0x6e9   :  { %v2537_v37 = vpop.permute.xlu0 %2536  ;;  %v2025_v50 = vpop.permute.xlu1 %2024 }
 0x6ea   :  { %v4615_v60 = vsel %vm209_vm12, %v2535_v17, %v2537_v37  ;;  %v4618_v40 = vsel %vm5213_vm5, %v2023_v41, %v2025_v50  ;;  %v4621_v6 = vsel %vm5214_vm6, %v2025_v50, %v2027_v51  ;;  %v4624_v53 = vsel %vm209_vm12, %v2537_v37, %v2539_v63  ;;  %vm5238_vm5 = vmmov %vm5237_vm2 }
 0x6eb   :  { %5212 = vst [vmem:[#allocation63_spill] sm:$0xff] %v4615_v60  ;;  %5215 = vst [vmem:[#allocation64_spill] sm:$0xff] %v4624_v53  ;;  %3034 = vrot.lane.b32.xlu0 %v2861_v46, %s3528_s19  ;;  %2290 = vrot.lane.b32.xlu1 %v4118_v3, %s3516_s6 }
 0x6ec   :  { %vm5239_vm6 = vmmov %vm5237_vm2 }
 0x6ed   :  { %v2407_v31 = vpop.permute.xlu0 %2406  ;;  %v1895_v4 = vpop.permute.xlu1 %1894 }
 0x6ee   :  { %v4630_v32 = vsel %vm5216_vm1, %v1895_v4, %v1897_v47  ;;  %v4633_v60 = vsel %vm5217_vm0, %v1893_v35, %v1895_v4  ;;  %vm5240_vm1 = vmmov %vm5237_vm2 }
 0x6ef   :  { %2260 = vrot.lane.b32.xlu0 %v4070_v49, %s3516_s6  ;;  %2802 = vrot.lane.b32.xlu1 %v4118_v3, %s3507_s28  ;;  %v3530_v3 = vmov 29   ;;  %vm5241_vm0 = vmmov %vm5240_vm1 }
 0x6f0   :  { %3467 = vset.pattern.permute.xlu0 %v3530_v3 }
 0x6f1   :  { %v2409_v51 = vpop.permute.xlu0 %2408  ;;  %v2661_v63 = vpop.permute.xlu1 %2660 }
 0x6f2   :  { %v4640_v41 = vsel %vm5218_vm3, %v2407_v31, %v2409_v51  ;;  %v4644_v46 = vsel %vm220_vm13, %v4523_v23, %v2661_v63  ;;  %v4647_v47 = vsel %vm220_vm13, %v2661_v63, %v2663_v1  ;;  %v4650_v35 = vsel %vm5220_vm11, %v2409_v51, %v2411_v16  ;;  %vm5242_vm3 = vmmov %vm5241_vm0 }
 0x6f3   :  { %5219 = vst [vmem:[#allocation65_spill] sm:$0xff] %v4640_v41  ;;  %5221 = vst [vmem:[#allocation66_spill] sm:$0xff] %v4650_v35  ;;  %2782 = vrot.lane.b32.xlu0 %v4089_v56, %s3507_s28  ;;  %2784 = vrot.lane.b32.xlu1 %v4187_v7, %s3507_s28  ;;  %v3006_v56 = vld [vmem:[#allocation7 + $0x18] ss:$0 sm:$0xff] }
 0x6f4   :  { %vm5243_vm11 = vmmov %vm5241_vm0 }
 0x6f5   :  { %v4656_v37 = vpop.permute.xlu0 %2278  ;;  %v2533_v50 = vpop.permute.xlu1 %2532 }
 0x6f6   :  { %5222 = vst [vmem:[#allocation67_spill] sm:$0xff] %v4656_v37  ;;  %v4660_v23 = vsel %vm209_vm12, %v4529_v22, %v2533_v50  ;;  %v4663_v1 = vsel %vm209_vm12, %v2533_v50, %v2535_v17 }
 0x6f7   :  { %5223 = vst [vmem:[#allocation68_spill] sm:$0xff] %v4660_v23  ;;  %2772 = vrot.lane.b32.xlu0 %v4070_v49, %s3507_s28  ;;  %2774 = vrot.lane.b32.xlu1 %v4086_v55, %s3507_s28 }
 0x6f9   :  { %v2157_v7 = vpop.permute.xlu0 %2156  ;;  %v2405_v16 = vpop.permute.xlu1 %2404 }
 0x6fa   :  { %v4671_v4 = vsel %vm5224_vm15, %v4535_v38, %v2405_v16  ;;  %v4674_v51 = vsel %vm5226_vm4, %v2405_v16, %v2407_v31  ;;  %vm5244_vm15 = vmmov %vm5241_vm0  ;;  %vm5245_vm4 = vcmask 1031168  }
 0x6fb   :  { %5225 = vst [vmem:[#allocation69_spill] sm:$0xff] %v4671_v4  ;;  %5227 = vst [vmem:[#allocation70_spill] sm:$0xff] %v4674_v51  ;;  %3009 = vperm.xlu0 %3467, %v3006_v56  }
 0x6fd   :  { %v4676_v22 = vpop.permute.xlu0 %2668  ;;  %v2277_v17 = vpop.permute.xlu1 %2276 }
 0x6fe   :  { %v4680_v49 = vsel %vm5228_vm7, %v4540_v20, %v2277_v17  ;;  %v4684_v55 = vsel %vm5230_vm8, %v2277_v17, %v4656_v37  ;;  %vm5246_vm7 = vmmov %vm5245_vm4 }
 0x6ff   :  { %5229 = vst [vmem:[#allocation71_spill] sm:$0xff] %v4680_v49  ;;  %5231 = vst [vmem:[#allocation72_spill] sm:$0xff] %v4684_v55 }
 0x700   :  { %vm5247_vm8 = vmmov %vm5241_vm0 }
 0x701   :  { %v4686_v63 = vpop.permute.xlu0 %2540  ;;  %v2797_v3 = vpop.permute.xlu1 %2796 }
 0x705   :  { %v4688_v38 = vpop.permute.xlu0 %2412  ;;  %v2029_v50 = vpop.permute.xlu1 %2028 }
 0x706   :  { %5232 = vst [vmem:[#allocation73_spill] sm:$0xff] %v4688_v38 }
 0x709   :  { %v4690_v31 = vpop.permute.xlu0 %2284  ;;  %v4692_v56 = vpop.permute.xlu1 %1900 }
 0x70a   :  { %5233 = vst [vmem:[#allocation74_spill] sm:$0xff] %v4690_v31 }
 0x70d   :  { %v4694_v16 = vpop.permute.xlu0 %2676  ;;  %v2165_v41 = vpop.permute.xlu1 %2164 }
 0x711   :  { %v4696_v35 = vpop.permute.xlu0 %2548  ;;  %v4698_v20 = vpop.permute.xlu1 %2036 }
 0x712   :  { %5234 = vst [vmem:[#allocation75_spill] sm:$0xff] %v4696_v35  ;;  %v2815_v35 = vsel %vm231_vm14, %v4546_v12, %v4576_v25  ;;  %v2810_v12 = vsel %vm231_vm14, %v4375_v54, %v4423_v45 }
 0x715   :  { %v4700_v49 = vpop.permute.xlu0 %2420  ;;  %v4702_v17 = vpop.permute.xlu1 %1908 }
 0x716   :  { %5235 = vst [vmem:[#allocation76_spill] sm:$0xff] %v4700_v49 }
 0x719   :  { %v4704_v37 = vpop.permute.xlu0 %2292  ;;  %v2799_v55 = vpop.permute.xlu1 %2798 }
 0x71a   :  { %5236 = vst [vmem:[#allocation77_spill] sm:$0xff] %v4704_v37  ;;  %v2818_v51 = vsel %vm231_vm14, %v2797_v3, %v2799_v55 }
 0x71d   :  { %v4706_v4 = vpop.permute.xlu0 %2800  ;;  %v2161_v53 = vpop.permute.xlu1 %2160 }
 0x71e   :  { %v2819_v31 = vsel %vm231_vm14, %v2799_v55, %v4706_v4  ;;  %v2811_v55 = vsel %vm231_vm14, %v4423_v45, %v4425_v36  ;;  %v2806_v45 = vsel %vm231_vm14, %v4219_v13, %v4265_v27  ;;  %v2167_v13 = vsel %vm5243_vm11, %v4273_v30, %v4311_v8 }
 0x71f   :  { %3152 = vmatprep.subr.mxu1 %v2819_v31 }
 0x720   :  { %3153 = vmatpush1.msra.mxu1 %v2818_v51 }
 0x721   :  { %v2159_v49 = vpop.permute.xlu0 %2158  ;;  %3154 = vmatprep.subr.mxu1 %v2815_v35  ;;  %v2031_v38 = vpop.permute.xlu1 %2030  ;;  %v2807_v35 = vsel %vm231_vm14, %v4265_v27, %v4301_v39 }
 0x722   :  { %v2178_v37 = vsel %vm5237_vm2, %v2157_v7, %v2159_v49  ;;  %3155 = vmatpush1.msra.mxu1 %v4550_v61  ;;  %v2179_v23 = vsel %vm5238_vm5, %v2159_v49, %v2161_v53  ;;  %v4729_v61 = vsel %vm3036_vm9, %v4053_v43, %v4055_v10  ;;  %vm5248_vm2 = vmmov %vm5241_vm0 }
 0x723   :  { %3051 = vmatprep.subr.mxu0 %v2179_v23  ;;  %3156 = vmatprep.subr.mxu1 %v2811_v55  ;;  %vm5249_vm5 = vmmov %vm5241_vm0 }
 0x724   :  { %3052 = vmatpush1.msra.mxu0 %v2178_v37  ;;  %3157 = vmatpush1.msra.mxu1 %v2810_v12  ;;  %v2171_v37 = vsel %vm5240_vm1, %v4431_v59, %v4433_v52  ;;  %vm5251_vm1 = vmmov %vm5245_vm4  ;;  %v5273_v12 = vmov 0.0  }
 0x725   :  { %v2163_v7 = vpop.permute.xlu0 %2162  ;;  %3053 = vmatprep.subr.mxu0 %v4586_v62  ;;  %3158 = vmatprep.subr.mxu1 %v2807_v35  ;;  %v1903_v23 = vpop.permute.xlu1 %1902  ;;  %v2170_v62 = vsel %vm5242_vm3, %v4357_v48, %v4431_v59  ;;  %v2050_v59 = vsel %vm5246_vm7, %v2029_v50, %v2031_v38  ;;  %vm5257_vm7 = vcmask 1039360   ;;  %v5266_v50 = vld [vmem:[#allocation45_spill] sm:$0xff] }
 0x726   :  { %v2180_v54 = vsel %vm5239_vm6, %v2161_v53, %v2163_v7  ;;  %3054 = vmatpush1.msra.mxu0 %v4557_v26  ;;  %3159 = vmatpush1.msra.mxu1 %v2806_v45  ;;  %v2181_v10 = vsel %vm5241_vm0, %v2163_v7, %v2165_v41  ;;  %v2166_v53 = vsel %vm5244_vm15, %v4225_v15, %v4273_v30  ;;  %vm5250_vm6 = vmmov %vm5241_vm0 }
 0x727   :  { %3055 = vmatprep.subr.mxu0 %v2171_v37  ;;  %3400 = vmatmul.mubr.msk.f32.vlgmr.msra.gmra.mxu1 %vm409_vm10, %v4729_v61  ;;  %v2173_v41 = vsel %vm5247_vm8, %v4439_v34, %v4399_v2  ;;  %v2172_v15 = vsel %vm5248_vm2, %v4433_v52, %v4439_v34  ;;  %v2168_v2 = vsel %vm5250_vm6, %v4311_v8, %v4319_v42  ;;  %vm5252_vm0 = vmmov %vm5251_vm1  ;;  %v1811_v37 = vld [vmem:[#allocation5 + $0x80] sm:$0xff] }
 0x728   :  { %3205 = vmatprep.subr.mxu1 %v2181_v10  ;;  %3056 = vmatpush1.msra.mxu0 %v2170_v62  ;;  %v2043_v34 = vsel %vm5252_vm0, %v4441_v5, %v4447_v58  ;;  %vm5253_vm3 = vmmov %vm5252_vm0  ;;  %v5278_v10 = vld [vmem:[#allocation44_spill] sm:$0xff]  ;;  %v1807_v62 = vld [vmem:[#allocation5 + $0x58] sm:$0xff] }
 0x729   :  { %3206 = vmatpush1.msra.mxu1 %v2180_v54  ;;  %v2033_v26 = vpop.permute.xlu0 %2032  ;;  %3057 = vmatprep.subr.mxu0 %v2167_v13  ;;  %v4749_v27 = vpop.permute.xlu1 %2280  ;;  %vm5254_vm11 = vmmov %vm5252_vm0 }
 0x72a   :  { %3207 = vmatprep.subr.mxu1 %v4598_v9  ;;  %3058 = vmatpush1.msra.mxu0 %v2166_v53  ;;  %v2051_v48 = vsel %vm5245_vm4, %v2031_v38, %v2033_v26  ;;  %v2169_v9 = vsel %vm5249_vm5, %v4319_v42, %v4241_v29  ;;  %v2042_v29 = vsel %vm5254_vm11, %v4383_v57, %v4441_v5  ;;  %vm5255_vm15 = vmmov %vm5252_vm0 }
 0x72b   :  { %3208 = vmatpush1.msra.mxu1 %v4595_v33  ;;  %3059 = vmatprep.subr.mxu0 %v2051_v48  ;;  %v2039_v8 = vsel %vm5255_vm15, %v4283_v14, %v4327_v44  ;;  %vm5256_vm4 = vmmov %vm5252_vm0  ;;  %v5280_v48 = vld [vmem:[#allocation19_spill] sm:$0xff] }
 0x72c   :  { %3209 = vmatprep.subr.mxu1 %v2173_v41  ;;  %3060 = vmatpush1.msra.mxu0 %v2050_v59  ;;  %v2038_v52 = vsel %vm5256_vm4, %v4233_v18, %v4283_v14  ;;  %vm5258_vm8 = vmmov %vm5257_vm7  ;;  %v1803_v59 = vld [vmem:[#allocation5 + $0x30] sm:$0xff]  ;;  %v5281_v41 = vld [vmem:[#allocation43_spill] sm:$0xff] }
 0x72d   :  { %3210 = vmatpush1.msra.mxu1 %v2172_v15  ;;  %v2035_v30 = vpop.permute.xlu0 %2034  ;;  %3061 = vmatprep.subr.mxu0 %v4608_v11  ;;  %v4768_v33 = vpop.permute.xlu1 %2270  ;;  %v1922_v5 = vsel %vm5258_vm8, %v4692_v56, %v1903_v23  ;;  %vm5259_vm2 = vmmov %vm5252_vm0  ;;  %v5270_v56 = vld [vmem:[#allocation15_spill] sm:$0xff] }
 0x72e   :  { %v2052_v51 = vsel %vm5251_vm1, %v2033_v26, %v2035_v30  ;;  %3211 = vmatprep.subr.mxu1 %v2169_v9  ;;  %3062 = vmatpush1.msra.mxu0 %v4564_v0  ;;  %v2053_v11 = vsel %vm5253_vm3, %v2035_v30, %v4698_v20  ;;  %v2045_v49 = vsel %vm5259_vm2, %v4455_v21, %v4407_v28  ;;  %vm5260_vm5 = vmmov %vm5252_vm0  ;;  %v5263_v28 = vld [vmem:[#allocation60_spill] sm:$0xff]  ;;  %v5271_v20 = vld [vmem:[#allocation22_spill] sm:$0xff] }
 0x72f   :  { %3212 = vmatpush1.msra.mxu1 %v2168_v2  ;;  %3063 = vmatprep.subr.mxu0 %v2043_v34  ;;  %v2044_v18 = vsel %vm5260_vm5, %v4447_v58, %v4455_v21  ;;  %vm5262_vm6 = vmmov %vm5252_vm0  ;;  %v5265_v58 = vld [vmem:[#allocation47_spill] sm:$0xff]  ;;  %v5279_v26 = vld [vmem:[#allocation61_spill] sm:$0xff] }
 0x730   :  { %3213 = vmatprep.subr.mxu1 %v2053_v11  ;;  %3064 = vmatpush1.msra.mxu0 %v2042_v29  ;;  %vm5264_vm1 = vmmov %vm5252_vm0  ;;  %v1802_v30 = vld [vmem:[#allocation5 + $0x28] sm:$0xff]  ;;  %v5286_v34 = vld [vmem:[#allocation21_spill] sm:$0xff] }
 0x731   :  { %3214 = vmatpush1.msra.mxu1 %v2052_v51  ;;  %v1905_v0 = vpop.permute.xlu0 %1904  ;;  %3065 = vmatprep.subr.mxu0 %v2039_v8  ;;  %v4786_v42 = vpop.permute.xlu1 %2672  ;;  %vm5267_vm0 = vmmov %vm5257_vm7  ;;  %v1799_v2 = vld [vmem:[#allocation5 + $0x8] sm:$0xff]  ;;  %v5285_v51 = vld [vmem:[#allocation16_spill] sm:$0xff] }
 0x732   :  { %3215 = vmatprep.subr.mxu1 %v4621_v6  ;;  %3066 = vmatpush1.msra.mxu0 %v2038_v52  ;;  %v1923_v57 = vsel %vm5257_vm7, %v1903_v23, %v1905_v0  ;;  %v5261_v6 = vld [vmem:[#allocation28_spill] sm:$0xff]  ;;  %v1915_v31 = vsel %vm5267_vm0, %v5266_v50, %v5265_v58  ;;  %vm5269_vm3 = vmmov %vm5267_vm0  ;;  %v5274_v23 = vld [vmem:[#allocation10_spill] sm:$0xff] }
 0x733   :  { %3216 = vmatpush1.msra.mxu1 %v4618_v40  ;;  %3067 = vmatprep.subr.mxu0 %v1923_v57  ;;  %v2041_v40 = vsel %vm5262_vm6, %v5261_v6, %v4249_v24  ;;  %v2040_v21 = vsel %vm5264_vm1, %v4327_v44, %v5261_v6  ;;  %vm5272_vm11 = vmmov %vm5267_vm0  ;;  %v1798_v8 = vld [vmem:[#allocation5] sm:$0xff]  ;;  %vm5308_vm1 = vcmask 900096  }
 0x734   :  { %3217 = vmatprep.subr.mxu1 %v2045_v49  ;;  %3068 = vmatpush1.msra.mxu0 %v1922_v5  ;;  %v1911_v55 = vsel %vm5272_vm11, %v5271_v20, %v5270_v56  ;;  %vm5275_vm15 = vmmov %vm5267_vm0  ;;  %v1813_v5 = vld [vmem:[#allocation5 + $0x90] sm:$0xff]  ;;  %v1812_v49 = vld [vmem:[#allocation5 + $0x88] sm:$0xff] }
 0x735   :  { %3218 = vmatpush1.msra.mxu1 %v2044_v18  ;;  %v4802_v14 = vpop.permute.xlu0 %3458  ;;  %3069 = vmatprep.subr.mxu0 %v4633_v60  ;;  %v4808_v3 = vpop.permute.xlu1 %2674  ;;  %v5268_v60 = vld [vmem:[#allocation39_spill] sm:$0xff]  ;;  %v1910_v45 = vsel %vm5275_vm15, %v5274_v23, %v5271_v20  ;;  %vm5276_vm4 = vmmov %vm5267_vm0  ;;  %vm5329_vm15 = vcmask 908288  }
 0x736   :  { %v3460_v38 = vunpack.i.l.bf16 %v4802_v14  ;;  %3219 = vmatprep.subr.mxu1 %v2041_v40  ;;  %3070 = vmatpush1.msra.mxu0 %v5263_v28  ;;  %v1914_v24 = vsel %vm5269_vm3, %v5268_v60, %v5266_v50  ;;  %vm5277_vm7 = vmmov %vm5267_vm0  ;;  %v1809_v18 = vld [vmem:[#allocation5 + $0x68] sm:$0xff]  ;;  %v5289_v28 = vld [vmem:[#allocation46_spill] sm:$0xff] }
 0x737   :  { %3220 = vmatpush1.msra.mxu1 %v2040_v21  ;;  %3071 = vmatprep.subr.mxu0 %v1915_v31  ;;  %vm5283_vm8 = vmmov %vm5267_vm0  ;;  %v5290_v21 = vld [vmem:[#allocation51_spill] sm:$0xff]  ;;  %v1805_v50 = vld [vmem:[#allocation5 + $0x40] sm:$0xff] }
 0x738   :  { %3072 = vmatpush1.msra.mxu0 %v1914_v24  ;;  %v4828_v44 = vsel %vm3036_vm9, %v3460_v38, %v4053_v43  ;;  %3198 = vmatprep.mubr.f32.mxu1 %v5273_v12  ;;  %vm5284_vm2 = vmmov %vm5267_vm0  ;;  %v5291_v31 = vld [vmem:[#allocation34_spill] sm:$0xff]  ;;  %v1804_v24 = vld [vmem:[#allocation5 + $0x38] sm:$0xff] }
 0x739   :  { %v1907_v35 = vpop.permute.xlu0 %1906  ;;  %3073 = vmatprep.subr.mxu0 %v1911_v55  ;;  %3115 = vmatprep.mubr.f32.mxu0 %v4828_v44  ;;  %v4832_v7 = vpop.permute.xlu1 %2792  ;;  %vm5287_vm5 = vmmov %vm5267_vm0  ;;  %v2682_v60 = vsel %vm220_vm13, %v5291_v31, %v5290_v21  ;;  %v5294_v23 = vld [vmem:[#allocation11_spill] sm:$0xff]  ;;  %v5311_v31 = vld [vmem:[#allocation70_spill] sm:$0xff] }
 0x73a   :  { %v1924_v54 = vsel %vm5276_vm4, %v1905_v0, %v1907_v35  ;;  %3074 = vmatpush1.msra.mxu0 %v1910_v45  ;;  %v1925_v43 = vsel %vm5277_vm7, %v1907_v35, %v4702_v17  ;;  %v5282_v17 = vld [vmem:[#allocation49_spill] sm:$0xff]  ;;  %v1913_v11 = vsel %vm5287_vm5, %v5286_v34, %v5285_v51  ;;  %vm5288_vm6 = vmmov %vm5267_vm0 }
 0x73b   :  { %3075 = vmatprep.subr.mxu0 %v1811_v37  ;;  %3221 = vmatprep.subr.mxu1 %v1925_v43  ;;  %v1917_v15 = vsel %vm5283_vm8, %v5282_v17, %v5281_v41  ;;  %v1916_v9 = vsel %vm5284_vm2, %v5265_v58, %v5282_v17  ;;  %v1912_v0 = vsel %vm5288_vm6, %v5270_v56, %v5286_v34  ;;  %v5293_v56 = vld [vmem:[#allocation30_spill] sm:$0xff]  ;;  %v5298_v41 = vld [vmem:[#allocation53_spill] sm:$0xff]  ;;  %vm5309_vm0 = vmmov %vm5308_vm1 }
 0x73c   :  { %3076 = vmatpush1.msra.mxu0 %v5278_v10  ;;  %3222 = vmatpush1.msra.mxu1 %v1924_v54  ;;  %v2683_v58 = vsel %vm220_vm13, %v5290_v21, %v5289_v28  ;;  %v2678_v45 = vsel %vm220_vm13, %v5294_v23, %v5293_v56  ;;  %v1800_v54 = vld [vmem:[#allocation5 + $0x10] sm:$0xff]  ;;  %v2693_v10 = vsel %vm220_vm13, %v4808_v3, %v4694_v16  ;;  %v5297_v16 = vld [vmem:[#allocation50_spill] sm:$0xff]  ;;  %v5304_v34 = vld [vmem:[#allocation17_spill] sm:$0xff] }
 0x73d   :  { %v4841_v13 = vpop.permute.xlu0 %2282  ;;  %3077 = vmatprep.subr.mxu0 %v1807_v62  ;;  %3223 = vmatprep.subr.mxu1 %v5279_v26  ;;  %v4844_v53 = vpop.permute.xlu1 %2544  ;;  %v2692_v62 = vsel %vm220_vm13, %v4786_v42, %v4808_v3  ;;  %v2555_v17 = vsel %vm209_vm12, %v5298_v41, %v5297_v16  ;;  %v5300_v3 = vld [vmem:[#allocation48_spill] sm:$0xff]  ;;  %vm5323_vm3 = vmmov %vm5309_vm0 }
 0x73e   :  { %3078 = vmatpush1.msra.mxu0 %v5280_v48  ;;  %3224 = vmatpush1.msra.mxu1 %v4630_v32  ;;  %v5295_v48 = vld [vmem:[#allocation68_spill] sm:$0xff]  ;;  %vm5327_vm11 = vmmov %vm5309_vm0 }
 0x73f   :  { %3079 = vmatprep.subr.mxu0 %v1803_v59  ;;  %3225 = vmatprep.subr.mxu1 %v1917_v15  ;;  %v5296_v59 = vld [vmem:[#allocation62_spill] sm:$0xff]  ;;  %vm5330_vm4 = vmmov %vm5329_vm15 }
 0x740   :  { %3080 = vmatpush1.msra.mxu0 %v1802_v30  ;;  %3226 = vmatpush1.msra.mxu1 %v1916_v9  ;;  %v5301_v30 = vld [vmem:[#allocation36_spill] sm:$0xff]  ;;  %v5302_v9 = vld [vmem:[#allocation25_spill] sm:$0xff]  ;;  %vm5332_vm7 = vmmov %vm5309_vm0 }
 0x741   :  { %v2671_v32 = vpop.permute.xlu0 %2670  ;;  %3081 = vmatprep.subr.mxu0 %v1799_v2  ;;  %3227 = vmatprep.subr.mxu1 %v1913_v11  ;;  %v4857_v29 = vpop.permute.xlu1 %2546  ;;  %v5303_v2 = vld [vmem:[#allocation32_spill] sm:$0xff]  ;;  %vm5333_vm8 = vmmov %vm5309_vm0 }
 0x742   :  { %v2690_v52 = vsel %vm220_vm13, %v4676_v22, %v2671_v32  ;;  %3082 = vmatpush1.msra.mxu0 %v1798_v8  ;;  %3228 = vmatpush1.msra.mxu1 %v1912_v0  ;;  %v2691_v57 = vsel %vm220_vm13, %v2671_v32, %v4786_v42  ;;  %v1808_v22 = vld [vmem:[#allocation5 + $0x60] sm:$0xff]  ;;  %v5299_v42 = vld [vmem:[#allocation40_spill] sm:$0xff]  ;;  %v2551_v51 = vsel %vm209_vm12, %v5303_v2, %v5302_v9  ;;  %vm5342_vm2 = vmmov %vm5330_vm4 }
 0x743   :  { %3083 = vmatprep.subr.mxu0 %v2691_v57  ;;  %3229 = vmatprep.subr.mxu1 %v1813_v5  ;;  %v2685_v15 = vsel %vm220_vm13, %v5300_v3, %v5299_v42  ;;  %v5305_v11 = vld [vmem:[#allocation24_spill] sm:$0xff]  ;;  %v5326_v42 = vld [vmem:[#allocation13_spill] sm:$0xff]  ;;  %vm5345_vm5 = vmmov %vm5309_vm0 }
 0x744   :  { %3084 = vmatpush2.msra.mxu0 %v2690_v52  ;;  %3230 = vmatpush1.msra.mxu1 %v1812_v49  ;;  %v2681_v32 = vsel %vm220_vm13, %v5305_v11, %v5304_v34  ;;  %v5306_v52 = vld [vmem:[#allocation12_spill] sm:$0xff]  ;;  %v5307_v49 = vld [vmem:[#allocation73_spill] sm:$0xff]  ;;  %vm5349_vm6 = vmmov %vm5342_vm2 }
 0x745   :  { %v4866_v6 = vpop.permute.xlu0 %2804  ;;  %3085 = vmatprep.subr.mxu0 %v4647_v47  ;;  %3231 = vmatprep.subr.mxu1 %v1809_v18  ;;  %v4869_v40 = vpop.permute.xlu1 %3032  ;;  %v5292_v47 = vld [vmem:[#allocation23_spill] sm:$0xff]  ;;  %v2550_v57 = vsel %vm209_vm12, %v5306_v52, %v5303_v2 }
 0x746   :  { %3086 = vmatpush2.msra.mxu0 %v4644_v46  ;;  %3232 = vmatpush1.msra.mxu1 %v1808_v22  ;;  %v2679_v20 = vsel %vm220_vm13, %v5293_v56, %v5292_v47  ;;  %v1801_v46 = vld [vmem:[#allocation5 + $0x18] sm:$0xff]  ;;  %v2680_v5 = vsel %vm220_vm13, %v5292_v47, %v5305_v11  ;;  %v5314_v56 = vld [vmem:[#allocation63_spill] sm:$0xff]  ;;  %v5334_v11 = vld [vmem:[#allocation72_spill] sm:$0xff] }
 0x747   :  { %3087 = vmatprep.subr.mxu0 %v2683_v58  ;;  %3233 = vmatprep.subr.mxu1 %v1805_v50  ;;  %v2564_v58 = vsel %vm209_vm12, %v4844_v53, %v4857_v29  ;;  %v5313_v47 = vld [vmem:[#allocation69_spill] sm:$0xff]  ;;  %v5336_v52 = vld [vmem:[#allocation71_spill] sm:$0xff] }
 0x748   :  { %3088 = vmatpush2.msra.mxu0 %v2682_v60  ;;  %3234 = vmatpush1.msra.mxu1 %v1804_v24  ;;  %v5312_v60 = vld [vmem:[#allocation64_spill] sm:$0xff] }
 0x749   :  { %v2543_v55 = vpop.permute.xlu0 %2542  ;;  %3089 = vmatprep.subr.mxu0 %v2679_v20  ;;  %3235 = vmatprep.subr.mxu1 %v1801_v46  ;;  %v4881_v35 = vpop.permute.xlu1 %2416  ;;  %v5315_v20 = vld [vmem:[#allocation41_spill] sm:$0xff]  ;;  %v5316_v46 = vld [vmem:[#allocation52_spill] sm:$0xff] }
 0x74a   :  { %v2562_v37 = vsel %vm209_vm12, %v4686_v63, %v2543_v55  ;;  %3090 = vmatpush2.msra.mxu0 %v2678_v45  ;;  %3236 = vmatpush1.msra.mxu1 %v1800_v54  ;;  %v2563_v43 = vsel %vm209_vm12, %v2543_v55, %v4844_v53  ;;  %v2557_v53 = vsel %vm209_vm12, %v5316_v46, %v5315_v20  ;;  %v5318_v55 = vld [vmem:[#allocation37_spill] sm:$0xff]  ;;  %v5348_v20 = vld [vmem:[#allocation35_spill] sm:$0xff] }
 0x74b   :  { %3091 = vmatprep.subr.mxu0 %v2563_v43  ;;  %3237 = vmatprep.subr.mxu1 %v2693_v10  ;;  %v5320_v45 = vld [vmem:[#allocation57_spill] sm:$0xff]  ;;  %v2556_v54 = vsel %vm209_vm12, %v5297_v16, %v5316_v46 }
 0x74c   :  { %3092 = vmatpush2.msra.mxu0 %v2562_v37  ;;  %3238 = vmatpush2.msra.mxu1 %v2692_v62  ;;  %v5321_v37 = vld [vmem:[#allocation27_spill] sm:$0xff]  ;;  %v5322_v43 = vld [vmem:[#allocation33_spill] sm:$0xff]  ;;  %v5324_v62 = vld [vmem:[#allocation18_spill] sm:$0xff] }
 0x74d   :  { %v4896_v26 = vpop.permute.xlu0 %2272  ;;  %3093 = vmatprep.subr.mxu0 %v4663_v1  ;;  %3239 = vmatprep.subr.mxu1 %v4601_v19  ;;  %v2419_v63 = vpop.permute.xlu1 %2418  ;;  %v2554_v1 = vsel %vm209_vm12, %v5301_v30, %v5298_v41  ;;  %v2684_v19 = vsel %vm220_vm13, %v5289_v28, %v5300_v3  ;;  %v5310_v28 = vld [vmem:[#allocation75_spill] sm:$0xff]  ;;  %vm5319_vm13 = vmmov %vm5309_vm0  ;;  %v2423_v10 = vsel %vm5323_vm3, %v5322_v43, %v5321_v37 }
 0x74e   :  { %3094 = vmatpush2.msra.mxu0 %v5295_v48  ;;  %3240 = vmatpush2.msra.mxu1 %v5296_v59  ;;  %v2565_v21 = vsel %vm209_vm12, %v4857_v29, %v5310_v28  ;;  %v5317_v29 = vld [vmem:[#allocation54_spill] sm:$0xff]  ;;  %v2422_v3 = vsel %vm5327_vm11, %v5326_v42, %v5322_v43 }
 0x74f   :  { %3095 = vmatprep.subr.mxu0 %v2555_v17  ;;  %3241 = vmatprep.subr.mxu1 %v2685_v15  ;;  %v2426_v23 = vsel %vm5319_vm13, %v5318_v55, %v5317_v29  ;;  %v5325_v48 = vld [vmem:[#allocation26_spill] sm:$0xff]  ;;  %v5351_v29 = vld [vmem:[#allocation29_spill] sm:$0xff] }
 0x750   :  { %3096 = vmatpush2.msra.mxu0 %v2554_v1  ;;  %3242 = vmatpush2.msra.mxu1 %v2684_v19  ;;  %v2553_v59 = vsel %vm209_vm12, %v5325_v48, %v5324_v62  ;;  %v2552_v16 = vsel %vm209_vm12, %v5302_v9, %v5325_v48  ;;  %v5328_v15 = vld [vmem:[#allocation74_spill] sm:$0xff]  ;;  %v5331_v19 = vld [vmem:[#allocation76_spill] sm:$0xff]  ;;  %vm5340_vm12 = vmmov %vm5330_vm4 }
 0x751   :  { %v2415_v8 = vpop.permute.xlu0 %2414  ;;  %3097 = vmatprep.subr.mxu0 %v2551_v51  ;;  %3243 = vmatprep.subr.mxu1 %v2681_v32  ;;  %v4920_v0 = vpop.permute.xlu1 %3463  ;;  %v2437_v2 = vsel %vm5332_vm7, %v2419_v63, %v5331_v19  ;;  %v2436_v51 = vsel %vm5333_vm8, %v4881_v35, %v2419_v63  ;;  %v5335_v9 = vld [vmem:[#allocation66_spill] sm:$0xff]  ;;  %v5356_v48 = vld [vmem:[#allocation77_spill] sm:$0xff] }
 0x752   :  { %v2434_v18 = vsel %vm5308_vm1, %v5307_v49, %v2415_v8  ;;  %3098 = vmatpush2.msra.mxu0 %v2550_v57  ;;  %3244 = vmatpush2.msra.mxu1 %v2680_v5  ;;  %v2435_v22 = vsel %vm5309_vm0, %v2415_v8, %v4881_v35  ;;  %v5337_v57 = vld [vmem:[#allocation65_spill] sm:$0xff]  ;;  %v5338_v5 = vld [vmem:[#allocation59_spill] sm:$0xff]  ;;  %v5339_v35 = vld [vmem:[#allocation58_spill] sm:$0xff] }
 0x753   :  { %3099 = vmatprep.subr.mxu0 %v2435_v22  ;;  %3245 = vmatprep.subr.mxu1 %v2565_v21  ;;  %v2299_v63 = vsel %vm5340_vm12, %v5339_v35, %v5338_v5  ;;  %v5341_v49 = vld [vmem:[#allocation38_spill] sm:$0xff]  ;;  %v3461_v22 = vunpack.i.h.bf16 %v4802_v14  ;;  %v5344_v21 = vld [vmem:[#allocation55_spill] sm:$0xff]  ;;  %vm5352_vm1 = vmmov %vm5309_vm0 }
 0x754   :  { %3100 = vmatpush2.msra.mxu0 %v2434_v18  ;;  %3246 = vmatpush2.msra.mxu1 %v2564_v58  ;;  %v2298_v18 = vsel %vm5342_vm2, %v5341_v49, %v5339_v35  ;;  %v5343_v28 = vld [vmem:[#allocation42_spill] sm:$0xff]  ;;  %vm5354_vm0 = vmmov %vm5342_vm2 }
 0x755   :  { %v4938_v50 = vpop.permute.xlu0 %2794  ;;  %3101 = vmatprep.subr.mxu0 %v5311_v31  ;;  %3247 = vmatprep.subr.mxu1 %v5312_v60  ;;  %v4942_v24 = vpop.permute.xlu1 %2262  ;;  %v2429_v58 = vsel %vm5345_vm5, %v5344_v21, %v5343_v28  ;;  %v3465_v31 = vunpack.i.l.bf16 %v4920_v0  ;;  %v5346_v60 = vld [vmem:[#allocation56_spill] sm:$0xff]  ;;  %vm5355_vm13 = vmmov %vm5352_vm1  ;;  %v3037_v62 = vsel %vm3036_vm9, %v3461_v22, %v3460_v38 }
 0x756   :  { %3102 = vmatpush2.msra.mxu0 %v5313_v47  ;;  %3248 = vmatpush2.msra.mxu1 %v5314_v56  ;;  %v5347_v56 = vld [vmem:[#allocation31_spill] sm:$0xff]  ;;  %vm5357_vm3 = vmmov %vm5354_vm0  ;;  %v2817_v38 = vsel %vm231_vm14, %v4832_v7, %v4938_v50 }
 0x757   :  { %3103 = vmatprep.subr.mxu0 %v5320_v45  ;;  %3249 = vmatprep.subr.mxu1 %v2557_v53  ;;  %v2295_v46 = vsel %vm5349_vm6, %v5348_v20, %v5347_v56  ;;  %v5350_v53 = vld [vmem:[#allocation20_spill] sm:$0xff]  ;;  %v5353_v45 = vld [vmem:[#allocation14_spill] sm:$0xff]  ;;  %vm5358_vm11 = vmmov %vm5354_vm0 }
 0x758   :  { %3104 = vmatpush2.msra.mxu0 %v2426_v23  ;;  %3250 = vmatpush2.msra.mxu1 %v2556_v54  ;;  %v2425_v55 = vsel %vm5352_vm1, %v5351_v29, %v5350_v53  ;;  %v2294_v54 = vsel %vm5354_vm0, %v5353_v45, %v5348_v20  ;;  %vm5362_vm7 = vmmov %vm5354_vm0 }
 0x759   :  { %v2287_v41 = vpop.permute.xlu0 %2286  ;;  %3105 = vmatprep.subr.mxu0 %v2423_v10  ;;  %3251 = vmatprep.subr.mxu1 %v2553_v59  ;;  %v2289_v17 = vpop.permute.xlu1 %2288  ;;  %v2301_v50 = vsel %vm5362_vm7, %v4768_v33, %v4896_v26  ;;  %vm5363_vm8 = vmmov %vm5354_vm0 }
 0x75a   :  { %v2306_v30 = vsel %vm5329_vm15, %v5328_v15, %v2287_v41  ;;  %3106 = vmatpush2.msra.mxu0 %v2422_v3  ;;  %3252 = vmatpush2.msra.mxu1 %v2552_v16  ;;  %v2307_v1 = vsel %vm5330_vm4, %v2287_v41, %v2289_v17  ;;  %v3466_v41 = vunpack.i.h.bf16 %v4920_v0  ;;  %vm5359_vm15 = vmmov %vm5354_vm0  ;;  %v5360_v0 = vld [vmem:[#allocation67_spill] sm:$0xff] }
 0x75b   :  { %3107 = vmatprep.subr.mxu0 %v2307_v1  ;;  %3253 = vmatprep.subr.mxu1 %v2437_v2  ;;  %v2305_v14 = vsel %vm5359_vm15, %v4749_v27, %v4841_v13  ;;  %vm5361_vm4 = vmmov %vm5354_vm0 }
 0x75c   :  { %3108 = vmatpush2.msra.mxu0 %v2306_v30  ;;  %3254 = vmatpush2.msra.mxu1 %v2436_v51  ;;  %v3040_v13 = vsel %vm3036_vm9, %v3466_v41, %v3465_v31  ;;  %vm5364_vm12 = vmmov %vm5354_vm0 }
 0x75d   :  { %v3035_v34 = vpop.permute.xlu0 %3034  ;;  %3109 = vmatprep.subr.mxu0 %v5334_v11  ;;  %3255 = vmatprep.subr.mxu1 %v5335_v9  ;;  %v2291_v32 = vpop.permute.xlu1 %2290 }
 0x75e   :  { %v4979_v8 = vsel %vm3036_vm9, %v4869_v40, %v3035_v34  ;;  %3110 = vmatpush2.msra.mxu0 %v5336_v52  ;;  %3256 = vmatpush2.msra.mxu1 %v5337_v57  ;;  %v2309_v59 = vsel %vm5357_vm3, %v2291_v32, %v5356_v48 }
 0x75f   :  { %3111 = vmatprep.subr.mxu0 %v2299_v63  ;;  %3401 = vmatmul.mubr.msk.f32.gmra.mxu1 %vm409_vm10, %v4979_v8 }
 0x760   :  { %3257 = vmatprep.subr.mxu1 %v2429_v58  ;;  %3112 = vmatpush2.msra.mxu0 %v2298_v18 }
 0x761   :  { %3258 = vmatpush2.msra.mxu1 %v5346_v60  ;;  %3269 = vmatprep.mubr.f32.mxu1 %v4828_v44  ;;  %v2261_v47 = vpop.permute.xlu0 %2260  ;;  %v2803_v23 = vpop.permute.xlu1 %2802  ;;  %v2424_v44 = vsel %vm5355_vm13, %v5321_v37, %v5351_v29  ;;  %v3041_v37 = vsel %vm3036_vm9, %v3465_v31, %v4869_v40  ;;  %v2304_v40 = vsel %vm5361_vm4, %v5360_v0, %v4749_v27  ;;  %vm5365_vm9 = vmmov %vm5354_vm0 }
 0x762   :  { %3113 = vmatprep.subr.mxu0 %v2295_v46  ;;  %3259 = vmatprep.subr.mxu1 %v2425_v55  ;;  %v2821_v43 = vsel %vm231_vm14, %v2803_v23, %v4866_v6  ;;  %v2820_v10 = vsel %vm231_vm14, %v4706_v4, %v2803_v23  ;;  %v2308_v6 = vsel %vm5358_vm11, %v2289_v17, %v2291_v32 }
 0x763   :  { %3114 = vmatpush2.msra.mxu0 %v2294_v54  ;;  %3260 = vmatpush2.msra.mxu1 %v2424_v44  ;;  %v2816_v17 = vsel %vm231_vm14, %v4576_v25, %v4832_v7  ;;  %v2300_v27 = vsel %vm5363_vm8, %v5338_v5, %v4768_v33  ;;  %v2297_v15 = vsel %vm5364_vm12, %v2261_v47, %v4942_v24 }
 0x764   :  { %3116 = vmatmul.mubr.f32.vlgmr.msra.gmra.mxu0 %v3037_v62  ;;  %3261 = vmatprep.subr.mxu1 %v2309_v59  ;;  %v2296_v26 = vsel %vm5365_vm9, %v5347_v56, %v2261_v47 }
 0x765   :  { %3306 = vmatprep.subr.mxu0 %v2821_v43  ;;  %3121 = vmatprep.mubr.f32.mxu0 %v3041_v37  ;;  %v2783_v4 = vpop.permute.xlu0 %2782  ;;  %v2785_v42 = vpop.permute.xlu1 %2784 }
 0x766   :  { %3262 = vmatpush2.msra.mxu1 %v2308_v6  ;;  %3307 = vmatpush1.msra.mxu0 %v2820_v10  ;;  %v2813_v3 = vsel %vm231_vm14, %v2783_v4, %v2785_v42  ;;  %v2812_v16 = vsel %vm231_vm14, %v4425_v36, %v2783_v4 }
 0x767   :  { %3263 = vmatprep.subr.mxu1 %v2305_v14  ;;  %3308 = vmatprep.subr.mxu0 %v2817_v38 }
 0x768   :  { %3264 = vmatpush2.msra.mxu1 %v2304_v40  ;;  %3309 = vmatpush1.msra.mxu0 %v2816_v17 }
 0x769   :  { %3122 = vmatmul.mubr.f32.gmra.mxu0 %v3040_v13  ;;  %3265 = vmatprep.subr.mxu1 %v2301_v50  ;;  %v2773_v25 = vpop.permute.xlu0 %2772  ;;  %v2775_v7 = vpop.permute.xlu1 %2774 }
 0x76a   :  { %3310 = vmatprep.subr.mxu0 %v2813_v3  ;;  %3266 = vmatpush2.msra.mxu1 %v2300_v27  ;;  %v2808_v36 = vsel %vm231_vm14, %v4301_v39, %v2773_v25  ;;  %v2809_v30 = vsel %vm231_vm14, %v2773_v25, %v2775_v7 }
 0x76b   :  { %3311 = vmatpush1.msra.mxu0 %v2812_v16  ;;  %3267 = vmatprep.subr.mxu1 %v2297_v15 }
 0x76c   :  { %3268 = vmatpush2.msra.mxu1 %v2296_v26  ;;  %3312 = vmatprep.subr.mxu0 %v2809_v30 }
 0x76d   :  { %3270 = vmatmul.mubr.f32.vlgmr.msra.gmra.mxu1 %v3037_v62  ;;  %3313 = vmatpush1.msra.mxu0 %v2808_v36 }
 0x76e   :  { %3275 = vmatprep.mubr.f32.mxu1 %v3041_v37  ;;  %3346 = vmatprep.mubr.f32.mxu0 %v5273_v12 }
 0x76f   :  { %3402 = vmatmul.mubr.msk.f32.vlgmr.msra.gmra.mxu0 %vm409_vm10, %v4729_v61 }
 0x770   :  { %3352 = vmatprep.mubr.f32.mxu0 %v5273_v12 }
 0x771   :  { %3276 = vmatmul.mubr.f32.gmra.mxu1 %v3040_v13 }
 0x773   :  { %3403 = vmatmul.mubr.msk.f32.gmra.mxu0 %vm409_vm10, %v4979_v8 }
 0x776   :  { %v3010_v33 = vpop.permute.xlu0 %3009 }
 0x7e7   :  { %v3194_v39 = vpop.f32.mrf.mxu1 }
 0x7e9   :  { %v3196_v1 = vpop.f32.mrf.mxu1 }
 0x81f   :  { %v3200_v51 = vpop.f32.mrf.mxu1 }
 0x821   :  { %v3202_v32 = vpop.f32.mrf.mxu1 }
 0x824   :  { %v3117_v24 = vpop.f32.mrf.mxu0 }
 0x825   :  { %v3118_v19 = vadd.f32 %v3117_v24, %v3010_v33 }
 0x826   :  { %v3119_v2 = vpop.f32.mrf.mxu0 }
 0x827   :  { %v3195_v34 = vadd.f32 %v3194_v39, %v3118_v19  ;;  %v3120_v11 = vadd.f32 %v3119_v2, %v3010_v33 }
 0x829   :  { %3359 = vst [vmem:[%s5084_s2] sm:$0xff] %v3195_v34  ;;  %v3197_v61 = vadd.f32 %v3196_v1, %v3120_v11  ;;  %v3123_v9 = vpop.f32.mrf.mxu0 }
 0x82a   :  { %v3124_v12 = vadd.f32 %v3123_v9, %v3010_v33 }
 0x82b   :  { %3360 = vst [vmem:[%s5084_s2 + $0x8] sm:$0xff] %v3197_v61  ;;  %v3125_v8 = vpop.f32.mrf.mxu0 }
 0x82c   :  { %v3201_v52 = vadd.f32 %v3200_v51, %v3124_v12  ;;  %v3126_v57 = vadd.f32 %v3125_v8, %v3010_v33 }
 0x82d   :  { %v3271_v5 = vpop.f32.mrf.mxu1 }
 0x82e   :  { %3363 = vst [vmem:[%s5084_s2 + $0x20] sm:$0x1] %v3201_v52  ;;  %v3203_v35 = vadd.f32 %v3202_v32, %v3126_v57  ;;  %v3272_v63 = vadd.f32 %v3271_v5, %v3010_v33 }
 0x82f   :  { %v3273_v49 = vpop.f32.mrf.mxu1  ;;  %v3348_v18 = vpop.f32.mrf.mxu0 }
 0x830   :  { %3364 = vst [vmem:[%s5084_s2 + $0x28] sm:$0x1] %v3203_v35  ;;  %v3274_v22 = vadd.f32 %v3273_v49, %v3010_v33  ;;  %v3349_v28 = vadd.f32 %v3348_v18, %v3272_v63 }
 0x831   :  { %v3277_v21 = vpop.f32.mrf.mxu1  ;;  %v3350_v58 = vpop.f32.mrf.mxu0 }
 0x832   :  { %3361 = vst [vmem:[%s5084_s2 + $0x10] sm:$0xff] %v3349_v28  ;;  %v3278_v31 = vadd.f32 %v3277_v21, %v3010_v33  ;;  %v3351_v60 = vadd.f32 %v3350_v58, %v3274_v22 }
 0x833   :  { %v3279_v47 = vpop.f32.mrf.mxu1  ;;  %v3354_v56 = vpop.f32.mrf.mxu0 }
 0x834   :  { %3362 = vst [vmem:[%s5084_s2 + $0x18] sm:$0xff] %v3351_v60  ;;  %v3280_v20 = vadd.f32 %v3279_v47, %v3010_v33  ;;  %v3355_v46 = vadd.f32 %v3354_v56, %v3278_v31 }
 0x835   :  { %v3356_v53 = vpop.f32.mrf.mxu0 }
 0x836   :  { %3365 = vst [vmem:[%s5084_s2 + $0x30] sm:$0x1] %v3355_v46  ;;  %v3357_v29 = vadd.f32 %v3356_v53, %v3280_v20 }
 0x838   :  { %3366 = vst [vmem:[%s5084_s2 + $0x38] sm:$0x1] %v3357_v29 }
 0x839   :  { %3371 = vsyncpa [#allocation8], 1 }

</bundles_post_ra>
